<compile_context>
chip_gen: v6e
topology: v6e:2x2x1
jax: 0.10.0
libtpu: 0.0.40
codegen_flags: <defaults>
</compile_context>

<pallas_src>
import math
import functools

import jax
import jax.numpy as jnp
from jax import lax
from jax.experimental import pallas as pl
from jax.experimental.pallas import tpu as pltpu


def _tensorcores_per_device():
    """Heuristic: megacore / dual-TC chips expose 2 TensorCores per device."""
    try:
        kind = jax.devices()[0].device_kind.lower()
    except Exception:
        return 1
    return 2 if any(tag in kind for tag in ("v4", "v5p", "v7", "7x")) else 1


def _attention_kernel(hid_ref, scan_ref,
                      wq_ref, bq_ref, wk_ref, bk_ref, wv_ref, bv_ref,
                      out_ref, *, num_heads, head_size):
    """One grid step == `nb` batch elements.

    hid_ref : (nb, T, H)                 hidden_states tile
    scan_ref: (nb, S, SH)                scan_encodings tile
    wq_ref  : (num_heads, H, head_size)  query weight, head-stacked (in, out)
    wk_ref  : (num_heads, SH, head_size) key weight
    wv_ref  : (num_heads, SH, head_size) value weight
    b*_ref  : (num_heads, 1, head_size)  biases, head-stacked
    out_ref : (nb, T, num_heads*head_size)
    """
    nb, T, H = hid_ref.shape
    _, S, SH = scan_ref.shape

    # Flatten batch into rows so each per-head projection is a single matmul.
    h = hid_ref[...].reshape(nb * T, H)      # (nb*T, H)
    s = scan_ref[...].reshape(nb * S, SH)    # (nb*S, SH)

    scale = 1.0 / math.sqrt(head_size)

    ctx_heads = []
    for hd in range(num_heads):
        # Per-head projections via leading-dim indexing (no lane-axis slicing).
        qh = jnp.dot(h, wq_ref[hd], preferred_element_type=jnp.float32) + bq_ref[hd]
        kh = jnp.dot(s, wk_ref[hd], preferred_element_type=jnp.float32) + bk_ref[hd]
        vh = jnp.dot(s, wv_ref[hd], preferred_element_type=jnp.float32) + bv_ref[hd]

        ctx_b = []
        for b in range(nb):  # static python loop; slices are sublane-aligned
            q_b = qh[b * T:(b + 1) * T, :]          # (T, dH)
            k_b = kh[b * S:(b + 1) * S, :]          # (S, dH)
            v_b = vh[b * S:(b + 1) * S, :]          # (S, dH)

            # Q @ K^T without an explicit transpose: contract last dims.
            scores = lax.dot_general(
                q_b, k_b, (((1,), (1,)), ((), ())),
                preferred_element_type=jnp.float32) * scale      # (T, S)

            # softmax over the scan (last) axis
            scores = scores - jnp.max(scores, axis=-1, keepdims=True)
            p = jnp.exp(scores)
            p = p * pl.reciprocal(jnp.sum(p, axis=-1, keepdims=True), approx=True)

            ctx_b.append(jnp.dot(p, v_b, preferred_element_type=jnp.float32))  # (T, dH)

        ctx_heads.append(ctx_b[0] if nb == 1 else jnp.concatenate(ctx_b, axis=0))

    # Assemble full context (heads along lanes) and do ONE lane-dense store.
    ctx = jnp.concatenate(ctx_heads, axis=-1)            # (nb*T, A)
    out_ref[...] = ctx.reshape(nb, T, num_heads * head_size).astype(out_ref.dtype)
    # TODO(synk): attention-prob dropout is identity at inference; stateful
    # pltpu.prng_* dropout could be added here for training mode.


def bert_scan_attention_heads(scan_encodings, hidden_states, attention_mask,
                              params, *, num_heads, batch_block=None):
    """attention_mask is accepted for signature parity but unused (matches reference)."""
    del attention_mask
    B, T, H = hidden_states.shape
    _, S, SH = scan_encodings.shape
    A = params["wq"].shape[0]            # all_head_size
    head_size = A // num_heads

    # Glue (wrapper-side reshapes are free): nn.Linear weights (out, in) ->
    # head-stacked (num_heads, in, head_size); biases -> (num_heads, 1, head_size).
    wq = params["wq"].T.reshape(H, num_heads, head_size).transpose(1, 0, 2)
    wk = params["wk"].T.reshape(SH, num_heads, head_size).transpose(1, 0, 2)
    wv = params["wv"].T.reshape(SH, num_heads, head_size).transpose(1, 0, 2)
    bq = params["bq"].reshape(num_heads, 1, head_size)
    bk = params["bk"].reshape(num_heads, 1, head_size)
    bv = params["bv"].reshape(num_heads, 1, head_size)

    if batch_block is None:
        # Single-TC chips (v5e/v6e): collapse batch into one grid step.
        # Dual-TC chips (v7x / megacore): keep a parallel batch axis.
        batch_block = 1 if (_tensorcores_per_device() > 1 and B > 1) else B
    assert B % batch_block == 0
    grid_b = B // batch_block

    kernel = functools.partial(_attention_kernel,
                               num_heads=num_heads, head_size=head_size)

    def run(weight_pipeline_mode):
        wkw = {} if weight_pipeline_mode is None else {"pipeline_mode": weight_pipeline_mode}

        def w_spec(shape):
            return pl.BlockSpec(shape, lambda b: (0, 0, 0), **wkw)

        out = pl.pallas_call(
            kernel,
            out_shape=jax.ShapeDtypeStruct((B, T, A), hidden_states.dtype),
            grid_spec=pltpu.PrefetchScalarGridSpec(
                num_scalar_prefetch=0,
                grid=(grid_b,),
                in_specs=[
                    pl.BlockSpec((batch_block, T, H), lambda b: (b, 0, 0)),   # hidden_states
                    pl.BlockSpec((batch_block, S, SH), lambda b: (b, 0, 0)),  # scan_encodings
                    w_spec((num_heads, H, head_size)),    # wq
                    w_spec((num_heads, 1, head_size)),    # bq
                    w_spec((num_heads, SH, head_size)),   # wk
                    w_spec((num_heads, 1, head_size)),    # bk
                    w_spec((num_heads, SH, head_size)),   # wv
                    w_spec((num_heads, 1, head_size)),    # bv
                ],
                out_specs=pl.BlockSpec((batch_block, T, A), lambda b: (b, 0, 0)),
            ),
            compiler_params=pltpu.CompilerParams(
                dimension_semantics=("parallel",)),
        )(hidden_states, scan_encodings, wq, bq, wk, bk, wv, bv)
        return jax.block_until_ready(out)

    try:
        # Constant operands across the grid: single-buffer to save VMEM.
        return run(pl.Buffered(1))
    except Exception:
        # TODO(synk): pl.Buffered(1) unsupported on this jax build; fall back
        # to default double-buffering (negligible at these sizes).
        return run(None)


def _reference(scan_encodings, hidden_states, params, num_heads):
    """Plain-JAX re-implementation of the PyTorch forward for validation."""
    A = params["wq"].shape[0]
    dH = A // num_heads
    B, T, _ = hidden_states.shape
    _, S, _ = scan_encodings.shape

    q = hidden_states @ params["wq"].T + params["bq"]
    k = scan_encodings @ params["wk"].T + params["bk"]
    v = scan_encodings @ params["wv"].T + params["bv"]

    def split(x, L):
        return x.reshape(B, L, num_heads, dH).transpose(0, 2, 1, 3)

    qh, kh, vh = split(q, T), split(k, S), split(v, S)
    scores = jnp.einsum("bhtd,bhsd->bhts", qh, kh) / math.sqrt(dH)
    probs = jax.nn.softmax(scores, axis=-1)
    ctx = jnp.einsum("bhts,bhsd->bhtd", probs, vh)
    return ctx.transpose(0, 2, 1, 3).reshape(B, T, A)


if __name__ == "__main__":
    # Small config consistent with the module:
    #   hidden_size=32, num_attention_heads=4 (head_size=8), scan_hidden_size=16
    #   batch=2, text seq len T=8, scan seq len S=16
    B, T, S = 2, 8, 16
    hidden_size, scan_hidden_size, num_heads = 32, 16, 4
    all_head_size = hidden_size  # num_heads * head_size

    key = jax.random.PRNGKey(0)
    k_hs, k_se, k_wq, k_bq, k_wk, k_bk, k_wv, k_bv = jax.random.split(key, 8)

    hidden_states = jax.random.normal(k_hs, (B, T, hidden_size), jnp.float32)
    scan_encodings = jax.random.normal(k_se, (B, S, scan_hidden_size), jnp.float32)
    attention_mask = jnp.zeros((B, 1, 1, S), jnp.float32)  # unused by the module

    def lin_init(kw, kb, out_f, in_f):
        bound = 1.0 / math.sqrt(in_f)
        w = jax.random.uniform(kw, (out_f, in_f), jnp.float32, -bound, bound)
        b = jax.random.uniform(kb, (out_f,), jnp.float32, -bound, bound)
        return w, b

    wq, bq = lin_init(k_wq, k_bq, all_head_size, hidden_size)
    wk, bk = lin_init(k_wk, k_bk, all_head_size, scan_hidden_size)
    wv, bv = lin_init(k_wv, k_bv, all_head_size, scan_hidden_size)
    params = {"wq": wq, "bq": bq, "wk": wk, "bk": bk, "wv": wv, "bv": bv}

    ref = _reference(scan_encodings, hidden_states, params, num_heads)

    # Default path (hardware-adaptive batch blocking).
    out = bert_scan_attention_heads(scan_encodings, hidden_states, attention_mask,
                                    params, num_heads=num_heads)
    out = jax.block_until_ready(out)
    assert out.shape == (B, T, all_head_size)
    # approx reciprocal in the softmax denom -> slightly loosened tolerance
    assert jnp.allclose(out, ref, atol=1e-2, rtol=1e-2), "mismatch vs reference (default path)"

    # Also exercise the per-batch-grid path (what v7x/megacore would pick).
    out_pb = bert_scan_attention_heads(scan_encodings, hidden_states, attention_mask,
                                       params, num_heads=num_heads, batch_block=1)
    out_pb = jax.block_until_ready(out_pb)
    assert jnp.allclose(out_pb, ref, atol=1e-2, rtol=1e-2), "mismatch vs reference (batched-grid path)"

    print("KERNEL_OK")
</pallas_src>

<mosaic_0001>
module attributes {stable_mosaic.version = 11 : i64} {
  func.func @_attention_kernel(%arg0: i32, %arg1: memref<2x8x32xf32, #tpu.memory_space<vmem>>, %arg2: memref<2x16x16xf32, #tpu.memory_space<vmem>>, %arg3: memref<4x32x8xf32, #tpu.memory_space<vmem>>, %arg4: memref<4x1x8xf32, #tpu.memory_space<vmem>>, %arg5: memref<4x16x8xf32, #tpu.memory_space<vmem>>, %arg6: memref<4x1x8xf32, #tpu.memory_space<vmem>>, %arg7: memref<4x16x8xf32, #tpu.memory_space<vmem>>, %arg8: memref<4x1x8xf32, #tpu.memory_space<vmem>>, %arg9: memref<2x8x32xf32, #tpu.memory_space<vmem>>) attributes {dimension_semantics = [#tpu.dimension_semantics<parallel>], iteration_bounds = array<i64: 1>, scalar_prefetch = 0 : i64, scratch_operands = 0 : i64, tpu.core_type = #tpu.core_type<tc>, window_params = [{transform_indices = @transform_0, window_bounds = array<i64: 2, 8, 32>}, {transform_indices = @transform_1, window_bounds = array<i64: 2, 16, 16>}, {pipeline_mode = #tpu.pipeline_mode<synchronous>, transform_indices = @transform_2, window_bounds = array<i64: 4, 32, 8>}, {pipeline_mode = #tpu.pipeline_mode<synchronous>, transform_indices = @transform_3, window_bounds = array<i64: 4, 1, 8>}, {pipeline_mode = #tpu.pipeline_mode<synchronous>, transform_indices = @transform_4, window_bounds = array<i64: 4, 16, 8>}, {pipeline_mode = #tpu.pipeline_mode<synchronous>, transform_indices = @transform_5, window_bounds = array<i64: 4, 1, 8>}, {pipeline_mode = #tpu.pipeline_mode<synchronous>, transform_indices = @transform_6, window_bounds = array<i64: 4, 16, 8>}, {pipeline_mode = #tpu.pipeline_mode<synchronous>, transform_indices = @transform_7, window_bounds = array<i64: 4, 1, 8>}, {transform_indices = @transform_8, window_bounds = array<i64: 2, 8, 32>}]} {
    %c0 = arith.constant 0 : index
    %c0_0 = arith.constant 0 : index
    %c0_1 = arith.constant 0 : index
    %0 = vector.load %arg1[%c0, %c0_0, %c0_1] : memref<2x8x32xf32, #tpu.memory_space<vmem>>, vector<2x8x32xf32>
    %1 = vector.shape_cast %0 : vector<2x8x32xf32> to vector<16x32xf32>
    %c0_2 = arith.constant 0 : index
    %c0_3 = arith.constant 0 : index
    %c0_4 = arith.constant 0 : index
    %2 = vector.load %arg2[%c0_2, %c0_3, %c0_4] : memref<2x16x16xf32, #tpu.memory_space<vmem>>, vector<2x16x16xf32>
    %3 = vector.shape_cast %2 : vector<2x16x16xf32> to vector<32x16xf32>
    %c0_5 = arith.constant 0 : index
    %c0_6 = arith.constant 0 : index
    %c0_7 = arith.constant 0 : index
    %4 = vector.load %arg3[%c0_5, %c0_6, %c0_7] : memref<4x32x8xf32, #tpu.memory_space<vmem>>, vector<1x32x8xf32>
    %5 = vector.shape_cast %4 : vector<1x32x8xf32> to vector<32x8xf32>
    %cst = arith.constant dense<0.000000e+00> : vector<16x8xf32>
    %6 = tpu.matmul %1, %5, %cst {dimension_numbers = #tpu.dot_dimension_numbers<[1], [0], [0], [1], [0, 0, 1, 1], [], []>} : vector<16x32xf32>, vector<32x8xf32>, vector<16x8xf32> -> vector<16x8xf32>
    %c0_8 = arith.constant 0 : index
    %c0_9 = arith.constant 0 : index
    %c0_10 = arith.constant 0 : index
    %7 = vector.load %arg4[%c0_8, %c0_9, %c0_10] : memref<4x1x8xf32, #tpu.memory_space<vmem>>, vector<1x1x8xf32>
    %8 = vector.shape_cast %7 : vector<1x1x8xf32> to vector<1x8xf32>
    %9 = vector.broadcast %8 : vector<1x8xf32> to vector<16x8xf32>
    %10 = arith.addf %6, %9 : vector<16x8xf32>
    %c0_11 = arith.constant 0 : index
    %c0_12 = arith.constant 0 : index
    %c0_13 = arith.constant 0 : index
    %11 = vector.load %arg5[%c0_11, %c0_12, %c0_13] : memref<4x16x8xf32, #tpu.memory_space<vmem>>, vector<1x16x8xf32>
    %12 = vector.shape_cast %11 : vector<1x16x8xf32> to vector<16x8xf32>
    %cst_14 = arith.constant dense<0.000000e+00> : vector<32x8xf32>
    %13 = tpu.matmul %3, %12, %cst_14 {dimension_numbers = #tpu.dot_dimension_numbers<[1], [0], [0], [1], [0, 0, 1, 1], [], []>} : vector<32x16xf32>, vector<16x8xf32>, vector<32x8xf32> -> vector<32x8xf32>
    %c0_15 = arith.constant 0 : index
    %c0_16 = arith.constant 0 : index
    %c0_17 = arith.constant 0 : index
    %14 = vector.load %arg6[%c0_15, %c0_16, %c0_17] : memref<4x1x8xf32, #tpu.memory_space<vmem>>, vector<1x1x8xf32>
    %15 = vector.shape_cast %14 : vector<1x1x8xf32> to vector<1x8xf32>
    %16 = vector.broadcast %15 : vector<1x8xf32> to vector<32x8xf32>
    %17 = arith.addf %13, %16 : vector<32x8xf32>
    %c0_18 = arith.constant 0 : index
    %c0_19 = arith.constant 0 : index
    %c0_20 = arith.constant 0 : index
    %18 = vector.load %arg7[%c0_18, %c0_19, %c0_20] : memref<4x16x8xf32, #tpu.memory_space<vmem>>, vector<1x16x8xf32>
    %19 = vector.shape_cast %18 : vector<1x16x8xf32> to vector<16x8xf32>
    %cst_21 = arith.constant dense<0.000000e+00> : vector<32x8xf32>
    %20 = tpu.matmul %3, %19, %cst_21 {dimension_numbers = #tpu.dot_dimension_numbers<[1], [0], [0], [1], [0, 0, 1, 1], [], []>} : vector<32x16xf32>, vector<16x8xf32>, vector<32x8xf32> -> vector<32x8xf32>
    %c0_22 = arith.constant 0 : index
    %c0_23 = arith.constant 0 : index
    %c0_24 = arith.constant 0 : index
    %21 = vector.load %arg8[%c0_22, %c0_23, %c0_24] : memref<4x1x8xf32, #tpu.memory_space<vmem>>, vector<1x1x8xf32>
    %22 = vector.shape_cast %21 : vector<1x1x8xf32> to vector<1x8xf32>
    %23 = vector.broadcast %22 : vector<1x8xf32> to vector<32x8xf32>
    %24 = arith.addf %20, %23 : vector<32x8xf32>
    %25 = vector.extract_strided_slice %10 {offsets = [0, 0], sizes = [8, 8], strides = [1, 1]} : vector<16x8xf32> to vector<8x8xf32>
    %26 = vector.extract_strided_slice %17 {offsets = [0, 0], sizes = [16, 8], strides = [1, 1]} : vector<32x8xf32> to vector<16x8xf32>
    %27 = vector.extract_strided_slice %24 {offsets = [0, 0], sizes = [16, 8], strides = [1, 1]} : vector<32x8xf32> to vector<16x8xf32>
    %cst_25 = arith.constant dense<0.000000e+00> : vector<8x16xf32>
    %28 = tpu.matmul %25, %26, %cst_25 {dimension_numbers = #tpu.dot_dimension_numbers<[1], [1], [0], [0], [0, 0, 1, 0], [], []>} : vector<8x8xf32>, vector<16x8xf32>, vector<8x16xf32> -> vector<8x16xf32>
    %cst_26 = arith.constant 0.353553385 : f32
    %29 = vector.broadcast %cst_26 : f32 to vector<8x16xf32>
    %30 = arith.mulf %28, %29 : vector<8x16xf32>
    %cst_27 = arith.constant dense<0xFF800000> : vector<8xf32>
    %31 = vector.multi_reduction <maximumf>, %30, %cst_27 [1] : vector<8x16xf32> to vector<8xf32>
    %32 = vector.shape_cast %31 : vector<8xf32> to vector<8x1xf32>
    %33 = vector.broadcast %32 : vector<8x1xf32> to vector<8x16xf32>
    %34 = arith.subf %30, %33 : vector<8x16xf32>
    %35 = math.exp %34 : vector<8x16xf32>
    %cst_28 = arith.constant dense<0.000000e+00> : vector<8xf32>
    %36 = vector.multi_reduction <add>, %35, %cst_28 [1] : vector<8x16xf32> to vector<8xf32>
    %37 = vector.shape_cast %36 : vector<8xf32> to vector<8x1xf32>
    %38 = tpu.reciprocal %37 {approx = true} : vector<8x1xf32> -> vector<8x1xf32>
    %39 = vector.broadcast %38 : vector<8x1xf32> to vector<8x16xf32>
    %40 = arith.mulf %35, %39 : vector<8x16xf32>
    %cst_29 = arith.constant dense<0.000000e+00> : vector<8x8xf32>
    %41 = tpu.matmul %40, %27, %cst_29 {dimension_numbers = #tpu.dot_dimension_numbers<[1], [0], [0], [1], [0, 0, 1, 1], [], []>} : vector<8x16xf32>, vector<16x8xf32>, vector<8x8xf32> -> vector<8x8xf32>
    %42 = vector.extract_strided_slice %10 {offsets = [8, 0], sizes = [8, 8], strides = [1, 1]} : vector<16x8xf32> to vector<8x8xf32>
    %43 = vector.extract_strided_slice %17 {offsets = [16, 0], sizes = [16, 8], strides = [1, 1]} : vector<32x8xf32> to vector<16x8xf32>
    %44 = vector.extract_strided_slice %24 {offsets = [16, 0], sizes = [16, 8], strides = [1, 1]} : vector<32x8xf32> to vector<16x8xf32>
    %cst_30 = arith.constant dense<0.000000e+00> : vector<8x16xf32>
    %45 = tpu.matmul %42, %43, %cst_30 {dimension_numbers = #tpu.dot_dimension_numbers<[1], [1], [0], [0], [0, 0, 1, 0], [], []>} : vector<8x8xf32>, vector<16x8xf32>, vector<8x16xf32> -> vector<8x16xf32>
    %cst_31 = arith.constant 0.353553385 : f32
    %46 = vector.broadcast %cst_31 : f32 to vector<8x16xf32>
    %47 = arith.mulf %45, %46 : vector<8x16xf32>
    %cst_32 = arith.constant dense<0xFF800000> : vector<8xf32>
    %48 = vector.multi_reduction <maximumf>, %47, %cst_32 [1] : vector<8x16xf32> to vector<8xf32>
    %49 = vector.shape_cast %48 : vector<8xf32> to vector<8x1xf32>
    %50 = vector.broadcast %49 : vector<8x1xf32> to vector<8x16xf32>
    %51 = arith.subf %47, %50 : vector<8x16xf32>
    %52 = math.exp %51 : vector<8x16xf32>
    %cst_33 = arith.constant dense<0.000000e+00> : vector<8xf32>
    %53 = vector.multi_reduction <add>, %52, %cst_33 [1] : vector<8x16xf32> to vector<8xf32>
    %54 = vector.shape_cast %53 : vector<8xf32> to vector<8x1xf32>
    %55 = tpu.reciprocal %54 {approx = true} : vector<8x1xf32> -> vector<8x1xf32>
    %56 = vector.broadcast %55 : vector<8x1xf32> to vector<8x16xf32>
    %57 = arith.mulf %52, %56 : vector<8x16xf32>
    %cst_34 = arith.constant dense<0.000000e+00> : vector<8x8xf32>
    %58 = tpu.matmul %57, %44, %cst_34 {dimension_numbers = #tpu.dot_dimension_numbers<[1], [0], [0], [1], [0, 0, 1, 1], [], []>} : vector<8x16xf32>, vector<16x8xf32>, vector<8x8xf32> -> vector<8x8xf32>
    %59 = tpu.concatenate %41, %58 in 0 : vector<8x8xf32>, vector<8x8xf32> -> vector<16x8xf32>
    %c1 = arith.constant 1 : index
    %c0_35 = arith.constant 0 : index
    %c0_36 = arith.constant 0 : index
    %60 = vector.load %arg3[%c1, %c0_35, %c0_36] : memref<4x32x8xf32, #tpu.memory_space<vmem>>, vector<1x32x8xf32>
    %61 = vector.shape_cast %60 : vector<1x32x8xf32> to vector<32x8xf32>
    %cst_37 = arith.constant dense<0.000000e+00> : vector<16x8xf32>
    %62 = tpu.matmul %1, %61, %cst_37 {dimension_numbers = #tpu.dot_dimension_numbers<[1], [0], [0], [1], [0, 0, 1, 1], [], []>} : vector<16x32xf32>, vector<32x8xf32>, vector<16x8xf32> -> vector<16x8xf32>
    %c1_38 = arith.constant 1 : index
    %c0_39 = arith.constant 0 : index
    %c0_40 = arith.constant 0 : index
    %63 = vector.load %arg4[%c1_38, %c0_39, %c0_40] : memref<4x1x8xf32, #tpu.memory_space<vmem>>, vector<1x1x8xf32>
    %64 = vector.shape_cast %63 : vector<1x1x8xf32> to vector<1x8xf32>
    %65 = vector.broadcast %64 : vector<1x8xf32> to vector<16x8xf32>
    %66 = arith.addf %62, %65 : vector<16x8xf32>
    %c1_41 = arith.constant 1 : index
    %c0_42 = arith.constant 0 : index
    %c0_43 = arith.constant 0 : index
    %67 = vector.load %arg5[%c1_41, %c0_42, %c0_43] : memref<4x16x8xf32, #tpu.memory_space<vmem>>, vector<1x16x8xf32>
    %68 = vector.shape_cast %67 : vector<1x16x8xf32> to vector<16x8xf32>
    %cst_44 = arith.constant dense<0.000000e+00> : vector<32x8xf32>
    %69 = tpu.matmul %3, %68, %cst_44 {dimension_numbers = #tpu.dot_dimension_numbers<[1], [0], [0], [1], [0, 0, 1, 1], [], []>} : vector<32x16xf32>, vector<16x8xf32>, vector<32x8xf32> -> vector<32x8xf32>
    %c1_45 = arith.constant 1 : index
    %c0_46 = arith.constant 0 : index
    %c0_47 = arith.constant 0 : index
    %70 = vector.load %arg6[%c1_45, %c0_46, %c0_47] : memref<4x1x8xf32, #tpu.memory_space<vmem>>, vector<1x1x8xf32>
    %71 = vector.shape_cast %70 : vector<1x1x8xf32> to vector<1x8xf32>
    %72 = vector.broadcast %71 : vector<1x8xf32> to vector<32x8xf32>
    %73 = arith.addf %69, %72 : vector<32x8xf32>
    %c1_48 = arith.constant 1 : index
    %c0_49 = arith.constant 0 : index
    %c0_50 = arith.constant 0 : index
    %74 = vector.load %arg7[%c1_48, %c0_49, %c0_50] : memref<4x16x8xf32, #tpu.memory_space<vmem>>, vector<1x16x8xf32>
    %75 = vector.shape_cast %74 : vector<1x16x8xf32> to vector<16x8xf32>
    %cst_51 = arith.constant dense<0.000000e+00> : vector<32x8xf32>
    %76 = tpu.matmul %3, %75, %cst_51 {dimension_numbers = #tpu.dot_dimension_numbers<[1], [0], [0], [1], [0, 0, 1, 1], [], []>} : vector<32x16xf32>, vector<16x8xf32>, vector<32x8xf32> -> vector<32x8xf32>
    %c1_52 = arith.constant 1 : index
    %c0_53 = arith.constant 0 : index
    %c0_54 = arith.constant 0 : index
    %77 = vector.load %arg8[%c1_52, %c0_53, %c0_54] : memref<4x1x8xf32, #tpu.memory_space<vmem>>, vector<1x1x8xf32>
    %78 = vector.shape_cast %77 : vector<1x1x8xf32> to vector<1x8xf32>
    %79 = vector.broadcast %78 : vector<1x8xf32> to vector<32x8xf32>
    %80 = arith.addf %76, %79 : vector<32x8xf32>
    %81 = vector.extract_strided_slice %66 {offsets = [0, 0], sizes = [8, 8], strides = [1, 1]} : vector<16x8xf32> to vector<8x8xf32>
    %82 = vector.extract_strided_slice %73 {offsets = [0, 0], sizes = [16, 8], strides = [1, 1]} : vector<32x8xf32> to vector<16x8xf32>
    %83 = vector.extract_strided_slice %80 {offsets = [0, 0], sizes = [16, 8], strides = [1, 1]} : vector<32x8xf32> to vector<16x8xf32>
    %cst_55 = arith.constant dense<0.000000e+00> : vector<8x16xf32>
    %84 = tpu.matmul %81, %82, %cst_55 {dimension_numbers = #tpu.dot_dimension_numbers<[1], [1], [0], [0], [0, 0, 1, 0], [], []>} : vector<8x8xf32>, vector<16x8xf32>, vector<8x16xf32> -> vector<8x16xf32>
    %cst_56 = arith.constant 0.353553385 : f32
    %85 = vector.broadcast %cst_56 : f32 to vector<8x16xf32>
    %86 = arith.mulf %84, %85 : vector<8x16xf32>
    %cst_57 = arith.constant dense<0xFF800000> : vector<8xf32>
    %87 = vector.multi_reduction <maximumf>, %86, %cst_57 [1] : vector<8x16xf32> to vector<8xf32>
    %88 = vector.shape_cast %87 : vector<8xf32> to vector<8x1xf32>
    %89 = vector.broadcast %88 : vector<8x1xf32> to vector<8x16xf32>
    %90 = arith.subf %86, %89 : vector<8x16xf32>
    %91 = math.exp %90 : vector<8x16xf32>
    %cst_58 = arith.constant dense<0.000000e+00> : vector<8xf32>
    %92 = vector.multi_reduction <add>, %91, %cst_58 [1] : vector<8x16xf32> to vector<8xf32>
    %93 = vector.shape_cast %92 : vector<8xf32> to vector<8x1xf32>
    %94 = tpu.reciprocal %93 {approx = true} : vector<8x1xf32> -> vector<8x1xf32>
    %95 = vector.broadcast %94 : vector<8x1xf32> to vector<8x16xf32>
    %96 = arith.mulf %91, %95 : vector<8x16xf32>
    %cst_59 = arith.constant dense<0.000000e+00> : vector<8x8xf32>
    %97 = tpu.matmul %96, %83, %cst_59 {dimension_numbers = #tpu.dot_dimension_numbers<[1], [0], [0], [1], [0, 0, 1, 1], [], []>} : vector<8x16xf32>, vector<16x8xf32>, vector<8x8xf32> -> vector<8x8xf32>
    %98 = vector.extract_strided_slice %66 {offsets = [8, 0], sizes = [8, 8], strides = [1, 1]} : vector<16x8xf32> to vector<8x8xf32>
    %99 = vector.extract_strided_slice %73 {offsets = [16, 0], sizes = [16, 8], strides = [1, 1]} : vector<32x8xf32> to vector<16x8xf32>
    %100 = vector.extract_strided_slice %80 {offsets = [16, 0], sizes = [16, 8], strides = [1, 1]} : vector<32x8xf32> to vector<16x8xf32>
    %cst_60 = arith.constant dense<0.000000e+00> : vector<8x16xf32>
    %101 = tpu.matmul %98, %99, %cst_60 {dimension_numbers = #tpu.dot_dimension_numbers<[1], [1], [0], [0], [0, 0, 1, 0], [], []>} : vector<8x8xf32>, vector<16x8xf32>, vector<8x16xf32> -> vector<8x16xf32>
    %cst_61 = arith.constant 0.353553385 : f32
    %102 = vector.broadcast %cst_61 : f32 to vector<8x16xf32>
    %103 = arith.mulf %101, %102 : vector<8x16xf32>
    %cst_62 = arith.constant dense<0xFF800000> : vector<8xf32>
    %104 = vector.multi_reduction <maximumf>, %103, %cst_62 [1] : vector<8x16xf32> to vector<8xf32>
    %105 = vector.shape_cast %104 : vector<8xf32> to vector<8x1xf32>
    %106 = vector.broadcast %105 : vector<8x1xf32> to vector<8x16xf32>
    %107 = arith.subf %103, %106 : vector<8x16xf32>
    %108 = math.exp %107 : vector<8x16xf32>
    %cst_63 = arith.constant dense<0.000000e+00> : vector<8xf32>
    %109 = vector.multi_reduction <add>, %108, %cst_63 [1] : vector<8x16xf32> to vector<8xf32>
    %110 = vector.shape_cast %109 : vector<8xf32> to vector<8x1xf32>
    %111 = tpu.reciprocal %110 {approx = true} : vector<8x1xf32> -> vector<8x1xf32>
    %112 = vector.broadcast %111 : vector<8x1xf32> to vector<8x16xf32>
    %113 = arith.mulf %108, %112 : vector<8x16xf32>
    %cst_64 = arith.constant dense<0.000000e+00> : vector<8x8xf32>
    %114 = tpu.matmul %113, %100, %cst_64 {dimension_numbers = #tpu.dot_dimension_numbers<[1], [0], [0], [1], [0, 0, 1, 1], [], []>} : vector<8x16xf32>, vector<16x8xf32>, vector<8x8xf32> -> vector<8x8xf32>
    %115 = tpu.concatenate %97, %114 in 0 : vector<8x8xf32>, vector<8x8xf32> -> vector<16x8xf32>
    %c2 = arith.constant 2 : index
    %c0_65 = arith.constant 0 : index
    %c0_66 = arith.constant 0 : index
    %116 = vector.load %arg3[%c2, %c0_65, %c0_66] : memref<4x32x8xf32, #tpu.memory_space<vmem>>, vector<1x32x8xf32>
    %117 = vector.shape_cast %116 : vector<1x32x8xf32> to vector<32x8xf32>
    %cst_67 = arith.constant dense<0.000000e+00> : vector<16x8xf32>
    %118 = tpu.matmul %1, %117, %cst_67 {dimension_numbers = #tpu.dot_dimension_numbers<[1], [0], [0], [1], [0, 0, 1, 1], [], []>} : vector<16x32xf32>, vector<32x8xf32>, vector<16x8xf32> -> vector<16x8xf32>
    %c2_68 = arith.constant 2 : index
    %c0_69 = arith.constant 0 : index
    %c0_70 = arith.constant 0 : index
    %119 = vector.load %arg4[%c2_68, %c0_69, %c0_70] : memref<4x1x8xf32, #tpu.memory_space<vmem>>, vector<1x1x8xf32>
    %120 = vector.shape_cast %119 : vector<1x1x8xf32> to vector<1x8xf32>
    %121 = vector.broadcast %120 : vector<1x8xf32> to vector<16x8xf32>
    %122 = arith.addf %118, %121 : vector<16x8xf32>
    %c2_71 = arith.constant 2 : index
    %c0_72 = arith.constant 0 : index
    %c0_73 = arith.constant 0 : index
    %123 = vector.load %arg5[%c2_71, %c0_72, %c0_73] : memref<4x16x8xf32, #tpu.memory_space<vmem>>, vector<1x16x8xf32>
    %124 = vector.shape_cast %123 : vector<1x16x8xf32> to vector<16x8xf32>
    %cst_74 = arith.constant dense<0.000000e+00> : vector<32x8xf32>
    %125 = tpu.matmul %3, %124, %cst_74 {dimension_numbers = #tpu.dot_dimension_numbers<[1], [0], [0], [1], [0, 0, 1, 1], [], []>} : vector<32x16xf32>, vector<16x8xf32>, vector<32x8xf32> -> vector<32x8xf32>
    %c2_75 = arith.constant 2 : index
    %c0_76 = arith.constant 0 : index
    %c0_77 = arith.constant 0 : index
    %126 = vector.load %arg6[%c2_75, %c0_76, %c0_77] : memref<4x1x8xf32, #tpu.memory_space<vmem>>, vector<1x1x8xf32>
    %127 = vector.shape_cast %126 : vector<1x1x8xf32> to vector<1x8xf32>
    %128 = vector.broadcast %127 : vector<1x8xf32> to vector<32x8xf32>
    %129 = arith.addf %125, %128 : vector<32x8xf32>
    %c2_78 = arith.constant 2 : index
    %c0_79 = arith.constant 0 : index
    %c0_80 = arith.constant 0 : index
    %130 = vector.load %arg7[%c2_78, %c0_79, %c0_80] : memref<4x16x8xf32, #tpu.memory_space<vmem>>, vector<1x16x8xf32>
    %131 = vector.shape_cast %130 : vector<1x16x8xf32> to vector<16x8xf32>
    %cst_81 = arith.constant dense<0.000000e+00> : vector<32x8xf32>
    %132 = tpu.matmul %3, %131, %cst_81 {dimension_numbers = #tpu.dot_dimension_numbers<[1], [0], [0], [1], [0, 0, 1, 1], [], []>} : vector<32x16xf32>, vector<16x8xf32>, vector<32x8xf32> -> vector<32x8xf32>
    %c2_82 = arith.constant 2 : index
    %c0_83 = arith.constant 0 : index
    %c0_84 = arith.constant 0 : index
    %133 = vector.load %arg8[%c2_82, %c0_83, %c0_84] : memref<4x1x8xf32, #tpu.memory_space<vmem>>, vector<1x1x8xf32>
    %134 = vector.shape_cast %133 : vector<1x1x8xf32> to vector<1x8xf32>
    %135 = vector.broadcast %134 : vector<1x8xf32> to vector<32x8xf32>
    %136 = arith.addf %132, %135 : vector<32x8xf32>
    %137 = vector.extract_strided_slice %122 {offsets = [0, 0], sizes = [8, 8], strides = [1, 1]} : vector<16x8xf32> to vector<8x8xf32>
    %138 = vector.extract_strided_slice %129 {offsets = [0, 0], sizes = [16, 8], strides = [1, 1]} : vector<32x8xf32> to vector<16x8xf32>
    %139 = vector.extract_strided_slice %136 {offsets = [0, 0], sizes = [16, 8], strides = [1, 1]} : vector<32x8xf32> to vector<16x8xf32>
    %cst_85 = arith.constant dense<0.000000e+00> : vector<8x16xf32>
    %140 = tpu.matmul %137, %138, %cst_85 {dimension_numbers = #tpu.dot_dimension_numbers<[1], [1], [0], [0], [0, 0, 1, 0], [], []>} : vector<8x8xf32>, vector<16x8xf32>, vector<8x16xf32> -> vector<8x16xf32>
    %cst_86 = arith.constant 0.353553385 : f32
    %141 = vector.broadcast %cst_86 : f32 to vector<8x16xf32>
    %142 = arith.mulf %140, %141 : vector<8x16xf32>
    %cst_87 = arith.constant dense<0xFF800000> : vector<8xf32>
    %143 = vector.multi_reduction <maximumf>, %142, %cst_87 [1] : vector<8x16xf32> to vector<8xf32>
    %144 = vector.shape_cast %143 : vector<8xf32> to vector<8x1xf32>
    %145 = vector.broadcast %144 : vector<8x1xf32> to vector<8x16xf32>
    %146 = arith.subf %142, %145 : vector<8x16xf32>
    %147 = math.exp %146 : vector<8x16xf32>
    %cst_88 = arith.constant dense<0.000000e+00> : vector<8xf32>
    %148 = vector.multi_reduction <add>, %147, %cst_88 [1] : vector<8x16xf32> to vector<8xf32>
    %149 = vector.shape_cast %148 : vector<8xf32> to vector<8x1xf32>
    %150 = tpu.reciprocal %149 {approx = true} : vector<8x1xf32> -> vector<8x1xf32>
    %151 = vector.broadcast %150 : vector<8x1xf32> to vector<8x16xf32>
    %152 = arith.mulf %147, %151 : vector<8x16xf32>
    %cst_89 = arith.constant dense<0.000000e+00> : vector<8x8xf32>
    %153 = tpu.matmul %152, %139, %cst_89 {dimension_numbers = #tpu.dot_dimension_numbers<[1], [0], [0], [1], [0, 0, 1, 1], [], []>} : vector<8x16xf32>, vector<16x8xf32>, vector<8x8xf32> -> vector<8x8xf32>
    %154 = vector.extract_strided_slice %122 {offsets = [8, 0], sizes = [8, 8], strides = [1, 1]} : vector<16x8xf32> to vector<8x8xf32>
    %155 = vector.extract_strided_slice %129 {offsets = [16, 0], sizes = [16, 8], strides = [1, 1]} : vector<32x8xf32> to vector<16x8xf32>
    %156 = vector.extract_strided_slice %136 {offsets = [16, 0], sizes = [16, 8], strides = [1, 1]} : vector<32x8xf32> to vector<16x8xf32>
    %cst_90 = arith.constant dense<0.000000e+00> : vector<8x16xf32>
    %157 = tpu.matmul %154, %155, %cst_90 {dimension_numbers = #tpu.dot_dimension_numbers<[1], [1], [0], [0], [0, 0, 1, 0], [], []>} : vector<8x8xf32>, vector<16x8xf32>, vector<8x16xf32> -> vector<8x16xf32>
    %cst_91 = arith.constant 0.353553385 : f32
    %158 = vector.broadcast %cst_91 : f32 to vector<8x16xf32>
    %159 = arith.mulf %157, %158 : vector<8x16xf32>
    %cst_92 = arith.constant dense<0xFF800000> : vector<8xf32>
    %160 = vector.multi_reduction <maximumf>, %159, %cst_92 [1] : vector<8x16xf32> to vector<8xf32>
    %161 = vector.shape_cast %160 : vector<8xf32> to vector<8x1xf32>
    %162 = vector.broadcast %161 : vector<8x1xf32> to vector<8x16xf32>
    %163 = arith.subf %159, %162 : vector<8x16xf32>
    %164 = math.exp %163 : vector<8x16xf32>
    %cst_93 = arith.constant dense<0.000000e+00> : vector<8xf32>
    %165 = vector.multi_reduction <add>, %164, %cst_93 [1] : vector<8x16xf32> to vector<8xf32>
    %166 = vector.shape_cast %165 : vector<8xf32> to vector<8x1xf32>
    %167 = tpu.reciprocal %166 {approx = true} : vector<8x1xf32> -> vector<8x1xf32>
    %168 = vector.broadcast %167 : vector<8x1xf32> to vector<8x16xf32>
    %169 = arith.mulf %164, %168 : vector<8x16xf32>
    %cst_94 = arith.constant dense<0.000000e+00> : vector<8x8xf32>
    %170 = tpu.matmul %169, %156, %cst_94 {dimension_numbers = #tpu.dot_dimension_numbers<[1], [0], [0], [1], [0, 0, 1, 1], [], []>} : vector<8x16xf32>, vector<16x8xf32>, vector<8x8xf32> -> vector<8x8xf32>
    %171 = tpu.concatenate %153, %170 in 0 : vector<8x8xf32>, vector<8x8xf32> -> vector<16x8xf32>
    %c3 = arith.constant 3 : index
    %c0_95 = arith.constant 0 : index
    %c0_96 = arith.constant 0 : index
    %172 = vector.load %arg3[%c3, %c0_95, %c0_96] : memref<4x32x8xf32, #tpu.memory_space<vmem>>, vector<1x32x8xf32>
    %173 = vector.shape_cast %172 : vector<1x32x8xf32> to vector<32x8xf32>
    %cst_97 = arith.constant dense<0.000000e+00> : vector<16x8xf32>
    %174 = tpu.matmul %1, %173, %cst_97 {dimension_numbers = #tpu.dot_dimension_numbers<[1], [0], [0], [1], [0, 0, 1, 1], [], []>} : vector<16x32xf32>, vector<32x8xf32>, vector<16x8xf32> -> vector<16x8xf32>
    %c3_98 = arith.constant 3 : index
    %c0_99 = arith.constant 0 : index
    %c0_100 = arith.constant 0 : index
    %175 = vector.load %arg4[%c3_98, %c0_99, %c0_100] : memref<4x1x8xf32, #tpu.memory_space<vmem>>, vector<1x1x8xf32>
    %176 = vector.shape_cast %175 : vector<1x1x8xf32> to vector<1x8xf32>
    %177 = vector.broadcast %176 : vector<1x8xf32> to vector<16x8xf32>
    %178 = arith.addf %174, %177 : vector<16x8xf32>
    %c3_101 = arith.constant 3 : index
    %c0_102 = arith.constant 0 : index
    %c0_103 = arith.constant 0 : index
    %179 = vector.load %arg5[%c3_101, %c0_102, %c0_103] : memref<4x16x8xf32, #tpu.memory_space<vmem>>, vector<1x16x8xf32>
    %180 = vector.shape_cast %179 : vector<1x16x8xf32> to vector<16x8xf32>
    %cst_104 = arith.constant dense<0.000000e+00> : vector<32x8xf32>
    %181 = tpu.matmul %3, %180, %cst_104 {dimension_numbers = #tpu.dot_dimension_numbers<[1], [0], [0], [1], [0, 0, 1, 1], [], []>} : vector<32x16xf32>, vector<16x8xf32>, vector<32x8xf32> -> vector<32x8xf32>
    %c3_105 = arith.constant 3 : index
    %c0_106 = arith.constant 0 : index
    %c0_107 = arith.constant 0 : index
    %182 = vector.load %arg6[%c3_105, %c0_106, %c0_107] : memref<4x1x8xf32, #tpu.memory_space<vmem>>, vector<1x1x8xf32>
    %183 = vector.shape_cast %182 : vector<1x1x8xf32> to vector<1x8xf32>
    %184 = vector.broadcast %183 : vector<1x8xf32> to vector<32x8xf32>
    %185 = arith.addf %181, %184 : vector<32x8xf32>
    %c3_108 = arith.constant 3 : index
    %c0_109 = arith.constant 0 : index
    %c0_110 = arith.constant 0 : index
    %186 = vector.load %arg7[%c3_108, %c0_109, %c0_110] : memref<4x16x8xf32, #tpu.memory_space<vmem>>, vector<1x16x8xf32>
    %187 = vector.shape_cast %186 : vector<1x16x8xf32> to vector<16x8xf32>
    %cst_111 = arith.constant dense<0.000000e+00> : vector<32x8xf32>
    %188 = tpu.matmul %3, %187, %cst_111 {dimension_numbers = #tpu.dot_dimension_numbers<[1], [0], [0], [1], [0, 0, 1, 1], [], []>} : vector<32x16xf32>, vector<16x8xf32>, vector<32x8xf32> -> vector<32x8xf32>
    %c3_112 = arith.constant 3 : index
    %c0_113 = arith.constant 0 : index
    %c0_114 = arith.constant 0 : index
    %189 = vector.load %arg8[%c3_112, %c0_113, %c0_114] : memref<4x1x8xf32, #tpu.memory_space<vmem>>, vector<1x1x8xf32>
    %190 = vector.shape_cast %189 : vector<1x1x8xf32> to vector<1x8xf32>
    %191 = vector.broadcast %190 : vector<1x8xf32> to vector<32x8xf32>
    %192 = arith.addf %188, %191 : vector<32x8xf32>
    %193 = vector.extract_strided_slice %178 {offsets = [0, 0], sizes = [8, 8], strides = [1, 1]} : vector<16x8xf32> to vector<8x8xf32>
    %194 = vector.extract_strided_slice %185 {offsets = [0, 0], sizes = [16, 8], strides = [1, 1]} : vector<32x8xf32> to vector<16x8xf32>
    %195 = vector.extract_strided_slice %192 {offsets = [0, 0], sizes = [16, 8], strides = [1, 1]} : vector<32x8xf32> to vector<16x8xf32>
    %cst_115 = arith.constant dense<0.000000e+00> : vector<8x16xf32>
    %196 = tpu.matmul %193, %194, %cst_115 {dimension_numbers = #tpu.dot_dimension_numbers<[1], [1], [0], [0], [0, 0, 1, 0], [], []>} : vector<8x8xf32>, vector<16x8xf32>, vector<8x16xf32> -> vector<8x16xf32>
    %cst_116 = arith.constant 0.353553385 : f32
    %197 = vector.broadcast %cst_116 : f32 to vector<8x16xf32>
    %198 = arith.mulf %196, %197 : vector<8x16xf32>
    %cst_117 = arith.constant dense<0xFF800000> : vector<8xf32>
    %199 = vector.multi_reduction <maximumf>, %198, %cst_117 [1] : vector<8x16xf32> to vector<8xf32>
    %200 = vector.shape_cast %199 : vector<8xf32> to vector<8x1xf32>
    %201 = vector.broadcast %200 : vector<8x1xf32> to vector<8x16xf32>
    %202 = arith.subf %198, %201 : vector<8x16xf32>
    %203 = math.exp %202 : vector<8x16xf32>
    %cst_118 = arith.constant dense<0.000000e+00> : vector<8xf32>
    %204 = vector.multi_reduction <add>, %203, %cst_118 [1] : vector<8x16xf32> to vector<8xf32>
    %205 = vector.shape_cast %204 : vector<8xf32> to vector<8x1xf32>
    %206 = tpu.reciprocal %205 {approx = true} : vector<8x1xf32> -> vector<8x1xf32>
    %207 = vector.broadcast %206 : vector<8x1xf32> to vector<8x16xf32>
    %208 = arith.mulf %203, %207 : vector<8x16xf32>
    %cst_119 = arith.constant dense<0.000000e+00> : vector<8x8xf32>
    %209 = tpu.matmul %208, %195, %cst_119 {dimension_numbers = #tpu.dot_dimension_numbers<[1], [0], [0], [1], [0, 0, 1, 1], [], []>} : vector<8x16xf32>, vector<16x8xf32>, vector<8x8xf32> -> vector<8x8xf32>
    %210 = vector.extract_strided_slice %178 {offsets = [8, 0], sizes = [8, 8], strides = [1, 1]} : vector<16x8xf32> to vector<8x8xf32>
    %211 = vector.extract_strided_slice %185 {offsets = [16, 0], sizes = [16, 8], strides = [1, 1]} : vector<32x8xf32> to vector<16x8xf32>
    %212 = vector.extract_strided_slice %192 {offsets = [16, 0], sizes = [16, 8], strides = [1, 1]} : vector<32x8xf32> to vector<16x8xf32>
    %cst_120 = arith.constant dense<0.000000e+00> : vector<8x16xf32>
    %213 = tpu.matmul %210, %211, %cst_120 {dimension_numbers = #tpu.dot_dimension_numbers<[1], [1], [0], [0], [0, 0, 1, 0], [], []>} : vector<8x8xf32>, vector<16x8xf32>, vector<8x16xf32> -> vector<8x16xf32>
    %cst_121 = arith.constant 0.353553385 : f32
    %214 = vector.broadcast %cst_121 : f32 to vector<8x16xf32>
    %215 = arith.mulf %213, %214 : vector<8x16xf32>
    %cst_122 = arith.constant dense<0xFF800000> : vector<8xf32>
    %216 = vector.multi_reduction <maximumf>, %215, %cst_122 [1] : vector<8x16xf32> to vector<8xf32>
    %217 = vector.shape_cast %216 : vector<8xf32> to vector<8x1xf32>
    %218 = vector.broadcast %217 : vector<8x1xf32> to vector<8x16xf32>
    %219 = arith.subf %215, %218 : vector<8x16xf32>
    %220 = math.exp %219 : vector<8x16xf32>
    %cst_123 = arith.constant dense<0.000000e+00> : vector<8xf32>
    %221 = vector.multi_reduction <add>, %220, %cst_123 [1] : vector<8x16xf32> to vector<8xf32>
    %222 = vector.shape_cast %221 : vector<8xf32> to vector<8x1xf32>
    %223 = tpu.reciprocal %222 {approx = true} : vector<8x1xf32> -> vector<8x1xf32>
    %224 = vector.broadcast %223 : vector<8x1xf32> to vector<8x16xf32>
    %225 = arith.mulf %220, %224 : vector<8x16xf32>
    %cst_124 = arith.constant dense<0.000000e+00> : vector<8x8xf32>
    %226 = tpu.matmul %225, %212, %cst_124 {dimension_numbers = #tpu.dot_dimension_numbers<[1], [0], [0], [1], [0, 0, 1, 1], [], []>} : vector<8x16xf32>, vector<16x8xf32>, vector<8x8xf32> -> vector<8x8xf32>
    %227 = tpu.concatenate %209, %226 in 0 : vector<8x8xf32>, vector<8x8xf32> -> vector<16x8xf32>
    %228 = tpu.concatenate %59, %115, %171, %227 in 1 : vector<16x8xf32>, vector<16x8xf32>, vector<16x8xf32>, vector<16x8xf32> -> vector<16x32xf32>
    %229 = vector.shape_cast %228 : vector<16x32xf32> to vector<2x8x32xf32>
    %c0_125 = arith.constant 0 : index
    %c0_126 = arith.constant 0 : index
    %c0_127 = arith.constant 0 : index
    %230 = vector.load %arg9[%c0_125, %c0_126, %c0_127] : memref<2x8x32xf32, #tpu.memory_space<vmem>>, vector<2x8x32xf32>
    tpu.vector_store %arg9[%c0_125, %c0_126, %c0_127], %229 {strides = array<i32>} : memref<2x8x32xf32, #tpu.memory_space<vmem>>, vector<2x8x32xf32>,
    return
  }
  func.func @transform_0(%arg0: i32) -> (i32, i32, i32) {
    %c0_i32 = arith.constant 0 : i32
    %c0_i32_0 = arith.constant 0 : i32
    %c0_i32_1 = arith.constant 0 : i32
    return %arg0, %c0_i32, %c0_i32_0 : i32, i32, i32
  }
  func.func @transform_1(%arg0: i32) -> (i32, i32, i32) {
    %c0_i32 = arith.constant 0 : i32
    %c0_i32_0 = arith.constant 0 : i32
    %c0_i32_1 = arith.constant 0 : i32
    return %arg0, %c0_i32, %c0_i32_0 : i32, i32, i32
  }
  func.func @transform_2(%arg0: i32) -> (i32, i32, i32) {
    %c0_i32 = arith.constant 0 : i32
    %c0_i32_0 = arith.constant 0 : i32
    %c0_i32_1 = arith.constant 0 : i32
    %c0_i32_2 = arith.constant 0 : i32
    return %c0_i32, %c0_i32_0, %c0_i32_1 : i32, i32, i32
  }
  func.func @transform_3(%arg0: i32) -> (i32, i32, i32) {
    %c0_i32 = arith.constant 0 : i32
    %c0_i32_0 = arith.constant 0 : i32
    %c0_i32_1 = arith.constant 0 : i32
    %c0_i32_2 = arith.constant 0 : i32
    return %c0_i32, %c0_i32_0, %c0_i32_1 : i32, i32, i32
  }
  func.func @transform_4(%arg0: i32) -> (i32, i32, i32) {
    %c0_i32 = arith.constant 0 : i32
    %c0_i32_0 = arith.constant 0 : i32
    %c0_i32_1 = arith.constant 0 : i32
    %c0_i32_2 = arith.constant 0 : i32
    return %c0_i32, %c0_i32_0, %c0_i32_1 : i32, i32, i32
  }
  func.func @transform_5(%arg0: i32) -> (i32, i32, i32) {
    %c0_i32 = arith.constant 0 : i32
    %c0_i32_0 = arith.constant 0 : i32
    %c0_i32_1 = arith.constant 0 : i32
    %c0_i32_2 = arith.constant 0 : i32
    return %c0_i32, %c0_i32_0, %c0_i32_1 : i32, i32, i32
  }
  func.func @transform_6(%arg0: i32) -> (i32, i32, i32) {
    %c0_i32 = arith.constant 0 : i32
    %c0_i32_0 = arith.constant 0 : i32
    %c0_i32_1 = arith.constant 0 : i32
    %c0_i32_2 = arith.constant 0 : i32
    return %c0_i32, %c0_i32_0, %c0_i32_1 : i32, i32, i32
  }
  func.func @transform_7(%arg0: i32) -> (i32, i32, i32) {
    %c0_i32 = arith.constant 0 : i32
    %c0_i32_0 = arith.constant 0 : i32
    %c0_i32_1 = arith.constant 0 : i32
    %c0_i32_2 = arith.constant 0 : i32
    return %c0_i32, %c0_i32_0, %c0_i32_1 : i32, i32, i32
  }
  func.func @transform_8(%arg0: i32) -> (i32, i32, i32) {
    %c0_i32 = arith.constant 0 : i32
    %c0_i32_0 = arith.constant 0 : i32
    %c0_i32_1 = arith.constant 0 : i32
    return %arg0, %c0_i32, %c0_i32_0 : i32, i32, i32
  }
}

module attributes {stable_mosaic.version = 11 : i64} {
  func.func @_attention_kernel(%arg0: i32, %arg1: memref<2x8x32xf32, #tpu.memory_space<vmem>>, %arg2: memref<2x16x16xf32, #tpu.memory_space<vmem>>, %arg3: memref<4x32x8xf32, #tpu.memory_space<vmem>>, %arg4: memref<4x1x8xf32, #tpu.memory_space<vmem>>, %arg5: memref<4x16x8xf32, #tpu.memory_space<vmem>>, %arg6: memref<4x1x8xf32, #tpu.memory_space<vmem>>, %arg7: memref<4x16x8xf32, #tpu.memory_space<vmem>>, %arg8: memref<4x1x8xf32, #tpu.memory_space<vmem>>, %arg9: memref<2x8x32xf32, #tpu.memory_space<vmem>>) attributes {dimension_semantics = [#tpu.dimension_semantics<parallel>], iteration_bounds = array<i64: 1>, scalar_prefetch = 0 : i64, scratch_operands = 0 : i64, tpu.core_type = #tpu.core_type<tc>, window_params = [{transform_indices = @transform_0, window_bounds = array<i64: 2, 8, 32>}, {transform_indices = @transform_1, window_bounds = array<i64: 2, 16, 16>}, {pipeline_mode = #tpu.pipeline_mode<synchronous>, transform_indices = @transform_2, window_bounds = array<i64: 4, 32, 8>}, {pipeline_mode = #tpu.pipeline_mode<synchronous>, transform_indices = @transform_3, window_bounds = array<i64: 4, 1, 8>}, {pipeline_mode = #tpu.pipeline_mode<synchronous>, transform_indices = @transform_4, window_bounds = array<i64: 4, 16, 8>}, {pipeline_mode = #tpu.pipeline_mode<synchronous>, transform_indices = @transform_5, window_bounds = array<i64: 4, 1, 8>}, {pipeline_mode = #tpu.pipeline_mode<synchronous>, transform_indices = @transform_6, window_bounds = array<i64: 4, 16, 8>}, {pipeline_mode = #tpu.pipeline_mode<synchronous>, transform_indices = @transform_7, window_bounds = array<i64: 4, 1, 8>}, {transform_indices = @transform_8, window_bounds = array<i64: 2, 8, 32>}]} {
    %c0 = arith.constant 0 : index
    %c0_0 = arith.constant 0 : index
    %c0_1 = arith.constant 0 : index
    %0 = vector.load %arg1[%c0, %c0_0, %c0_1] : memref<2x8x32xf32, #tpu.memory_space<vmem>>, vector<2x8x32xf32>
    %1 = vector.shape_cast %0 : vector<2x8x32xf32> to vector<16x32xf32>
    %c0_2 = arith.constant 0 : index
    %c0_3 = arith.constant 0 : index
    %c0_4 = arith.constant 0 : index
    %2 = vector.load %arg2[%c0_2, %c0_3, %c0_4] : memref<2x16x16xf32, #tpu.memory_space<vmem>>, vector<2x16x16xf32>
    %3 = vector.shape_cast %2 : vector<2x16x16xf32> to vector<32x16xf32>
    %c0_5 = arith.constant 0 : index
    %c0_6 = arith.constant 0 : index
    %c0_7 = arith.constant 0 : index
    %4 = vector.load %arg3[%c0_5, %c0_6, %c0_7] : memref<4x32x8xf32, #tpu.memory_space<vmem>>, vector<1x32x8xf32>
    %5 = vector.shape_cast %4 : vector<1x32x8xf32> to vector<32x8xf32>
    %cst = arith.constant dense<0.000000e+00> : vector<16x8xf32>
    %6 = tpu.matmul %1, %5, %cst {dimension_numbers = #tpu.dot_dimension_numbers<[1], [0], [0], [1], [0, 0, 1, 1], [], []>} : vector<16x32xf32>, vector<32x8xf32>, vector<16x8xf32> -> vector<16x8xf32>
    %c0_8 = arith.constant 0 : index
    %c0_9 = arith.constant 0 : index
    %c0_10 = arith.constant 0 : index
    %7 = vector.load %arg4[%c0_8, %c0_9, %c0_10] : memref<4x1x8xf32, #tpu.memory_space<vmem>>, vector<1x1x8xf32>
    %8 = vector.shape_cast %7 : vector<1x1x8xf32> to vector<1x8xf32>
    %9 = vector.broadcast %8 : vector<1x8xf32> to vector<16x8xf32>
    %10 = arith.addf %6, %9 : vector<16x8xf32>
    %c0_11 = arith.constant 0 : index
    %c0_12 = arith.constant 0 : index
    %c0_13 = arith.constant 0 : index
    %11 = vector.load %arg5[%c0_11, %c0_12, %c0_13] : memref<4x16x8xf32, #tpu.memory_space<vmem>>, vector<1x16x8xf32>
    %12 = vector.shape_cast %11 : vector<1x16x8xf32> to vector<16x8xf32>
    %cst_14 = arith.constant dense<0.000000e+00> : vector<32x8xf32>
    %13 = tpu.matmul %3, %12, %cst_14 {dimension_numbers = #tpu.dot_dimension_numbers<[1], [0], [0], [1], [0, 0, 1, 1], [], []>} : vector<32x16xf32>, vector<16x8xf32>, vector<32x8xf32> -> vector<32x8xf32>
    %c0_15 = arith.constant 0 : index
    %c0_16 = arith.constant 0 : index
    %c0_17 = arith.constant 0 : index
    %14 = vector.load %arg6[%c0_15, %c0_16, %c0_17] : memref<4x1x8xf32, #tpu.memory_space<vmem>>, vector<1x1x8xf32>
    %15 = vector.shape_cast %14 : vector<1x1x8xf32> to vector<1x8xf32>
    %16 = vector.broadcast %15 : vector<1x8xf32> to vector<32x8xf32>
    %17 = arith.addf %13, %16 : vector<32x8xf32>
    %c0_18 = arith.constant 0 : index
    %c0_19 = arith.constant 0 : index
    %c0_20 = arith.constant 0 : index
    %18 = vector.load %arg7[%c0_18, %c0_19, %c0_20] : memref<4x16x8xf32, #tpu.memory_space<vmem>>, vector<1x16x8xf32>
    %19 = vector.shape_cast %18 : vector<1x16x8xf32> to vector<16x8xf32>
    %cst_21 = arith.constant dense<0.000000e+00> : vector<32x8xf32>
    %20 = tpu.matmul %3, %19, %cst_21 {dimension_numbers = #tpu.dot_dimension_numbers<[1], [0], [0], [1], [0, 0, 1, 1], [], []>} : vector<32x16xf32>, vector<16x8xf32>, vector<32x8xf32> -> vector<32x8xf32>
    %c0_22 = arith.constant 0 : index
    %c0_23 = arith.constant 0 : index
    %c0_24 = arith.constant 0 : index
    %21 = vector.load %arg8[%c0_22, %c0_23, %c0_24] : memref<4x1x8xf32, #tpu.memory_space<vmem>>, vector<1x1x8xf32>
    %22 = vector.shape_cast %21 : vector<1x1x8xf32> to vector<1x8xf32>
    %23 = vector.broadcast %22 : vector<1x8xf32> to vector<32x8xf32>
    %24 = arith.addf %20, %23 : vector<32x8xf32>
    %25 = vector.extract_strided_slice %10 {offsets = [0, 0], sizes = [8, 8], strides = [1, 1]} : vector<16x8xf32> to vector<8x8xf32>
    %26 = vector.extract_strided_slice %17 {offsets = [0, 0], sizes = [16, 8], strides = [1, 1]} : vector<32x8xf32> to vector<16x8xf32>
    %27 = vector.extract_strided_slice %24 {offsets = [0, 0], sizes = [16, 8], strides = [1, 1]} : vector<32x8xf32> to vector<16x8xf32>
    %cst_25 = arith.constant dense<0.000000e+00> : vector<8x16xf32>
    %28 = tpu.matmul %25, %26, %cst_25 {dimension_numbers = #tpu.dot_dimension_numbers<[1], [1], [0], [0], [0, 0, 1, 0], [], []>} : vector<8x8xf32>, vector<16x8xf32>, vector<8x16xf32> -> vector<8x16xf32>
    %cst_26 = arith.constant 0.353553385 : f32
    %29 = vector.broadcast %cst_26 : f32 to vector<8x16xf32>
    %30 = arith.mulf %28, %29 : vector<8x16xf32>
    %cst_27 = arith.constant dense<0xFF800000> : vector<8xf32>
    %31 = vector.multi_reduction <maximumf>, %30, %cst_27 [1] : vector<8x16xf32> to vector<8xf32>
    %32 = vector.shape_cast %31 : vector<8xf32> to vector<8x1xf32>
    %33 = vector.broadcast %32 : vector<8x1xf32> to vector<8x16xf32>
    %34 = arith.subf %30, %33 : vector<8x16xf32>
    %35 = math.exp %34 : vector<8x16xf32>
    %cst_28 = arith.constant dense<0.000000e+00> : vector<8xf32>
    %36 = vector.multi_reduction <add>, %35, %cst_28 [1] : vector<8x16xf32> to vector<8xf32>
    %37 = vector.shape_cast %36 : vector<8xf32> to vector<8x1xf32>
    %38 = tpu.reciprocal %37 {approx = true} : vector<8x1xf32> -> vector<8x1xf32>
    %39 = vector.broadcast %38 : vector<8x1xf32> to vector<8x16xf32>
    %40 = arith.mulf %35, %39 : vector<8x16xf32>
    %cst_29 = arith.constant dense<0.000000e+00> : vector<8x8xf32>
    %41 = tpu.matmul %40, %27, %cst_29 {dimension_numbers = #tpu.dot_dimension_numbers<[1], [0], [0], [1], [0, 0, 1, 1], [], []>} : vector<8x16xf32>, vector<16x8xf32>, vector<8x8xf32> -> vector<8x8xf32>
    %42 = vector.extract_strided_slice %10 {offsets = [8, 0], sizes = [8, 8], strides = [1, 1]} : vector<16x8xf32> to vector<8x8xf32>
    %43 = vector.extract_strided_slice %17 {offsets = [16, 0], sizes = [16, 8], strides = [1, 1]} : vector<32x8xf32> to vector<16x8xf32>
    %44 = vector.extract_strided_slice %24 {offsets = [16, 0], sizes = [16, 8], strides = [1, 1]} : vector<32x8xf32> to vector<16x8xf32>
    %cst_30 = arith.constant dense<0.000000e+00> : vector<8x16xf32>
    %45 = tpu.matmul %42, %43, %cst_30 {dimension_numbers = #tpu.dot_dimension_numbers<[1], [1], [0], [0], [0, 0, 1, 0], [], []>} : vector<8x8xf32>, vector<16x8xf32>, vector<8x16xf32> -> vector<8x16xf32>
    %cst_31 = arith.constant 0.353553385 : f32
    %46 = vector.broadcast %cst_31 : f32 to vector<8x16xf32>
    %47 = arith.mulf %45, %46 : vector<8x16xf32>
    %cst_32 = arith.constant dense<0xFF800000> : vector<8xf32>
    %48 = vector.multi_reduction <maximumf>, %47, %cst_32 [1] : vector<8x16xf32> to vector<8xf32>
    %49 = vector.shape_cast %48 : vector<8xf32> to vector<8x1xf32>
    %50 = vector.broadcast %49 : vector<8x1xf32> to vector<8x16xf32>
    %51 = arith.subf %47, %50 : vector<8x16xf32>
    %52 = math.exp %51 : vector<8x16xf32>
    %cst_33 = arith.constant dense<0.000000e+00> : vector<8xf32>
    %53 = vector.multi_reduction <add>, %52, %cst_33 [1] : vector<8x16xf32> to vector<8xf32>
    %54 = vector.shape_cast %53 : vector<8xf32> to vector<8x1xf32>
    %55 = tpu.reciprocal %54 {approx = true} : vector<8x1xf32> -> vector<8x1xf32>
    %56 = vector.broadcast %55 : vector<8x1xf32> to vector<8x16xf32>
    %57 = arith.mulf %52, %56 : vector<8x16xf32>
    %cst_34 = arith.constant dense<0.000000e+00> : vector<8x8xf32>
    %58 = tpu.matmul %57, %44, %cst_34 {dimension_numbers = #tpu.dot_dimension_numbers<[1], [0], [0], [1], [0, 0, 1, 1], [], []>} : vector<8x16xf32>, vector<16x8xf32>, vector<8x8xf32> -> vector<8x8xf32>
    %59 = tpu.concatenate %41, %58 in 0 : vector<8x8xf32>, vector<8x8xf32> -> vector<16x8xf32>
    %c1 = arith.constant 1 : index
    %c0_35 = arith.constant 0 : index
    %c0_36 = arith.constant 0 : index
    %60 = vector.load %arg3[%c1, %c0_35, %c0_36] : memref<4x32x8xf32, #tpu.memory_space<vmem>>, vector<1x32x8xf32>
    %61 = vector.shape_cast %60 : vector<1x32x8xf32> to vector<32x8xf32>
    %cst_37 = arith.constant dense<0.000000e+00> : vector<16x8xf32>
    %62 = tpu.matmul %1, %61, %cst_37 {dimension_numbers = #tpu.dot_dimension_numbers<[1], [0], [0], [1], [0, 0, 1, 1], [], []>} : vector<16x32xf32>, vector<32x8xf32>, vector<16x8xf32> -> vector<16x8xf32>
    %c1_38 = arith.constant 1 : index
    %c0_39 = arith.constant 0 : index
    %c0_40 = arith.constant 0 : index
    %63 = vector.load %arg4[%c1_38, %c0_39, %c0_40] : memref<4x1x8xf32, #tpu.memory_space<vmem>>, vector<1x1x8xf32>
    %64 = vector.shape_cast %63 : vector<1x1x8xf32> to vector<1x8xf32>
    %65 = vector.broadcast %64 : vector<1x8xf32> to vector<16x8xf32>
    %66 = arith.addf %62, %65 : vector<16x8xf32>
    %c1_41 = arith.constant 1 : index
    %c0_42 = arith.constant 0 : index
    %c0_43 = arith.constant 0 : index
    %67 = vector.load %arg5[%c1_41, %c0_42, %c0_43] : memref<4x16x8xf32, #tpu.memory_space<vmem>>, vector<1x16x8xf32>
    %68 = vector.shape_cast %67 : vector<1x16x8xf32> to vector<16x8xf32>
    %cst_44 = arith.constant dense<0.000000e+00> : vector<32x8xf32>
    %69 = tpu.matmul %3, %68, %cst_44 {dimension_numbers = #tpu.dot_dimension_numbers<[1], [0], [0], [1], [0, 0, 1, 1], [], []>} : vector<32x16xf32>, vector<16x8xf32>, vector<32x8xf32> -> vector<32x8xf32>
    %c1_45 = arith.constant 1 : index
    %c0_46 = arith.constant 0 : index
    %c0_47 = arith.constant 0 : index
    %70 = vector.load %arg6[%c1_45, %c0_46, %c0_47] : memref<4x1x8xf32, #tpu.memory_space<vmem>>, vector<1x1x8xf32>
    %71 = vector.shape_cast %70 : vector<1x1x8xf32> to vector<1x8xf32>
    %72 = vector.broadcast %71 : vector<1x8xf32> to vector<32x8xf32>
    %73 = arith.addf %69, %72 : vector<32x8xf32>
    %c1_48 = arith.constant 1 : index
    %c0_49 = arith.constant 0 : index
    %c0_50 = arith.constant 0 : index
    %74 = vector.load %arg7[%c1_48, %c0_49, %c0_50] : memref<4x16x8xf32, #tpu.memory_space<vmem>>, vector<1x16x8xf32>
    %75 = vector.shape_cast %74 : vector<1x16x8xf32> to vector<16x8xf32>
    %cst_51 = arith.constant dense<0.000000e+00> : vector<32x8xf32>
    %76 = tpu.matmul %3, %75, %cst_51 {dimension_numbers = #tpu.dot_dimension_numbers<[1], [0], [0], [1], [0, 0, 1, 1], [], []>} : vector<32x16xf32>, vector<16x8xf32>, vector<32x8xf32> -> vector<32x8xf32>
    %c1_52 = arith.constant 1 : index
    %c0_53 = arith.constant 0 : index
    %c0_54 = arith.constant 0 : index
    %77 = vector.load %arg8[%c1_52, %c0_53, %c0_54] : memref<4x1x8xf32, #tpu.memory_space<vmem>>, vector<1x1x8xf32>
    %78 = vector.shape_cast %77 : vector<1x1x8xf32> to vector<1x8xf32>
    %79 = vector.broadcast %78 : vector<1x8xf32> to vector<32x8xf32>
    %80 = arith.addf %76, %79 : vector<32x8xf32>
    %81 = vector.extract_strided_slice %66 {offsets = [0, 0], sizes = [8, 8], strides = [1, 1]} : vector<16x8xf32> to vector<8x8xf32>
    %82 = vector.extract_strided_slice %73 {offsets = [0, 0], sizes = [16, 8], strides = [1, 1]} : vector<32x8xf32> to vector<16x8xf32>
    %83 = vector.extract_strided_slice %80 {offsets = [0, 0], sizes = [16, 8], strides = [1, 1]} : vector<32x8xf32> to vector<16x8xf32>
    %cst_55 = arith.constant dense<0.000000e+00> : vector<8x16xf32>
    %84 = tpu.matmul %81, %82, %cst_55 {dimension_numbers = #tpu.dot_dimension_numbers<[1], [1], [0], [0], [0, 0, 1, 0], [], []>} : vector<8x8xf32>, vector<16x8xf32>, vector<8x16xf32> -> vector<8x16xf32>
    %cst_56 = arith.constant 0.353553385 : f32
    %85 = vector.broadcast %cst_56 : f32 to vector<8x16xf32>
    %86 = arith.mulf %84, %85 : vector<8x16xf32>
    %cst_57 = arith.constant dense<0xFF800000> : vector<8xf32>
    %87 = vector.multi_reduction <maximumf>, %86, %cst_57 [1] : vector<8x16xf32> to vector<8xf32>
    %88 = vector.shape_cast %87 : vector<8xf32> to vector<8x1xf32>
    %89 = vector.broadcast %88 : vector<8x1xf32> to vector<8x16xf32>
    %90 = arith.subf %86, %89 : vector<8x16xf32>
    %91 = math.exp %90 : vector<8x16xf32>
    %cst_58 = arith.constant dense<0.000000e+00> : vector<8xf32>
    %92 = vector.multi_reduction <add>, %91, %cst_58 [1] : vector<8x16xf32> to vector<8xf32>
    %93 = vector.shape_cast %92 : vector<8xf32> to vector<8x1xf32>
    %94 = tpu.reciprocal %93 {approx = true} : vector<8x1xf32> -> vector<8x1xf32>
    %95 = vector.broadcast %94 : vector<8x1xf32> to vector<8x16xf32>
    %96 = arith.mulf %91, %95 : vector<8x16xf32>
    %cst_59 = arith.constant dense<0.000000e+00> : vector<8x8xf32>
    %97 = tpu.matmul %96, %83, %cst_59 {dimension_numbers = #tpu.dot_dimension_numbers<[1], [0], [0], [1], [0, 0, 1, 1], [], []>} : vector<8x16xf32>, vector<16x8xf32>, vector<8x8xf32> -> vector<8x8xf32>
    %98 = vector.extract_strided_slice %66 {offsets = [8, 0], sizes = [8, 8], strides = [1, 1]} : vector<16x8xf32> to vector<8x8xf32>
    %99 = vector.extract_strided_slice %73 {offsets = [16, 0], sizes = [16, 8], strides = [1, 1]} : vector<32x8xf32> to vector<16x8xf32>
    %100 = vector.extract_strided_slice %80 {offsets = [16, 0], sizes = [16, 8], strides = [1, 1]} : vector<32x8xf32> to vector<16x8xf32>
    %cst_60 = arith.constant dense<0.000000e+00> : vector<8x16xf32>
    %101 = tpu.matmul %98, %99, %cst_60 {dimension_numbers = #tpu.dot_dimension_numbers<[1], [1], [0], [0], [0, 0, 1, 0], [], []>} : vector<8x8xf32>, vector<16x8xf32>, vector<8x16xf32> -> vector<8x16xf32>
    %cst_61 = arith.constant 0.353553385 : f32
    %102 = vector.broadcast %cst_61 : f32 to vector<8x16xf32>
    %103 = arith.mulf %101, %102 : vector<8x16xf32>
    %cst_62 = arith.constant dense<0xFF800000> : vector<8xf32>
    %104 = vector.multi_reduction <maximumf>, %103, %cst_62 [1] : vector<8x16xf32> to vector<8xf32>
    %105 = vector.shape_cast %104 : vector<8xf32> to vector<8x1xf32>
    %106 = vector.broadcast %105 : vector<8x1xf32> to vector<8x16xf32>
    %107 = arith.subf %103, %106 : vector<8x16xf32>
    %108 = math.exp %107 : vector<8x16xf32>
    %cst_63 = arith.constant dense<0.000000e+00> : vector<8xf32>
    %109 = vector.multi_reduction <add>, %108, %cst_63 [1] : vector<8x16xf32> to vector<8xf32>
    %110 = vector.shape_cast %109 : vector<8xf32> to vector<8x1xf32>
    %111 = tpu.reciprocal %110 {approx = true} : vector<8x1xf32> -> vector<8x1xf32>
    %112 = vector.broadcast %111 : vector<8x1xf32> to vector<8x16xf32>
    %113 = arith.mulf %108, %112 : vector<8x16xf32>
    %cst_64 = arith.constant dense<0.000000e+00> : vector<8x8xf32>
    %114 = tpu.matmul %113, %100, %cst_64 {dimension_numbers = #tpu.dot_dimension_numbers<[1], [0], [0], [1], [0, 0, 1, 1], [], []>} : vector<8x16xf32>, vector<16x8xf32>, vector<8x8xf32> -> vector<8x8xf32>
    %115 = tpu.concatenate %97, %114 in 0 : vector<8x8xf32>, vector<8x8xf32> -> vector<16x8xf32>
    %c2 = arith.constant 2 : index
    %c0_65 = arith.constant 0 : index
    %c0_66 = arith.constant 0 : index
    %116 = vector.load %arg3[%c2, %c0_65, %c0_66] : memref<4x32x8xf32, #tpu.memory_space<vmem>>, vector<1x32x8xf32>
    %117 = vector.shape_cast %116 : vector<1x32x8xf32> to vector<32x8xf32>
    %cst_67 = arith.constant dense<0.000000e+00> : vector<16x8xf32>
    %118 = tpu.matmul %1, %117, %cst_67 {dimension_numbers = #tpu.dot_dimension_numbers<[1], [0], [0], [1], [0, 0, 1, 1], [], []>} : vector<16x32xf32>, vector<32x8xf32>, vector<16x8xf32> -> vector<16x8xf32>
    %c2_68 = arith.constant 2 : index
    %c0_69 = arith.constant 0 : index
    %c0_70 = arith.constant 0 : index
    %119 = vector.load %arg4[%c2_68, %c0_69, %c0_70] : memref<4x1x8xf32, #tpu.memory_space<vmem>>, vector<1x1x8xf32>
    %120 = vector.shape_cast %119 : vector<1x1x8xf32> to vector<1x8xf32>
    %121 = vector.broadcast %120 : vector<1x8xf32> to vector<16x8xf32>
    %122 = arith.addf %118, %121 : vector<16x8xf32>
    %c2_71 = arith.constant 2 : index
    %c0_72 = arith.constant 0 : index
    %c0_73 = arith.constant 0 : index
    %123 = vector.load %arg5[%c2_71, %c0_72, %c0_73] : memref<4x16x8xf32, #tpu.memory_space<vmem>>, vector<1x16x8xf32>
    %124 = vector.shape_cast %123 : vector<1x16x8xf32> to vector<16x8xf32>
    %cst_74 = arith.constant dense<0.000000e+00> : vector<32x8xf32>
    %125 = tpu.matmul %3, %124, %cst_74 {dimension_numbers = #tpu.dot_dimension_numbers<[1], [0], [0], [1], [0, 0, 1, 1], [], []>} : vector<32x16xf32>, vector<16x8xf32>, vector<32x8xf32> -> vector<32x8xf32>
    %c2_75 = arith.constant 2 : index
    %c0_76 = arith.constant 0 : index
    %c0_77 = arith.constant 0 : index
    %126 = vector.load %arg6[%c2_75, %c0_76, %c0_77] : memref<4x1x8xf32, #tpu.memory_space<vmem>>, vector<1x1x8xf32>
    %127 = vector.shape_cast %126 : vector<1x1x8xf32> to vector<1x8xf32>
    %128 = vector.broadcast %127 : vector<1x8xf32> to vector<32x8xf32>
    %129 = arith.addf %125, %128 : vector<32x8xf32>
    %c2_78 = arith.constant 2 : index
    %c0_79 = arith.constant 0 : index
    %c0_80 = arith.constant 0 : index
    %130 = vector.load %arg7[%c2_78, %c0_79, %c0_80] : memref<4x16x8xf32, #tpu.memory_space<vmem>>, vector<1x16x8xf32>
    %131 = vector.shape_cast %130 : vector<1x16x8xf32> to vector<16x8xf32>
    %cst_81 = arith.constant dense<0.000000e+00> : vector<32x8xf32>
    %132 = tpu.matmul %3, %131, %cst_81 {dimension_numbers = #tpu.dot_dimension_numbers<[1], [0], [0], [1], [0, 0, 1, 1], [], []>} : vector<32x16xf32>, vector<16x8xf32>, vector<32x8xf32> -> vector<32x8xf32>
    %c2_82 = arith.constant 2 : index
    %c0_83 = arith.constant 0 : index
    %c0_84 = arith.constant 0 : index
    %133 = vector.load %arg8[%c2_82, %c0_83, %c0_84] : memref<4x1x8xf32, #tpu.memory_space<vmem>>, vector<1x1x8xf32>
    %134 = vector.shape_cast %133 : vector<1x1x8xf32> to vector<1x8xf32>
    %135 = vector.broadcast %134 : vector<1x8xf32> to vector<32x8xf32>
    %136 = arith.addf %132, %135 : vector<32x8xf32>
    %137 = vector.extract_strided_slice %122 {offsets = [0, 0], sizes = [8, 8], strides = [1, 1]} : vector<16x8xf32> to vector<8x8xf32>
    %138 = vector.extract_strided_slice %129 {offsets = [0, 0], sizes = [16, 8], strides = [1, 1]} : vector<32x8xf32> to vector<16x8xf32>
    %139 = vector.extract_strided_slice %136 {offsets = [0, 0], sizes = [16, 8], strides = [1, 1]} : vector<32x8xf32> to vector<16x8xf32>
    %cst_85 = arith.constant dense<0.000000e+00> : vector<8x16xf32>
    %140 = tpu.matmul %137, %138, %cst_85 {dimension_numbers = #tpu.dot_dimension_numbers<[1], [1], [0], [0], [0, 0, 1, 0], [], []>} : vector<8x8xf32>, vector<16x8xf32>, vector<8x16xf32> -> vector<8x16xf32>
    %cst_86 = arith.constant 0.353553385 : f32
    %141 = vector.broadcast %cst_86 : f32 to vector<8x16xf32>
    %142 = arith.mulf %140, %141 : vector<8x16xf32>
    %cst_87 = arith.constant dense<0xFF800000> : vector<8xf32>
    %143 = vector.multi_reduction <maximumf>, %142, %cst_87 [1] : vector<8x16xf32> to vector<8xf32>
    %144 = vector.shape_cast %143 : vector<8xf32> to vector<8x1xf32>
    %145 = vector.broadcast %144 : vector<8x1xf32> to vector<8x16xf32>
    %146 = arith.subf %142, %145 : vector<8x16xf32>
    %147 = math.exp %146 : vector<8x16xf32>
    %cst_88 = arith.constant dense<0.000000e+00> : vector<8xf32>
    %148 = vector.multi_reduction <add>, %147, %cst_88 [1] : vector<8x16xf32> to vector<8xf32>
    %149 = vector.shape_cast %148 : vector<8xf32> to vector<8x1xf32>
    %150 = tpu.reciprocal %149 {approx = true} : vector<8x1xf32> -> vector<8x1xf32>
    %151 = vector.broadcast %150 : vector<8x1xf32> to vector<8x16xf32>
    %152 = arith.mulf %147, %151 : vector<8x16xf32>
    %cst_89 = arith.constant dense<0.000000e+00> : vector<8x8xf32>
    %153 = tpu.matmul %152, %139, %cst_89 {dimension_numbers = #tpu.dot_dimension_numbers<[1], [0], [0], [1], [0, 0, 1, 1], [], []>} : vector<8x16xf32>, vector<16x8xf32>, vector<8x8xf32> -> vector<8x8xf32>
    %154 = vector.extract_strided_slice %122 {offsets = [8, 0], sizes = [8, 8], strides = [1, 1]} : vector<16x8xf32> to vector<8x8xf32>
    %155 = vector.extract_strided_slice %129 {offsets = [16, 0], sizes = [16, 8], strides = [1, 1]} : vector<32x8xf32> to vector<16x8xf32>
    %156 = vector.extract_strided_slice %136 {offsets = [16, 0], sizes = [16, 8], strides = [1, 1]} : vector<32x8xf32> to vector<16x8xf32>
    %cst_90 = arith.constant dense<0.000000e+00> : vector<8x16xf32>
    %157 = tpu.matmul %154, %155, %cst_90 {dimension_numbers = #tpu.dot_dimension_numbers<[1], [1], [0], [0], [0, 0, 1, 0], [], []>} : vector<8x8xf32>, vector<16x8xf32>, vector<8x16xf32> -> vector<8x16xf32>
    %cst_91 = arith.constant 0.353553385 : f32
    %158 = vector.broadcast %cst_91 : f32 to vector<8x16xf32>
    %159 = arith.mulf %157, %158 : vector<8x16xf32>
    %cst_92 = arith.constant dense<0xFF800000> : vector<8xf32>
    %160 = vector.multi_reduction <maximumf>, %159, %cst_92 [1] : vector<8x16xf32> to vector<8xf32>
    %161 = vector.shape_cast %160 : vector<8xf32> to vector<8x1xf32>
    %162 = vector.broadcast %161 : vector<8x1xf32> to vector<8x16xf32>
    %163 = arith.subf %159, %162 : vector<8x16xf32>
    %164 = math.exp %163 : vector<8x16xf32>
    %cst_93 = arith.constant dense<0.000000e+00> : vector<8xf32>
    %165 = vector.multi_reduction <add>, %164, %cst_93 [1] : vector<8x16xf32> to vector<8xf32>
    %166 = vector.shape_cast %165 : vector<8xf32> to vector<8x1xf32>
    %167 = tpu.reciprocal %166 {approx = true} : vector<8x1xf32> -> vector<8x1xf32>
    %168 = vector.broadcast %167 : vector<8x1xf32> to vector<8x16xf32>
    %169 = arith.mulf %164, %168 : vector<8x16xf32>
    %cst_94 = arith.constant dense<0.000000e+00> : vector<8x8xf32>
    %170 = tpu.matmul %169, %156, %cst_94 {dimension_numbers = #tpu.dot_dimension_numbers<[1], [0], [0], [1], [0, 0, 1, 1], [], []>} : vector<8x16xf32>, vector<16x8xf32>, vector<8x8xf32> -> vector<8x8xf32>
    %171 = tpu.concatenate %153, %170 in 0 : vector<8x8xf32>, vector<8x8xf32> -> vector<16x8xf32>
    %c3 = arith.constant 3 : index
    %c0_95 = arith.constant 0 : index
    %c0_96 = arith.constant 0 : index
    %172 = vector.load %arg3[%c3, %c0_95, %c0_96] : memref<4x32x8xf32, #tpu.memory_space<vmem>>, vector<1x32x8xf32>
    %173 = vector.shape_cast %172 : vector<1x32x8xf32> to vector<32x8xf32>
    %cst_97 = arith.constant dense<0.000000e+00> : vector<16x8xf32>
    %174 = tpu.matmul %1, %173, %cst_97 {dimension_numbers = #tpu.dot_dimension_numbers<[1], [0], [0], [1], [0, 0, 1, 1], [], []>} : vector<16x32xf32>, vector<32x8xf32>, vector<16x8xf32> -> vector<16x8xf32>
    %c3_98 = arith.constant 3 : index
    %c0_99 = arith.constant 0 : index
    %c0_100 = arith.constant 0 : index
    %175 = vector.load %arg4[%c3_98, %c0_99, %c0_100] : memref<4x1x8xf32, #tpu.memory_space<vmem>>, vector<1x1x8xf32>
    %176 = vector.shape_cast %175 : vector<1x1x8xf32> to vector<1x8xf32>
    %177 = vector.broadcast %176 : vector<1x8xf32> to vector<16x8xf32>
    %178 = arith.addf %174, %177 : vector<16x8xf32>
    %c3_101 = arith.constant 3 : index
    %c0_102 = arith.constant 0 : index
    %c0_103 = arith.constant 0 : index
    %179 = vector.load %arg5[%c3_101, %c0_102, %c0_103] : memref<4x16x8xf32, #tpu.memory_space<vmem>>, vector<1x16x8xf32>
    %180 = vector.shape_cast %179 : vector<1x16x8xf32> to vector<16x8xf32>
    %cst_104 = arith.constant dense<0.000000e+00> : vector<32x8xf32>
    %181 = tpu.matmul %3, %180, %cst_104 {dimension_numbers = #tpu.dot_dimension_numbers<[1], [0], [0], [1], [0, 0, 1, 1], [], []>} : vector<32x16xf32>, vector<16x8xf32>, vector<32x8xf32> -> vector<32x8xf32>
    %c3_105 = arith.constant 3 : index
    %c0_106 = arith.constant 0 : index
    %c0_107 = arith.constant 0 : index
    %182 = vector.load %arg6[%c3_105, %c0_106, %c0_107] : memref<4x1x8xf32, #tpu.memory_space<vmem>>, vector<1x1x8xf32>
    %183 = vector.shape_cast %182 : vector<1x1x8xf32> to vector<1x8xf32>
    %184 = vector.broadcast %183 : vector<1x8xf32> to vector<32x8xf32>
    %185 = arith.addf %181, %184 : vector<32x8xf32>
    %c3_108 = arith.constant 3 : index
    %c0_109 = arith.constant 0 : index
    %c0_110 = arith.constant 0 : index
    %186 = vector.load %arg7[%c3_108, %c0_109, %c0_110] : memref<4x16x8xf32, #tpu.memory_space<vmem>>, vector<1x16x8xf32>
    %187 = vector.shape_cast %186 : vector<1x16x8xf32> to vector<16x8xf32>
    %cst_111 = arith.constant dense<0.000000e+00> : vector<32x8xf32>
    %188 = tpu.matmul %3, %187, %cst_111 {dimension_numbers = #tpu.dot_dimension_numbers<[1], [0], [0], [1], [0, 0, 1, 1], [], []>} : vector<32x16xf32>, vector<16x8xf32>, vector<32x8xf32> -> vector<32x8xf32>
    %c3_112 = arith.constant 3 : index
    %c0_113 = arith.constant 0 : index
    %c0_114 = arith.constant 0 : index
    %189 = vector.load %arg8[%c3_112, %c0_113, %c0_114] : memref<4x1x8xf32, #tpu.memory_space<vmem>>, vector<1x1x8xf32>
    %190 = vector.shape_cast %189 : vector<1x1x8xf32> to vector<1x8xf32>
    %191 = vector.broadcast %190 : vector<1x8xf32> to vector<32x8xf32>
    %192 = arith.addf %188, %191 : vector<32x8xf32>
    %193 = vector.extract_strided_slice %178 {offsets = [0, 0], sizes = [8, 8], strides = [1, 1]} : vector<16x8xf32> to vector<8x8xf32>
    %194 = vector.extract_strided_slice %185 {offsets = [0, 0], sizes = [16, 8], strides = [1, 1]} : vector<32x8xf32> to vector<16x8xf32>
    %195 = vector.extract_strided_slice %192 {offsets = [0, 0], sizes = [16, 8], strides = [1, 1]} : vector<32x8xf32> to vector<16x8xf32>
    %cst_115 = arith.constant dense<0.000000e+00> : vector<8x16xf32>
    %196 = tpu.matmul %193, %194, %cst_115 {dimension_numbers = #tpu.dot_dimension_numbers<[1], [1], [0], [0], [0, 0, 1, 0], [], []>} : vector<8x8xf32>, vector<16x8xf32>, vector<8x16xf32> -> vector<8x16xf32>
    %cst_116 = arith.constant 0.353553385 : f32
    %197 = vector.broadcast %cst_116 : f32 to vector<8x16xf32>
    %198 = arith.mulf %196, %197 : vector<8x16xf32>
    %cst_117 = arith.constant dense<0xFF800000> : vector<8xf32>
    %199 = vector.multi_reduction <maximumf>, %198, %cst_117 [1] : vector<8x16xf32> to vector<8xf32>
    %200 = vector.shape_cast %199 : vector<8xf32> to vector<8x1xf32>
    %201 = vector.broadcast %200 : vector<8x1xf32> to vector<8x16xf32>
    %202 = arith.subf %198, %201 : vector<8x16xf32>
    %203 = math.exp %202 : vector<8x16xf32>
    %cst_118 = arith.constant dense<0.000000e+00> : vector<8xf32>
    %204 = vector.multi_reduction <add>, %203, %cst_118 [1] : vector<8x16xf32> to vector<8xf32>
    %205 = vector.shape_cast %204 : vector<8xf32> to vector<8x1xf32>
    %206 = tpu.reciprocal %205 {approx = true} : vector<8x1xf32> -> vector<8x1xf32>
    %207 = vector.broadcast %206 : vector<8x1xf32> to vector<8x16xf32>
    %208 = arith.mulf %203, %207 : vector<8x16xf32>
    %cst_119 = arith.constant dense<0.000000e+00> : vector<8x8xf32>
    %209 = tpu.matmul %208, %195, %cst_119 {dimension_numbers = #tpu.dot_dimension_numbers<[1], [0], [0], [1], [0, 0, 1, 1], [], []>} : vector<8x16xf32>, vector<16x8xf32>, vector<8x8xf32> -> vector<8x8xf32>
    %210 = vector.extract_strided_slice %178 {offsets = [8, 0], sizes = [8, 8], strides = [1, 1]} : vector<16x8xf32> to vector<8x8xf32>
    %211 = vector.extract_strided_slice %185 {offsets = [16, 0], sizes = [16, 8], strides = [1, 1]} : vector<32x8xf32> to vector<16x8xf32>
    %212 = vector.extract_strided_slice %192 {offsets = [16, 0], sizes = [16, 8], strides = [1, 1]} : vector<32x8xf32> to vector<16x8xf32>
    %cst_120 = arith.constant dense<0.000000e+00> : vector<8x16xf32>
    %213 = tpu.matmul %210, %211, %cst_120 {dimension_numbers = #tpu.dot_dimension_numbers<[1], [1], [0], [0], [0, 0, 1, 0], [], []>} : vector<8x8xf32>, vector<16x8xf32>, vector<8x16xf32> -> vector<8x16xf32>
    %cst_121 = arith.constant 0.353553385 : f32
    %214 = vector.broadcast %cst_121 : f32 to vector<8x16xf32>
    %215 = arith.mulf %213, %214 : vector<8x16xf32>
    %cst_122 = arith.constant dense<0xFF800000> : vector<8xf32>
    %216 = vector.multi_reduction <maximumf>, %215, %cst_122 [1] : vector<8x16xf32> to vector<8xf32>
    %217 = vector.shape_cast %216 : vector<8xf32> to vector<8x1xf32>
    %218 = vector.broadcast %217 : vector<8x1xf32> to vector<8x16xf32>
    %219 = arith.subf %215, %218 : vector<8x16xf32>
    %220 = math.exp %219 : vector<8x16xf32>
    %cst_123 = arith.constant dense<0.000000e+00> : vector<8xf32>
    %221 = vector.multi_reduction <add>, %220, %cst_123 [1] : vector<8x16xf32> to vector<8xf32>
    %222 = vector.shape_cast %221 : vector<8xf32> to vector<8x1xf32>
    %223 = tpu.reciprocal %222 {approx = true} : vector<8x1xf32> -> vector<8x1xf32>
    %224 = vector.broadcast %223 : vector<8x1xf32> to vector<8x16xf32>
    %225 = arith.mulf %220, %224 : vector<8x16xf32>
    %cst_124 = arith.constant dense<0.000000e+00> : vector<8x8xf32>
    %226 = tpu.matmul %225, %212, %cst_124 {dimension_numbers = #tpu.dot_dimension_numbers<[1], [0], [0], [1], [0, 0, 1, 1], [], []>} : vector<8x16xf32>, vector<16x8xf32>, vector<8x8xf32> -> vector<8x8xf32>
    %227 = tpu.concatenate %209, %226 in 0 : vector<8x8xf32>, vector<8x8xf32> -> vector<16x8xf32>
    %228 = tpu.concatenate %59, %115, %171, %227 in 1 : vector<16x8xf32>, vector<16x8xf32>, vector<16x8xf32>, vector<16x8xf32> -> vector<16x32xf32>
    %229 = vector.shape_cast %228 : vector<16x32xf32> to vector<2x8x32xf32>
    %c0_125 = arith.constant 0 : index
    %c0_126 = arith.constant 0 : index
    %c0_127 = arith.constant 0 : index
    %230 = vector.load %arg9[%c0_125, %c0_126, %c0_127] : memref<2x8x32xf32, #tpu.memory_space<vmem>>, vector<2x8x32xf32>
    tpu.vector_store %arg9[%c0_125, %c0_126, %c0_127], %229 {strides = array<i32>} : memref<2x8x32xf32, #tpu.memory_space<vmem>>, vector<2x8x32xf32>,
    return
  }
  func.func @transform_0(%arg0: i32) -> (i32, i32, i32) {
    %c0_i32 = arith.constant 0 : i32
    %c0_i32_0 = arith.constant 0 : i32
    %c0_i32_1 = arith.constant 0 : i32
    return %arg0, %c0_i32, %c0_i32_0 : i32, i32, i32
  }
  func.func @transform_1(%arg0: i32) -> (i32, i32, i32) {
    %c0_i32 = arith.constant 0 : i32
    %c0_i32_0 = arith.constant 0 : i32
    %c0_i32_1 = arith.constant 0 : i32
    return %arg0, %c0_i32, %c0_i32_0 : i32, i32, i32
  }
  func.func @transform_2(%arg0: i32) -> (i32, i32, i32) {
    %c0_i32 = arith.constant 0 : i32
    %c0_i32_0 = arith.constant 0 : i32
    %c0_i32_1 = arith.constant 0 : i32
    %c0_i32_2 = arith.constant 0 : i32
    return %c0_i32, %c0_i32_0, %c0_i32_1 : i32, i32, i32
  }
  func.func @transform_3(%arg0: i32) -> (i32, i32, i32) {
    %c0_i32 = arith.constant 0 : i32
    %c0_i32_0 = arith.constant 0 : i32
    %c0_i32_1 = arith.constant 0 : i32
    %c0_i32_2 = arith.constant 0 : i32
    return %c0_i32, %c0_i32_0, %c0_i32_1 : i32, i32, i32
  }
  func.func @transform_4(%arg0: i32) -> (i32, i32, i32) {
    %c0_i32 = arith.constant 0 : i32
    %c0_i32_0 = arith.constant 0 : i32
    %c0_i32_1 = arith.constant 0 : i32
    %c0_i32_2 = arith.constant 0 : i32
    return %c0_i32, %c0_i32_0, %c0_i32_1 : i32, i32, i32
  }
  func.func @transform_5(%arg0: i32) -> (i32, i32, i32) {
    %c0_i32 = arith.constant 0 : i32
    %c0_i32_0 = arith.constant 0 : i32
    %c0_i32_1 = arith.constant 0 : i32
    %c0_i32_2 = arith.constant 0 : i32
    return %c0_i32, %c0_i32_0, %c0_i32_1 : i32, i32, i32
  }
  func.func @transform_6(%arg0: i32) -> (i32, i32, i32) {
    %c0_i32 = arith.constant 0 : i32
    %c0_i32_0 = arith.constant 0 : i32
    %c0_i32_1 = arith.constant 0 : i32
    %c0_i32_2 = arith.constant 0 : i32
    return %c0_i32, %c0_i32_0, %c0_i32_1 : i32, i32, i32
  }
  func.func @transform_7(%arg0: i32) -> (i32, i32, i32) {
    %c0_i32 = arith.constant 0 : i32
    %c0_i32_0 = arith.constant 0 : i32
    %c0_i32_1 = arith.constant 0 : i32
    %c0_i32_2 = arith.constant 0 : i32
    return %c0_i32, %c0_i32_0, %c0_i32_1 : i32, i32, i32
  }
  func.func @transform_8(%arg0: i32) -> (i32, i32, i32) {
    %c0_i32 = arith.constant 0 : i32
    %c0_i32_0 = arith.constant 0 : i32
    %c0_i32_1 = arith.constant 0 : i32
    return %arg0, %c0_i32, %c0_i32_0 : i32, i32, i32
  }
}

</mosaic_0001>

<bundles_post_ra>
// kernel: tpu_custom_call.1
= control target key start
LH: loop header
LB: loop body
LE: loop exit
PB: predicated region body
PF: predicated region fallthrough
CT: control target
= control target key end

     0   :  { %vm138_vm0 = vcmask 130048   ;;  %vm47_vm1 = vcmask 261120   ;;  %s3502_s0 = inlined_call_operand.vmem [shape: f32[2,8,32], index: 0, kind: input, shape index: {}]   ;;  %s3503_s1 = inlined_call_operand.vmem [shape: f32[2,16,16], index: 1, kind: input, shape index: {}]   ;;  %s3504_s2 = inlined_call_operand.vmem [shape: f32[4,32,8], index: 2, kind: input, shape index: {}]   ;;  %s3505_s3 = inlined_call_operand.vmem [shape: f32[4,1,8], index: 3, kind: input, shape index: {}]   ;;  %s3506_s4 = inlined_call_operand.vmem [shape: f32[4,16,8], index: 4, kind: input, shape index: {}]   ;;  %s3507_s5 = inlined_call_operand.vmem [shape: f32[4,1,8], index: 5, kind: input, shape index: {}]   ;;  %s3508_s6 = inlined_call_operand.vmem [shape: f32[4,16,8], index: 6, kind: input, shape index: {}]   ;;  %s3509_s7 = inlined_call_operand.vmem [shape: f32[4,1,8], index: 7, kind: input, shape index: {}]   ;;  %s3510_s8 = inlined_call_operand.hbm [shape: f32[2,8,32], index: 8, kind: output, shape index: {}]  }
   0x1   :  { %v39_v0 = vld [vmem:[%s3504_s2 + $0x18] sm:$0xff]  ;;  %v130_v1 = vld [vmem:[%s3506_s4 + $0x8] sm:$0xff]  ;;  %v38_v2 = vld [vmem:[%s3504_s2 + $0x10] sm:$0xff] }
   0x2   :  { %2769 = vmatprep.subr.mxu0 %v39_v0  ;;  %2780 = vmatprep.subr.mxu1 %v130_v1  ;;  %v129_v3 = vld [vmem:[%s3506_s4] sm:$0xff]  ;;  %v37_v5 = vld [vmem:[%s3504_s2 + $0x8] sm:$0xff] }
   0x3   :  { %2770 = vmatpush3.msra.mxu0 %v39_v0  ;;  %2781 = vmatpush3.msra.mxu1 %v130_v1  ;;  %v3133_v4 = vld [vmem:[%s3503_s1] sm:$0xff]  ;;  %v3141_v6 = vld [vmem:[%s3503_s1 + $0x8] sm:$0xff] }
   0x4   :  { %2771 = vmatprep.subr.mxu0 %v38_v2  ;;  %2782 = vmatprep.subr.mxu1 %v129_v3  ;;  %v36_v7 = vld [vmem:[%s3504_s2] sm:$0xff] }
   0x5   :  { %2772 = vmatpush3.msra.mxu0 %v38_v2  ;;  %2783 = vmatpush3.msra.mxu1 %v129_v3  ;;  %v3149_v8 = vld [vmem:[%s3502_s0] sm:$0xff] }
   0x6   :  { %13 = vsyncpa [#allocation3], 0  ;;  %2784 = vmatprep.mubr.msk.f32.mxu1 %vm138_vm0, %v3133_v4  ;;  %2773 = vmatprep.subr.mxu0 %v37_v5  ;;  %v3156_v9 = vld [vmem:[%s3503_s1 + $0x10] sm:$0xff]  ;;  %v3163_v10 = vld [vmem:[%s3502_s0 + $0x8] sm:$0xff]  ;;  %v3066_v14 = vmov 0.0   ;;  %vm3067_vm2 = vmmov 0  }
   0x7   :  { %2785 = vmatmul.mubr.msk.f32.vlgmr.msra.gmra.mxu1 %vm138_vm0, %v3141_v6  ;;  %2774 = vmatpush3.msra.mxu0 %v37_v5  ;;  %v3170_v11 = vld [vmem:[%s3503_s1 + $0x18] sm:$0xff]  ;;  %v237_v12 = vld [vmem:[%s3508_s6 + $0x8] sm:$0xff]  ;;  %v236_v13 = vld [vmem:[%s3508_s6] sm:$0xff]  ;;  %vm330_vm3 = vcmask 64512   ;;  %s3069_s28 = smov 16   ;;  %s3070_s0 = smov 24  }
   0x8   :  { %2775 = vmatprep.subr.mxu0 %v36_v7  ;;  %2777 = vmatprep.mubr.msk.f32.mxu0 %vm47_vm1, %v3149_v8  ;;  %v2535_v15 = vld [vmem:[%s3507_s5] ss:$0 sm:$0xff]  ;;  %v2556_v55 = vld [vmem:[%s3504_s2 + $0x38] sm:$0xff]  ;;  %v2555_v56 = vld [vmem:[%s3504_s2 + $0x30] sm:$0xff]  ;;  %vm2511_vm4 = vcmask 195584   ;;  %s3071_s29 = smov [#allocation2]  }
   0x9   :  { %2776 = vmatpush3.msra.mxu0 %v36_v7  ;;  %2787 = vmatprep.mubr.msk.f32.mxu1 %vm138_vm0, %v3156_v9  ;;  %v2532_v20 = vld [vmem:[%s3505_s3] ss:$0 sm:$0xff]  ;;  %v2554_v57 = vld [vmem:[%s3504_s2 + $0x28] sm:$0xff]  ;;  %v2562_v1 = vld [vmem:[%s3506_s4 + $0x18] sm:$0xff]  ;;  %s2521_s1 = sshll.u32 %s3071_s29, 4  ;;  %s2522_s1 = int_to_ptr.vmem [resolvable:$true] %s2521_s1 }
   0xa   :  { %2778 = vmatmul.mubr.msk.f32.vlgmr.msra.gmra.mxu0 %vm47_vm1, %v3163_v10  ;;  %2790 = vmatprep.subr.mxu0 %v237_v12  ;;  %v2540_v29 = vld [vmem:[%s3509_s7] ss:$0 sm:$0xff]  ;;  %v2561_v3 = vld [vmem:[%s3506_s4 + $0x10] sm:$0xff]  ;;  %v2570_v5 = vld [vmem:[%s3508_s6 + $0x18] sm:$0xff]  ;;  %s3044_s30 = scalar_lea.vmem %s2522_s1, 256  ;;  %p3049_p1 = scmp.lt.s32.totalorder %s2522_s1, %s2522_s1 }
   0xb   :  { %2788 = vmatmul.mubr.msk.f32.gmra.mxu1 %vm138_vm0, %v3170_v11  ;;  %2794 = vmatprep.mubr.msk.f32.mxu0 %vm138_vm0, %v3133_v4  ;;  %v2553_v58 = vld [vmem:[%s3504_s2 + $0x20] sm:$0xff]  ;;  %v2569_v7 = vld [vmem:[%s3508_s6 + $0x10] sm:$0xff]  ;;  %p3045_p0 = scmp.ne.s32.totalorder %s2522_s1, %s3044_s30  ;;  %p3050_p2 = scmp.lt.s32.totalorder %s3044_s30, %s3044_s30 }
   0xc   :  { %2791 = vmatpush3.msra.mxu0 %v237_v12  ;;  %2800 = vmatprep.subr.mxu1 %v3066_v14 }
   0xd   :  { %2792 = vmatprep.subr.mxu0 %v236_v13  ;;  %2804 = vmatprep.mubr.msk.f32.mxu1 %vm3067_vm2, %v3066_v14  ;;  %p3051_p3 = por %p3050_p2, %p3049_p1 }
   0xe   :  { %2793 = vmatpush3.msra.mxu0 %v236_v13 }
   0xf   :  { %2795 = vmatmul.mubr.msk.f32.vlgmr.msra.gmra.mxu0 %vm138_vm0, %v3141_v6  ;;  %2814 = vmatprep.subr.mxu0 %v3066_v14  ;;  %p3052_p4 = pnand %p3051_p3, %p3045_p0 }
  0x10   :  { %2797 = vmatprep.mubr.msk.f32.mxu0 %vm138_vm0, %v3156_v9 }
  0x13   :  { %2798 = vmatmul.mubr.msk.f32.gmra.mxu0 %vm138_vm0, %v3170_v11 }
  0x14   :  { %2818 = vmatprep.mubr.msk.f32.mxu0 %vm3067_vm2, %v3066_v14 }
  0xc7   :  { %v2786_v16 = vpop.f32.mrf.mxu1 }
  0xc8   :  { %v223_v17 = vadd.f32 %v2786_v16, %v2535_v15 }
  0xc9   :  { %v217_v18 = vpop.f32.mrf.mxu1 }
  0xca   :  { %2801 = vmatpush3.xpose.msk.msra.mxu1 %vm330_vm3, %v223_v17  ;;  %v2779_v19 = vpop.f32.mrf.mxu0  ;;  %v218_v22 = vadd.f32 %v2535_v15, %v217_v18  ;;  %v2564_v17 = vld [vmem:[%s3507_s5 + $0x1] ss:$0 sm:$0xff] }
  0xcb   :  { %v2789_v21 = vpop.f32.mrf.mxu1  ;;  %2802 = vmatprep.subr.mxu1 %v3066_v14  ;;  %v126_v28 = vadd.f32 %v2779_v19, %v2532_v20 }
  0xcc   :  { %v233_v23 = vadd.f32 %v2789_v21, %v2535_v15  ;;  %v120_v24 = vpop.f32.mrf.mxu0 }
  0xcd   :  { %v121_v25 = vadd.f32 %v2532_v20, %v120_v24  ;;  %v227_v26 = vpop.f32.mrf.mxu1  ;;  %v2558_v24 = vld [vmem:[%s3505_s3 + $0x1] ss:$0 sm:$0xff] }
  0xce   :  { %2803 = vmatpush3.xpose.msk.msra.mxu1 %vm330_vm3, %v218_v22  ;;  %2815 = vmatpush3.xpose.msk.msra.mxu0 %vm330_vm3, %v233_v23  ;;  %v228_v27 = vadd.f32 %v2535_v15, %v227_v26 }
  0xcf   :  { %2816 = vmatprep.subr.mxu0 %v3066_v14  ;;  %2807 = vmatprep.subr.mxu1 %v3066_v14  ;;  %v2796_v30 = vpop.f32.mrf.mxu0 }
  0xd0   :  { %v317_v31 = vadd.f32 %v2796_v30, %v2540_v29 }
  0xd1   :  { %2805 = vmatmul.mubr.msk.f32.vlgmr.msra.gmra.mxu1 %vm330_vm3, %v121_v25  ;;  %v311_v32 = vpop.f32.mrf.mxu0 }
  0xd2   :  { %2817 = vmatpush3.xpose.msk.msra.mxu0 %vm330_vm3, %v228_v27  ;;  %2811 = vmatprep.mubr.msk.f32.mxu1 %vm3067_vm2, %v3066_v14  ;;  %v312_v33 = vadd.f32 %v2540_v29, %v311_v32 }
  0xd3   :  { %2808 = vmatpush3.msra.mxu1 %v317_v31  ;;  %v2799_v34 = vpop.f32.mrf.mxu0  ;;  %2828 = vmatprep.subr.mxu0 %v2556_v55  ;;  %v2572_v31 = vld [vmem:[%s3509_s7 + $0x1] ss:$0 sm:$0xff] }
  0xd4   :  { %2809 = vmatprep.subr.mxu1 %v3066_v14  ;;  %v327_v35 = vadd.f32 %v2799_v34, %v2540_v29 }
  0xd5   :  { %2819 = vmatmul.mubr.msk.f32.vlgmr.msra.gmra.mxu0 %vm330_vm3, %v126_v28  ;;  %2810 = vmatpush3.msra.mxu1 %v312_v33  ;;  %v321_v38 = vpop.f32.mrf.mxu0 }
  0xd6   :  { %2836 = vmatprep.mubr.msk.f32.mxu0 %vm47_vm1, %v3149_v8  ;;  %2821 = vmatprep.subr.mxu1 %v3066_v14  ;;  %v322_v0 = vadd.f32 %v2540_v29, %v321_v38 }
  0xd7   :  { %2829 = vmatpush3.msra.mxu0 %v2556_v55 }
  0xd8   :  { %2830 = vmatprep.subr.mxu0 %v2555_v56 }
  0xd9   :  { %2831 = vmatpush3.msra.mxu0 %v2555_v56 }
  0xda   :  { %2832 = vmatprep.subr.mxu0 %v2554_v57 }
  0xdb   :  { %2833 = vmatpush3.msra.mxu0 %v2554_v57  ;;  %v2588_v57 = vld [vmem:[%s3504_s2 + $0x58] sm:$0xff] }
  0xdc   :  { %2834 = vmatprep.subr.mxu0 %v2553_v58 }
  0xdd   :  { %2835 = vmatpush3.msra.mxu0 %v2553_v58  ;;  %v2587_v58 = vld [vmem:[%s3504_s2 + $0x50] sm:$0xff] }
  0xde   :  { %2837 = vmatmul.mubr.msk.f32.vlgmr.msra.gmra.mxu0 %vm47_vm1, %v3163_v10  ;;  %2849 = vmatprep.subr.mxu0 %v2570_v5 }
  0xdf   :  { %2853 = vmatprep.mubr.msk.f32.mxu0 %vm138_vm0, %v3133_v4  ;;  %2850 = vmatpush3.msra.mxu0 %v2570_v5 }
  0xe0   :  { %2851 = vmatprep.subr.mxu0 %v2569_v7 }
  0xe1   :  { %2852 = vmatpush3.msra.mxu0 %v2569_v7  ;;  %v2593_v7 = vld [vmem:[%s3506_s4 + $0x20] sm:$0xff] }
  0xe2   :  { %2854 = vmatmul.mubr.msk.f32.vlgmr.msra.gmra.mxu0 %vm138_vm0, %v3141_v6  ;;  %2873 = vmatprep.subr.mxu0 %v3066_v14 }
  0xe3   :  { %2856 = vmatprep.mubr.msk.f32.mxu0 %vm138_vm0, %v3156_v9 }
  0xe6   :  { %2857 = vmatmul.mubr.msk.f32.gmra.mxu0 %vm138_vm0, %v3170_v11 }
  0xe7   :  { %2877 = vmatprep.mubr.msk.f32.mxu0 %vm3067_vm2, %v3066_v14 }
 0x191   :  { %v406_v36 = vpop.f32.mrf.mxu1 }
 0x192   :  { %v410_v37 = vmul.f32 0.35355338, %v406_v36 }
 0x193   :  { %v2806_v39 = vpop.f32.mrf.mxu1 }
 0x194   :  { %v411_v40 = vsel %vm138_vm0, %v410_v37, -inf }
 0x195   :  { %v570_v41 = vpop.f32.mrf.mxu0  ;;  %412 = vmax.xlane.f32.xlu0 %v411_v40 }
 0x196   :  { %v574_v42 = vmul.f32 0.35355338, %v570_v41 }
 0x197   :  { %v2820_v43 = vpop.f32.mrf.mxu0 }
 0x198   :  { %v575_v44 = vsel %vm138_vm0, %v574_v42, -inf }
 0x199   :  { %576 = vmax.xlane.f32.xlu0 %v575_v44 }
 0x19e   :  { %v2838_v20 = vpop.f32.mrf.mxu0 }
 0x19f   :  { %v744_v30 = vadd.f32 %v2838_v20, %v2558_v24 }
 0x1a0   :  { %v738_v26 = vpop.f32.mrf.mxu0 }
 0x1a1   :  { %v739_v28 = vadd.f32 %v2558_v24, %v738_v26 }
 0x1a2   :  { %v2855_v32 = vpop.f32.mrf.mxu0 }
 0x1a3   :  { %v926_v33 = vadd.f32 %v2855_v32, %v2572_v31 }
 0x1a4   :  { %v920_v34 = vpop.f32.mrf.mxu0 }
 0x1a6   :  { %v2858_v36 = vpop.f32.mrf.mxu0 }
 0x1a8   :  { %v930_v40 = vpop.f32.mrf.mxu0 }
 0x21e   :  { %v413_v45 = vpop.xlane.xlu0 %412 }
 0x21f   :  { %v414_v46 = vsub.f32 %v410_v37, %v413_v45  ;;  %v936_v37 = vadd.f32 %v2858_v36, %v2572_v31 }
 0x221   :  { %v415_v47 = vmul.f32 1.442695, %v414_v46 }
 0x222   :  { %v577_v48 = vpop.xlane.xlu0 %576 }
 0x223   :  { %3012 = vpow2.f32 %v415_v47  ;;  %v578_v49 = vsub.f32 %v574_v42, %v577_v48 }
 0x225   :  { %v579_v50 = vmul.f32 1.442695, %v578_v49 }
 0x227   :  { %3014 = vpow2.f32 %v579_v50 }
 0x230   :  { %v3013_v51 = vpop.eup %3012 }
 0x231   :  { %v417_v52 = vsel %vm138_vm0, %v3013_v51, 0.0 }
 0x232   :  { %418 = vadd.xlane.f32.xlu1 %v417_v52 }
 0x234   :  { %v3015_v53 = vpop.eup %3014 }
 0x235   :  { %v581_v54 = vsel %vm138_vm0, %v3015_v53, 0.0 }
 0x236   :  { %582 = vadd.xlane.f32.xlu1 %v581_v54 }
 0x2bb   :  { %v419_v59 = vpop.xlane.xlu1 %418 }
 0x2bc   :  { %3016 = vrcp.f32 %v419_v59  ;;  %v2586_v59 = vld [vmem:[%s3504_s2 + $0x48] sm:$0xff] }
 0x2bf   :  { %v583_v60 = vpop.xlane.xlu1 %582 }
 0x2c0   :  { %3018 = vrcp.f32 %v583_v60  ;;  %v2585_v60 = vld [vmem:[%s3504_s2 + $0x40] sm:$0xff] }
 0x2c9   :  { %v3017_v61 = vpop.eup %3016 }
 0x2ca   :  { %v421_v62 = vmul.f32 %v3017_v61, %v3013_v51 }
 0x2cc   :  { %2812 = vmatmul.mubr.msk.f32.vlgmr.msra.gmra.mxu1 %vm138_vm0, %v421_v62 }
 0x2cd   :  { %v3019_v63 = vpop.eup %3018  ;;  %2822 = vmatpush3.msra.mxu1 %v327_v35  ;;  %2825 = vmatprep.mubr.msk.f32.mxu1 %vm3067_vm2, %v3066_v14  ;;  %v921_v35 = vadd.f32 %v2572_v31, %v920_v34 }
 0x2ce   :  { %2823 = vmatprep.subr.mxu1 %v3066_v14  ;;  %v585_v2 = vmul.f32 %v3019_v63, %v3015_v53 }
 0x2cf   :  { %2824 = vmatpush3.msra.mxu1 %v322_v0 }
 0x2d0   :  { %2826 = vmatmul.mubr.msk.f32.vlgmr.msra.gmra.mxu1 %vm138_vm0, %v585_v2  ;;  %2839 = vmatprep.subr.mxu1 %v2562_v1  ;;  %v931_v2 = vadd.f32 %v2572_v31, %v930_v40 }
 0x2d1   :  { %2840 = vmatpush3.msra.mxu1 %v2562_v1  ;;  %2843 = vmatprep.mubr.msk.f32.mxu1 %vm138_vm0, %v3133_v4 }
 0x2d2   :  { %2841 = vmatprep.subr.mxu1 %v2561_v3 }
 0x2d3   :  { %2842 = vmatpush3.msra.mxu1 %v2561_v3  ;;  %v2594_v3 = vld [vmem:[%s3506_s4 + $0x28] sm:$0xff] }
 0x2d4   :  { %2844 = vmatmul.mubr.msk.f32.vlgmr.msra.gmra.mxu1 %vm138_vm0, %v3141_v6  ;;  %2859 = vmatprep.subr.mxu1 %v3066_v14 }
 0x2d5   :  { %2846 = vmatprep.mubr.msk.f32.mxu1 %vm138_vm0, %v3156_v9 }
 0x2d8   :  { %2847 = vmatmul.mubr.msk.f32.gmra.mxu1 %vm138_vm0, %v3170_v11 }
 0x2d9   :  { %2863 = vmatprep.mubr.msk.f32.mxu1 %vm3067_vm2, %v3066_v14 }
 0x38c   :  { %v3279_v12 = vpop.f32.mrf.mxu1 }
 0x38e   :  { %v2813_v13 = vpop.f32.mrf.mxu1 }
 0x38f   :  { %v2602_v13 = vld [vmem:[%s3508_s6 + $0x28] sm:$0xff] }
 0x390   :  { %v3281_v15 = vpop.f32.mrf.mxu1 }
 0x392   :  { %v2827_v16 = vpop.f32.mrf.mxu1 }
 0x393   :  { %v2601_v16 = vld [vmem:[%s3508_s6 + $0x20] sm:$0xff] }
 0x394   :  { %v2845_v18 = vpop.f32.mrf.mxu1 }
 0x395   :  { %v830_v19 = vadd.f32 %v2845_v18, %v2564_v17 }
 0x396   :  { %v824_v21 = vpop.f32.mrf.mxu1 }
 0x397   :  { %2860 = vmatpush3.xpose.msk.msra.mxu1 %vm330_vm3, %v830_v19  ;;  %v825_v23 = vadd.f32 %v2564_v17, %v824_v21  ;;  %v2596_v21 = vld [vmem:[%s3507_s5 + $0x2] ss:$0 sm:$0xff] }
 0x398   :  { %v2848_v22 = vpop.f32.mrf.mxu1  ;;  %2861 = vmatprep.subr.mxu1 %v3066_v14 }
 0x399   :  { %v840_v25 = vadd.f32 %v2848_v22, %v2564_v17 }
 0x39a   :  { %v834_v27 = vpop.f32.mrf.mxu1 }
 0x39b   :  { %2862 = vmatpush3.xpose.msk.msra.mxu1 %vm330_vm3, %v825_v23  ;;  %2874 = vmatpush3.xpose.msk.msra.mxu0 %vm330_vm3, %v840_v25  ;;  %v835_v29 = vadd.f32 %v2564_v17, %v834_v27 }
 0x39c   :  { %2875 = vmatprep.subr.mxu0 %v3066_v14  ;;  %2866 = vmatprep.subr.mxu1 %v3066_v14 }
 0x39e   :  { %2864 = vmatmul.mubr.msk.f32.vlgmr.msra.gmra.mxu1 %vm330_vm3, %v739_v28  ;;  %v2590_v28 = vld [vmem:[%s3505_s3 + $0x2] ss:$0 sm:$0xff] }
 0x39f   :  { %2876 = vmatpush3.xpose.msk.msra.mxu0 %vm330_vm3, %v835_v29  ;;  %2870 = vmatprep.mubr.msk.f32.mxu1 %vm3067_vm2, %v3066_v14 }
 0x3a0   :  { %2867 = vmatpush3.msra.mxu1 %v926_v33  ;;  %2887 = vmatprep.subr.mxu0 %v2588_v57 }
 0x3a1   :  { %2868 = vmatprep.subr.mxu1 %v3066_v14 }
 0x3a2   :  { %2878 = vmatmul.mubr.msk.f32.vlgmr.msra.gmra.mxu0 %vm330_vm3, %v744_v30  ;;  %2869 = vmatpush3.msra.mxu1 %v921_v35  ;;  %v2604_v35 = vld [vmem:[%s3509_s7 + $0x2] ss:$0 sm:$0xff] }
 0x3a3   :  { %2895 = vmatprep.mubr.msk.f32.mxu0 %vm47_vm1, %v3149_v8  ;;  %2880 = vmatprep.subr.mxu1 %v3066_v14 }
 0x3a4   :  { %2888 = vmatpush3.msra.mxu0 %v2588_v57 }
 0x3a5   :  { %2889 = vmatprep.subr.mxu0 %v2587_v58 }
 0x3a6   :  { %2890 = vmatpush3.msra.mxu0 %v2587_v58 }
 0x3a7   :  { %2891 = vmatprep.subr.mxu0 %v2586_v59 }
 0x3a8   :  { %2892 = vmatpush3.msra.mxu0 %v2586_v59 }
 0x3a9   :  { %2893 = vmatprep.subr.mxu0 %v2585_v60 }
 0x3aa   :  { %2894 = vmatpush3.msra.mxu0 %v2585_v60  ;;  %v2620_v60 = vld [vmem:[%s3504_s2 + $0x78] sm:$0xff] }
 0x3ab   :  { %2896 = vmatmul.mubr.msk.f32.vlgmr.msra.gmra.mxu0 %vm47_vm1, %v3163_v10  ;;  %2908 = vmatprep.subr.mxu0 %v2602_v13 }
 0x3ac   :  { %2912 = vmatprep.mubr.msk.f32.mxu0 %vm138_vm0, %v3133_v4  ;;  %2909 = vmatpush3.msra.mxu0 %v2602_v13 }
 0x3ad   :  { %2910 = vmatprep.subr.mxu0 %v2601_v16 }
 0x3ae   :  { %2911 = vmatpush3.msra.mxu0 %v2601_v16  ;;  %v2625_v16 = vld [vmem:[%s3506_s4 + $0x30] sm:$0xff] }
 0x3af   :  { %2913 = vmatmul.mubr.msk.f32.vlgmr.msra.gmra.mxu0 %vm138_vm0, %v3141_v6  ;;  %2932 = vmatprep.subr.mxu0 %v3066_v14 }
 0x3b0   :  { %2915 = vmatprep.mubr.msk.f32.mxu0 %vm138_vm0, %v3156_v9 }
 0x3b3   :  { %2916 = vmatmul.mubr.msk.f32.gmra.mxu0 %vm138_vm0, %v3170_v11 }
 0x3b4   :  { %2936 = vmatprep.mubr.msk.f32.mxu0 %vm3067_vm2, %v3066_v14 }
 0x45e   :  { %v1014_v38 = vpop.f32.mrf.mxu1 }
 0x45f   :  { %v1018_v39 = vmul.f32 0.35355338, %v1014_v38 }
 0x460   :  { %v2865_v41 = vpop.f32.mrf.mxu1 }
 0x461   :  { %v1019_v42 = vsel %vm138_vm0, %v1018_v39, -inf }
 0x462   :  { %v1178_v43 = vpop.f32.mrf.mxu0  ;;  %1020 = vmax.xlane.f32.xlu0 %v1019_v42 }
 0x463   :  { %v1182_v44 = vmul.f32 0.35355338, %v1178_v43 }
 0x464   :  { %v2879_v45 = vpop.f32.mrf.mxu0 }
 0x465   :  { %v1183_v46 = vsel %vm138_vm0, %v1182_v44, -inf }
 0x466   :  { %1184 = vmax.xlane.f32.xlu1 %v1183_v46 }
 0x46b   :  { %v2897_v24 = vpop.f32.mrf.mxu0 }
 0x46c   :  { %v1352_v34 = vadd.f32 %v2897_v24, %v2590_v28 }
 0x46d   :  { %v1346_v30 = vpop.f32.mrf.mxu0 }
 0x46e   :  { %v1347_v32 = vadd.f32 %v2590_v28, %v1346_v30  ;;  %v2622_v28 = vld [vmem:[%s3505_s3 + $0x3] ss:$0 sm:$0xff] }
 0x46f   :  { %v2914_v36 = vpop.f32.mrf.mxu0 }
 0x471   :  { %v1528_v38 = vpop.f32.mrf.mxu0 }
 0x473   :  { %v2917_v40 = vpop.f32.mrf.mxu0 }
 0x474   :  { %v1544_v41 = vadd.f32 %v2917_v40, %v2604_v35 }
 0x4eb   :  { %v1021_v47 = vpop.xlane.xlu0 %1020 }
 0x4ec   :  { %v1022_v48 = vsub.f32 %v1018_v39, %v1021_v47  ;;  %v1529_v39 = vadd.f32 %v2604_v35, %v1528_v38 }
 0x4ee   :  { %v1023_v49 = vmul.f32 1.442695, %v1022_v48 }
 0x4ef   :  { %v1185_v50 = vpop.xlane.xlu1 %1184 }
 0x4f0   :  { %3020 = vpow2.f32 %v1023_v49  ;;  %v1186_v51 = vsub.f32 %v1182_v44, %v1185_v50  ;;  %v1538_v44 = vpop.f32.mrf.mxu0 }
 0x4f2   :  { %v1187_v52 = vmul.f32 1.442695, %v1186_v51 }
 0x4f4   :  { %3022 = vpow2.f32 %v1187_v52 }
 0x4fd   :  { %v3021_v53 = vpop.eup %3020 }
 0x4fe   :  { %v1025_v54 = vsel %vm138_vm0, %v3021_v53, 0.0 }
 0x4ff   :  { %1026 = vadd.xlane.f32.xlu0 %v1025_v54 }
 0x501   :  { %v3023_v55 = vpop.eup %3022 }
 0x502   :  { %v1189_v56 = vsel %vm138_vm0, %v3023_v55, 0.0 }
 0x503   :  { %1190 = vadd.xlane.f32.xlu1 %v1189_v56 }
 0x588   :  { %v1027_v61 = vpop.xlane.xlu0 %1026 }
 0x589   :  { %3024 = vrcp.f32 %v1027_v61  ;;  %v2619_v61 = vld [vmem:[%s3504_s2 + $0x70] sm:$0xff] }
 0x58c   :  { %v1191_v62 = vpop.xlane.xlu1 %1190 }
 0x58d   :  { %3026 = vrcp.f32 %v1191_v62  ;;  %v2618_v62 = vld [vmem:[%s3504_s2 + $0x68] sm:$0xff] }
 0x596   :  { %v3025_v63 = vpop.eup %3024 }
 0x597   :  { %v1029_v0 = vmul.f32 %v3025_v63, %v3021_v53  ;;  %v2617_v63 = vld [vmem:[%s3504_s2 + $0x60] sm:$0xff] }
 0x599   :  { %2871 = vmatmul.mubr.msk.f32.vlgmr.msra.gmra.mxu1 %vm138_vm0, %v1029_v0 }
 0x59a   :  { %v3027_v1 = vpop.eup %3026  ;;  %2881 = vmatpush3.msra.mxu1 %v936_v37  ;;  %2884 = vmatprep.mubr.msk.f32.mxu1 %vm3067_vm2, %v3066_v14  ;;  %v1534_v37 = vadd.f32 %v2914_v36, %v2604_v35 }
 0x59b   :  { %2882 = vmatprep.subr.mxu1 %v3066_v14  ;;  %v1193_v5 = vmul.f32 %v3027_v1, %v3023_v55 }
 0x59c   :  { %2883 = vmatpush3.msra.mxu1 %v931_v2 }
 0x59d   :  { %2885 = vmatmul.mubr.msk.f32.vlgmr.msra.gmra.mxu1 %vm138_vm0, %v1193_v5  ;;  %2898 = vmatprep.subr.mxu1 %v2594_v3 }
 0x59e   :  { %2899 = vmatpush3.msra.mxu1 %v2594_v3  ;;  %2902 = vmatprep.mubr.msk.f32.mxu1 %vm138_vm0, %v3133_v4 }
 0x59f   :  { %2900 = vmatprep.subr.mxu1 %v2593_v7 }
 0x5a0   :  { %2901 = vmatpush3.msra.mxu1 %v2593_v7  ;;  %v1539_v7 = vadd.f32 %v2604_v35, %v1538_v44  ;;  %v2636_v35 = vld [vmem:[%s3509_s7 + $0x3] ss:$0 sm:$0xff]  ;;  %s3068_s7 = smov 8  }
 0x5a1   :  { %2903 = vmatmul.mubr.msk.f32.vlgmr.msra.gmra.mxu1 %vm138_vm0, %v3141_v6  ;;  %2918 = vmatprep.subr.mxu1 %v3066_v14 }
 0x5a2   :  { %2905 = vmatprep.mubr.msk.f32.mxu1 %vm138_vm0, %v3156_v9 }
 0x5a5   :  { %2906 = vmatmul.mubr.msk.f32.gmra.mxu1 %vm138_vm0, %v3170_v11 }
 0x5a6   :  { %2922 = vmatprep.mubr.msk.f32.mxu1 %vm3067_vm2, %v3066_v14 }
 0x659   :  { %v3364_v17 = vpop.f32.mrf.mxu1 }
 0x65b   :  { %v2872_v18 = vpop.f32.mrf.mxu1 }
 0x65c   :  { %v2633_v18 = vld [vmem:[%s3508_s6 + $0x30] sm:$0xff] }
 0x65d   :  { %v3366_v19 = vpop.f32.mrf.mxu1 }
 0x65f   :  { %v2886_v20 = vpop.f32.mrf.mxu1 }
 0x661   :  { %v2904_v22 = vpop.f32.mrf.mxu1 }
 0x662   :  { %v1438_v23 = vadd.f32 %v2904_v22, %v2596_v21 }
 0x663   :  { %v1432_v25 = vpop.f32.mrf.mxu1 }
 0x664   :  { %2919 = vmatpush3.xpose.msk.msra.mxu1 %vm330_vm3, %v1438_v23  ;;  %v1433_v27 = vadd.f32 %v2596_v21, %v1432_v25 }
 0x665   :  { %v2907_v26 = vpop.f32.mrf.mxu1  ;;  %2920 = vmatprep.subr.mxu1 %v3066_v14 }
 0x666   :  { %v1448_v29 = vadd.f32 %v2907_v26, %v2596_v21 }
 0x667   :  { %v1442_v31 = vpop.f32.mrf.mxu1 }
 0x668   :  { %2921 = vmatpush3.xpose.msk.msra.mxu1 %vm330_vm3, %v1433_v27  ;;  %2933 = vmatpush3.xpose.msk.msra.mxu0 %vm330_vm3, %v1448_v29  ;;  %v1443_v33 = vadd.f32 %v2596_v21, %v1442_v31 }
 0x669   :  { %2934 = vmatprep.subr.mxu0 %v3066_v14  ;;  %2925 = vmatprep.subr.mxu1 %v3066_v14 }
 0x66b   :  { %2923 = vmatmul.mubr.msk.f32.vlgmr.msra.gmra.mxu1 %vm330_vm3, %v1347_v32 }
 0x66c   :  { %2935 = vmatpush3.xpose.msk.msra.mxu0 %vm330_vm3, %v1443_v33  ;;  %2929 = vmatprep.mubr.msk.f32.mxu1 %vm3067_vm2, %v3066_v14 }
 0x66d   :  { %2926 = vmatpush3.msra.mxu1 %v1534_v37  ;;  %2946 = vmatprep.subr.mxu0 %v2620_v60 }
 0x66e   :  { %2927 = vmatprep.subr.mxu1 %v3066_v14 }
 0x66f   :  { %2937 = vmatmul.mubr.msk.f32.vlgmr.msra.gmra.mxu0 %vm330_vm3, %v1352_v34  ;;  %2928 = vmatpush3.msra.mxu1 %v1529_v39 }
 0x670   :  { %2954 = vmatprep.mubr.msk.f32.mxu0 %vm47_vm1, %v3149_v8  ;;  %2939 = vmatprep.subr.mxu1 %v3066_v14 }
 0x671   :  { %2947 = vmatpush3.msra.mxu0 %v2620_v60 }
 0x672   :  { %2948 = vmatprep.subr.mxu0 %v2619_v61 }
 0x673   :  { %2949 = vmatpush3.msra.mxu0 %v2619_v61 }
 0x674   :  { %2950 = vmatprep.subr.mxu0 %v2618_v62 }
 0x675   :  { %2951 = vmatpush3.msra.mxu0 %v2618_v62 }
 0x676   :  { %2952 = vmatprep.subr.mxu0 %v2617_v63 }
 0x677   :  { %2953 = vmatpush3.msra.mxu0 %v2617_v63 }
 0x678   :  { %2955 = vmatmul.mubr.msk.f32.vlgmr.msra.gmra.mxu0 %vm47_vm1, %v3163_v10  ;;  %v2626_v10 = vld [vmem:[%s3506_s4 + $0x38] sm:$0xff] }
 0x679   :  { %2971 = vmatprep.mubr.msk.f32.mxu0 %vm138_vm0, %v3133_v4 }
 0x72b   :  { %v1622_v42 = vpop.f32.mrf.mxu1 }
 0x72c   :  { %v1626_v43 = vmul.f32 0.35355338, %v1622_v42 }
 0x72d   :  { %v2924_v8 = vpop.f32.mrf.mxu1 }
 0x72e   :  { %v1627_v45 = vsel %vm138_vm0, %v1626_v43, -inf }
 0x72f   :  { %v1786_v46 = vpop.f32.mrf.mxu0  ;;  %1628 = vmax.xlane.f32.xlu0 %v1627_v45 }
 0x730   :  { %v1790_v47 = vmul.f32 0.35355338, %v1786_v46 }
 0x731   :  { %v2938_v48 = vpop.f32.mrf.mxu0 }
 0x732   :  { %v1791_v49 = vsel %vm138_vm0, %v1790_v47, -inf }
 0x733   :  { %1792 = vmax.xlane.f32.xlu1 %v1791_v49 }
 0x738   :  { %v2956_v26 = vpop.f32.mrf.mxu0 }
 0x739   :  { %v1960_v34 = vadd.f32 %v2956_v26, %v2622_v28 }
 0x73a   :  { %v1954_v30 = vpop.f32.mrf.mxu0 }
 0x73b   :  { %v1955_v32 = vadd.f32 %v2622_v28, %v1954_v30 }
 0x7b8   :  { %v1629_v50 = vpop.xlane.xlu0 %1628 }
 0x7b9   :  { %v1630_v51 = vsub.f32 %v1626_v43, %v1629_v50 }
 0x7bb   :  { %v1631_v52 = vmul.f32 1.442695, %v1630_v51 }
 0x7bc   :  { %v1793_v53 = vpop.xlane.xlu1 %1792 }
 0x7bd   :  { %3028 = vpow2.f32 %v1631_v52  ;;  %v1794_v54 = vsub.f32 %v1790_v47, %v1793_v53 }
 0x7bf   :  { %v1795_v55 = vmul.f32 1.442695, %v1794_v54 }
 0x7c1   :  { %3030 = vpow2.f32 %v1795_v55 }
 0x7ca   :  { %v3029_v56 = vpop.eup %3028 }
 0x7cb   :  { %v1633_v57 = vsel %vm138_vm0, %v3029_v56, 0.0 }
 0x7cc   :  { %1634 = vadd.xlane.f32.xlu0 %v1633_v57 }
 0x7ce   :  { %v3031_v58 = vpop.eup %3030 }
 0x7cf   :  { %v1797_v59 = vsel %vm138_vm0, %v3031_v58, 0.0 }
 0x7d0   :  { %1798 = vadd.xlane.f32.xlu1 %v1797_v59 }
 0x855   :  { %v1635_v0 = vpop.xlane.xlu0 %1634 }
 0x856   :  { %3032 = vrcp.f32 %v1635_v0 }
 0x859   :  { %v1799_v1 = vpop.xlane.xlu1 %1798 }
 0x85a   :  { %3034 = vrcp.f32 %v1799_v1 }
 0x863   :  { %v3033_v2 = vpop.eup %3032 }
 0x864   :  { %v1637_v3 = vmul.f32 %v3033_v2, %v3029_v56 }
 0x866   :  { %2930 = vmatmul.mubr.msk.f32.vlgmr.msra.gmra.mxu1 %vm138_vm0, %v1637_v3 }
 0x867   :  { %v3035_v5 = vpop.eup %3034  ;;  %2940 = vmatpush3.msra.mxu1 %v1544_v41  ;;  %2943 = vmatprep.mubr.msk.f32.mxu1 %vm3067_vm2, %v3066_v14 }
 0x868   :  { %2941 = vmatprep.subr.mxu1 %v3066_v14  ;;  %v1801_v13 = vmul.f32 %v3035_v5, %v3031_v58 }
 0x869   :  { %2942 = vmatpush3.msra.mxu1 %v1539_v7 }
 0x86a   :  { %2944 = vmatmul.mubr.msk.f32.vlgmr.msra.gmra.mxu1 %vm138_vm0, %v1801_v13  ;;  %2957 = vmatprep.subr.mxu1 %v2626_v10 }
 0x86b   :  { %2958 = vmatpush3.msra.mxu1 %v2626_v10  ;;  %2961 = vmatprep.mubr.msk.f32.mxu1 %vm138_vm0, %v3133_v4  ;;  %v2634_v4 = vld [vmem:[%s3508_s6 + $0x38] sm:$0xff] }
 0x86c   :  { %2959 = vmatprep.subr.mxu1 %v2625_v16  ;;  %2967 = vmatprep.subr.mxu0 %v2634_v4 }
 0x86d   :  { %2960 = vmatpush3.msra.mxu1 %v2625_v16  ;;  %2968 = vmatpush3.msra.mxu0 %v2634_v4 }
 0x86e   :  { %2962 = vmatmul.mubr.msk.f32.vlgmr.msra.gmra.mxu1 %vm138_vm0, %v3141_v6  ;;  %2977 = vmatprep.subr.mxu1 %v3066_v14 }
 0x86f   :  { %2964 = vmatprep.mubr.msk.f32.mxu1 %vm138_vm0, %v3156_v9  ;;  %2969 = vmatprep.subr.mxu0 %v2633_v18 }
 0x870   :  { %2970 = vmatpush3.msra.mxu0 %v2633_v18 }
 0x871   :  { %2972 = vmatmul.mubr.msk.f32.vlgmr.msra.gmra.mxu0 %vm138_vm0, %v3141_v6  ;;  %2991 = vmatprep.subr.mxu0 %v3066_v14  ;;  %v2628_v6 = vld [vmem:[%s3507_s5 + $0x3] ss:$0 sm:$0xff] }
 0x872   :  { %2965 = vmatmul.mubr.msk.f32.gmra.mxu1 %vm138_vm0, %v3170_v11  ;;  %2974 = vmatprep.mubr.msk.f32.mxu0 %vm138_vm0, %v3156_v9 }
 0x873   :  { %2981 = vmatprep.mubr.msk.f32.mxu1 %vm3067_vm2, %v3066_v14 }
 0x875   :  { %2975 = vmatmul.mubr.msk.f32.gmra.mxu0 %vm138_vm0, %v3170_v11 }
 0x876   :  { %2995 = vmatprep.mubr.msk.f32.mxu0 %vm3067_vm2, %v3066_v14 }
 0x926   :  { %v3449_v20 = vpop.f32.mrf.mxu1 }
 0x928   :  { %v2931_v21 = vpop.f32.mrf.mxu1 }
 0x92a   :  { %v3451_v22 = vpop.f32.mrf.mxu1 }
 0x92c   :  { %v2945_v23 = vpop.f32.mrf.mxu1 }
 0x92e   :  { %v2963_v24 = vpop.f32.mrf.mxu1 }
 0x92f   :  { %v2046_v25 = vadd.f32 %v2963_v24, %v2628_v6 }
 0x930   :  { %v2040_v9 = vpop.f32.mrf.mxu1 }
 0x931   :  { %2978 = vmatpush3.xpose.msk.msra.mxu1 %vm330_vm3, %v2046_v25  ;;  %v2041_v27 = vadd.f32 %v2628_v6, %v2040_v9  ;;  %v2973_v36 = vpop.f32.mrf.mxu0 }
 0x932   :  { %v2966_v11 = vpop.f32.mrf.mxu1  ;;  %2979 = vmatprep.subr.mxu1 %v3066_v14  ;;  %v2142_v37 = vadd.f32 %v2973_v36, %v2636_v35 }
 0x933   :  { %v2056_v29 = vadd.f32 %v2966_v11, %v2628_v6  ;;  %v2136_v38 = vpop.f32.mrf.mxu0 }
 0x934   :  { %v2050_v31 = vpop.f32.mrf.mxu1  ;;  %v2137_v39 = vadd.f32 %v2636_v35, %v2136_v38 }
 0x935   :  { %2980 = vmatpush3.xpose.msk.msra.mxu1 %vm330_vm3, %v2041_v27  ;;  %2992 = vmatpush3.xpose.msk.msra.mxu0 %vm330_vm3, %v2056_v29  ;;  %v2051_v33 = vadd.f32 %v2628_v6, %v2050_v31  ;;  %v2976_v40 = vpop.f32.mrf.mxu0 }
 0x936   :  { %2993 = vmatprep.subr.mxu0 %v3066_v14  ;;  %2984 = vmatprep.subr.mxu1 %v3066_v14  ;;  %v2152_v41 = vadd.f32 %v2976_v40, %v2636_v35 }
 0x937   :  { %v2146_v44 = vpop.f32.mrf.mxu0 }
 0x938   :  { %2982 = vmatmul.mubr.msk.f32.vlgmr.msra.gmra.mxu1 %vm330_vm3, %v1955_v32  ;;  %v2147_v1 = vadd.f32 %v2636_v35, %v2146_v44 }
 0x939   :  { %2994 = vmatpush3.xpose.msk.msra.mxu0 %vm330_vm3, %v2051_v33  ;;  %2988 = vmatprep.mubr.msk.f32.mxu1 %vm3067_vm2, %v3066_v14 }
 0x93a   :  { %2985 = vmatpush3.msra.mxu1 %v2142_v37 }
 0x93b   :  { %2986 = vmatprep.subr.mxu1 %v3066_v14 }
 0x93c   :  { %2996 = vmatmul.mubr.msk.f32.vlgmr.msra.gmra.mxu0 %vm330_vm3, %v1960_v34  ;;  %2987 = vmatpush3.msra.mxu1 %v2137_v39 }
 0x93d   :  { %2998 = vmatprep.subr.mxu1 %v3066_v14 }
 0x9f8   :  { %v2230_v42 = vpop.f32.mrf.mxu1 }
 0x9f9   :  { %v2234_v43 = vmul.f32 0.35355338, %v2230_v42 }
 0x9fa   :  { %v2983_v8 = vpop.f32.mrf.mxu1 }
 0x9fb   :  { %v2235_v45 = vsel %vm138_vm0, %v2234_v43, -inf }
 0x9fc   :  { %v2394_v46 = vpop.f32.mrf.mxu0  ;;  %2236 = vmax.xlane.f32.xlu0 %v2235_v45 }
 0x9fd   :  { %v2398_v47 = vmul.f32 0.35355338, %v2394_v46 }
 0x9fe   :  { %v2997_v48 = vpop.f32.mrf.mxu0 }
 0x9ff   :  { %v2399_v49 = vsel %vm138_vm0, %v2398_v47, -inf }
 0xa00   :  { %2400 = vmax.xlane.f32.xlu1 %v2399_v49 }
 0xa85   :  { %v2237_v50 = vpop.xlane.xlu0 %2236 }
 0xa86   :  { %v2238_v51 = vsub.f32 %v2234_v43, %v2237_v50 }
 0xa88   :  { %v2239_v52 = vmul.f32 1.442695, %v2238_v51 }
 0xa89   :  { %v2401_v53 = vpop.xlane.xlu1 %2400 }
 0xa8a   :  { %3036 = vpow2.f32 %v2239_v52  ;;  %v2402_v54 = vsub.f32 %v2398_v47, %v2401_v53 }
 0xa8c   :  { %v2403_v55 = vmul.f32 1.442695, %v2402_v54 }
 0xa8e   :  { %3038 = vpow2.f32 %v2403_v55 }
 0xa97   :  { %v3037_v56 = vpop.eup %3036 }
 0xa98   :  { %v2241_v57 = vsel %vm138_vm0, %v3037_v56, 0.0 }
 0xa99   :  { %2242 = vadd.xlane.f32.xlu0 %v2241_v57 }
 0xa9b   :  { %v3039_v58 = vpop.eup %3038 }
 0xa9c   :  { %v2405_v59 = vsel %vm138_vm0, %v3039_v58, 0.0 }
 0xa9d   :  { %2406 = vadd.xlane.f32.xlu1 %v2405_v59 }
 0xaae   :  { %2487 = vrot.lane.b32.xlu1 %v3366_v19, %s3068_s7 }
 0xaaf   :  { %2485 = vrot.lane.b32.xlu0 %v3364_v17, %s3068_s7 }
 0xab2   :  { %2493 = vrot.lane.b32.xlu1 %v3449_v20, %s3069_s28 }
 0xab6   :  { %2495 = vrot.lane.b32.xlu1 %v3451_v22, %s3069_s28 }
 0xb22   :  { %v2243_v60 = vpop.xlane.xlu0 %2242 }
 0xb23   :  { %3040 = vrcp.f32 %v2243_v60 }
 0xb26   :  { %v2407_v61 = vpop.xlane.xlu1 %2406  ;;  %v2486_v13 = vpop.permute.xlu0 %2485 }
 0xb27   :  { %3042 = vrcp.f32 %v2407_v61  ;;  %v2507_v16 = vsel %vm330_vm3, %v3279_v12, %v2486_v13 }
 0xb2a   :  { %v2488_v7 = vpop.permute.xlu1 %2487 }
 0xb2b   :  { %v2508_v21 = vsel %vm330_vm3, %v3281_v15, %v2488_v7 }
 0xb2e   :  { %v2494_v10 = vpop.permute.xlu1 %2493 }
 0xb30   :  { %v3041_v62 = vpop.eup %3040 }
 0xb31   :  { %v2245_v63 = vmul.f32 %v3041_v62, %v3037_v56 }
 0xb32   :  { %v2496_v4 = vpop.permute.xlu1 %2495 }
 0xb33   :  { %2989 = vmatmul.mubr.msk.f32.vlgmr.msra.gmra.mxu1 %vm138_vm0, %v2245_v63  ;;  %v2510_v22 = vsel %vm138_vm0, %v2508_v21, %v2496_v4 }
 0xb34   :  { %v3043_v0 = vpop.eup %3042  ;;  %2999 = vmatpush3.msra.mxu1 %v2152_v41  ;;  %3002 = vmatprep.mubr.msk.f32.mxu1 %vm3067_vm2, %v3066_v14 }
 0xb35   :  { %3000 = vmatprep.subr.mxu1 %v3066_v14  ;;  %v2409_v17 = vmul.f32 %v3043_v0, %v3039_v58  ;;  %v2509_v14 = vsel %vm138_vm0, %v2507_v16, %v2494_v10 }
 0xb36   :  { %3001 = vmatpush3.msra.mxu1 %v2147_v1 }
 0xb37   :  { %3003 = vmatmul.mubr.msk.f32.vlgmr.msra.gmra.mxu1 %vm138_vm0, %v2409_v17 }
 0xbf3   :  { %v2315_v19 = vpop.f32.mrf.mxu1 }
 0xbf4   :  { %2501 = vrot.lane.b32.xlu0 %v2315_v19, %s3070_s0 }
 0xbf5   :  { %v2990_v2 = vpop.f32.mrf.mxu1 }
 0xbf7   :  { %v2479_v3 = vpop.f32.mrf.mxu1 }
 0xbf8   :  { %2503 = vrot.lane.b32.xlu1 %v2479_v3, %s3070_s0 }
 0xbf9   :  { %v3004_v5 = vpop.f32.mrf.mxu1 }
 0xc66   :  { %v2502_v18 = vpop.permute.xlu0 %2501 }
 0xc67   :  { %v2512_v20 = vsel %vm2511_vm4, %v2509_v14, %v2502_v18 }
 0xc68   :  { %2514 = vst.msk [vmem:[#allocation2] sm:$0xff] %vm47_vm1, %v2512_v20 }
 0xc6a   :  { %v2504_v23 = vpop.permute.xlu1 %2503 }
 0xc6b   :  { %v2513_v6 = vsel %vm2511_vm4, %v2510_v22, %v2504_v23 }
 0xc6c   :  { %2515 = vst.msk [vmem:[#allocation2 + $0x8] sm:$0xff] %vm47_vm1, %v2513_v6 }
 0xc6d   :  { %3055 = shalt.err (!%p3052_p4)
}
 0xc6e   :  { %s3072_s9 = smov 128  }
 0xc6f   :  { %2527 = dma.vmem_to_hbm [thread:$0]  %s2522_s1, 256, %s3510_s8, [#allocation3], %s3072_s9, %s3072_s9, %s3068_s7  }
 0xc70   :  { %3064 = dma.done.wait [#allocation3], 256  }
 0xc71   :  { %3065 = vsyncadd [#allocation3], 4294967040 }
 0xc72   :  { %2531 = vsyncpa [#allocation3], 1 }

// kernel: tpu_custom_call.1
= control target key start
LH: loop header
LB: loop body
LE: loop exit
PB: predicated region body
PF: predicated region fallthrough
CT: control target
= control target key end

     0   :  { %vm138_vm0 = vcmask 130048   ;;  %vm47_vm1 = vcmask 261120   ;;  %s3502_s0 = inlined_call_operand.vmem [shape: f32[2,8,32], index: 0, kind: input, shape index: {}]   ;;  %s3503_s1 = inlined_call_operand.vmem [shape: f32[2,16,16], index: 1, kind: input, shape index: {}]   ;;  %s3504_s2 = inlined_call_operand.vmem [shape: f32[4,32,8], index: 2, kind: input, shape index: {}]   ;;  %s3505_s3 = inlined_call_operand.vmem [shape: f32[4,1,8], index: 3, kind: input, shape index: {}]   ;;  %s3506_s4 = inlined_call_operand.vmem [shape: f32[4,16,8], index: 4, kind: input, shape index: {}]   ;;  %s3507_s5 = inlined_call_operand.vmem [shape: f32[4,1,8], index: 5, kind: input, shape index: {}]   ;;  %s3508_s6 = inlined_call_operand.vmem [shape: f32[4,16,8], index: 6, kind: input, shape index: {}]   ;;  %s3509_s7 = inlined_call_operand.vmem [shape: f32[4,1,8], index: 7, kind: input, shape index: {}]   ;;  %s3510_s8 = inlined_call_operand.hbm [shape: f32[2,8,32], index: 8, kind: output, shape index: {}]  }
   0x1   :  { %v39_v0 = vld [vmem:[%s3504_s2 + $0x18] sm:$0xff]  ;;  %v130_v1 = vld [vmem:[%s3506_s4 + $0x8] sm:$0xff]  ;;  %v38_v2 = vld [vmem:[%s3504_s2 + $0x10] sm:$0xff] }
   0x2   :  { %2769 = vmatprep.subr.mxu0 %v39_v0  ;;  %2780 = vmatprep.subr.mxu1 %v130_v1  ;;  %v129_v3 = vld [vmem:[%s3506_s4] sm:$0xff]  ;;  %v37_v5 = vld [vmem:[%s3504_s2 + $0x8] sm:$0xff] }
   0x3   :  { %2770 = vmatpush3.msra.mxu0 %v39_v0  ;;  %2781 = vmatpush3.msra.mxu1 %v130_v1  ;;  %v3133_v4 = vld [vmem:[%s3503_s1] sm:$0xff]  ;;  %v3141_v6 = vld [vmem:[%s3503_s1 + $0x8] sm:$0xff] }
   0x4   :  { %2771 = vmatprep.subr.mxu0 %v38_v2  ;;  %2782 = vmatprep.subr.mxu1 %v129_v3  ;;  %v36_v7 = vld [vmem:[%s3504_s2] sm:$0xff] }
   0x5   :  { %2772 = vmatpush3.msra.mxu0 %v38_v2  ;;  %2783 = vmatpush3.msra.mxu1 %v129_v3  ;;  %v3149_v8 = vld [vmem:[%s3502_s0] sm:$0xff] }
   0x6   :  { %13 = vsyncpa [#allocation3], 0  ;;  %2784 = vmatprep.mubr.msk.f32.mxu1 %vm138_vm0, %v3133_v4  ;;  %2773 = vmatprep.subr.mxu0 %v37_v5  ;;  %v3156_v9 = vld [vmem:[%s3503_s1 + $0x10] sm:$0xff]  ;;  %v3163_v10 = vld [vmem:[%s3502_s0 + $0x8] sm:$0xff]  ;;  %v3066_v14 = vmov 0.0   ;;  %vm3067_vm2 = vmmov 0  }
   0x7   :  { %2785 = vmatmul.mubr.msk.f32.vlgmr.msra.gmra.mxu1 %vm138_vm0, %v3141_v6  ;;  %2774 = vmatpush3.msra.mxu0 %v37_v5  ;;  %v3170_v11 = vld [vmem:[%s3503_s1 + $0x18] sm:$0xff]  ;;  %v237_v12 = vld [vmem:[%s3508_s6 + $0x8] sm:$0xff]  ;;  %v236_v13 = vld [vmem:[%s3508_s6] sm:$0xff]  ;;  %vm330_vm3 = vcmask 64512   ;;  %s3069_s28 = smov 16   ;;  %s3070_s0 = smov 24  }
   0x8   :  { %2775 = vmatprep.subr.mxu0 %v36_v7  ;;  %2777 = vmatprep.mubr.msk.f32.mxu0 %vm47_vm1, %v3149_v8  ;;  %v2535_v15 = vld [vmem:[%s3507_s5] ss:$0 sm:$0xff]  ;;  %v2556_v55 = vld [vmem:[%s3504_s2 + $0x38] sm:$0xff]  ;;  %v2555_v56 = vld [vmem:[%s3504_s2 + $0x30] sm:$0xff]  ;;  %vm2511_vm4 = vcmask 195584   ;;  %s3071_s29 = smov [#allocation2]  }
   0x9   :  { %2776 = vmatpush3.msra.mxu0 %v36_v7  ;;  %2787 = vmatprep.mubr.msk.f32.mxu1 %vm138_vm0, %v3156_v9  ;;  %v2532_v20 = vld [vmem:[%s3505_s3] ss:$0 sm:$0xff]  ;;  %v2554_v57 = vld [vmem:[%s3504_s2 + $0x28] sm:$0xff]  ;;  %v2562_v1 = vld [vmem:[%s3506_s4 + $0x18] sm:$0xff]  ;;  %s2521_s1 = sshll.u32 %s3071_s29, 4  ;;  %s2522_s1 = int_to_ptr.vmem [resolvable:$true] %s2521_s1 }
   0xa   :  { %2778 = vmatmul.mubr.msk.f32.vlgmr.msra.gmra.mxu0 %vm47_vm1, %v3163_v10  ;;  %2790 = vmatprep.subr.mxu0 %v237_v12  ;;  %v2540_v29 = vld [vmem:[%s3509_s7] ss:$0 sm:$0xff]  ;;  %v2561_v3 = vld [vmem:[%s3506_s4 + $0x10] sm:$0xff]  ;;  %v2570_v5 = vld [vmem:[%s3508_s6 + $0x18] sm:$0xff]  ;;  %s3044_s30 = scalar_lea.vmem %s2522_s1, 256  ;;  %p3049_p1 = scmp.lt.s32.totalorder %s2522_s1, %s2522_s1 }
   0xb   :  { %2788 = vmatmul.mubr.msk.f32.gmra.mxu1 %vm138_vm0, %v3170_v11  ;;  %2794 = vmatprep.mubr.msk.f32.mxu0 %vm138_vm0, %v3133_v4  ;;  %v2553_v58 = vld [vmem:[%s3504_s2 + $0x20] sm:$0xff]  ;;  %v2569_v7 = vld [vmem:[%s3508_s6 + $0x10] sm:$0xff]  ;;  %p3045_p0 = scmp.ne.s32.totalorder %s2522_s1, %s3044_s30  ;;  %p3050_p2 = scmp.lt.s32.totalorder %s3044_s30, %s3044_s30 }
   0xc   :  { %2791 = vmatpush3.msra.mxu0 %v237_v12  ;;  %2800 = vmatprep.subr.mxu1 %v3066_v14 }
   0xd   :  { %2792 = vmatprep.subr.mxu0 %v236_v13  ;;  %2804 = vmatprep.mubr.msk.f32.mxu1 %vm3067_vm2, %v3066_v14  ;;  %p3051_p3 = por %p3050_p2, %p3049_p1 }
   0xe   :  { %2793 = vmatpush3.msra.mxu0 %v236_v13 }
   0xf   :  { %2795 = vmatmul.mubr.msk.f32.vlgmr.msra.gmra.mxu0 %vm138_vm0, %v3141_v6  ;;  %2814 = vmatprep.subr.mxu0 %v3066_v14  ;;  %p3052_p4 = pnand %p3051_p3, %p3045_p0 }
  0x10   :  { %2797 = vmatprep.mubr.msk.f32.mxu0 %vm138_vm0, %v3156_v9 }
  0x13   :  { %2798 = vmatmul.mubr.msk.f32.gmra.mxu0 %vm138_vm0, %v3170_v11 }
  0x14   :  { %2818 = vmatprep.mubr.msk.f32.mxu0 %vm3067_vm2, %v3066_v14 }
  0xc7   :  { %v2786_v16 = vpop.f32.mrf.mxu1 }
  0xc8   :  { %v223_v17 = vadd.f32 %v2786_v16, %v2535_v15 }
  0xc9   :  { %v217_v18 = vpop.f32.mrf.mxu1 }
  0xca   :  { %2801 = vmatpush3.xpose.msk.msra.mxu1 %vm330_vm3, %v223_v17  ;;  %v2779_v19 = vpop.f32.mrf.mxu0  ;;  %v218_v22 = vadd.f32 %v2535_v15, %v217_v18  ;;  %v2564_v17 = vld [vmem:[%s3507_s5 + $0x1] ss:$0 sm:$0xff] }
  0xcb   :  { %v2789_v21 = vpop.f32.mrf.mxu1  ;;  %2802 = vmatprep.subr.mxu1 %v3066_v14  ;;  %v126_v28 = vadd.f32 %v2779_v19, %v2532_v20 }
  0xcc   :  { %v233_v23 = vadd.f32 %v2789_v21, %v2535_v15  ;;  %v120_v24 = vpop.f32.mrf.mxu0 }
  0xcd   :  { %v121_v25 = vadd.f32 %v2532_v20, %v120_v24  ;;  %v227_v26 = vpop.f32.mrf.mxu1  ;;  %v2558_v24 = vld [vmem:[%s3505_s3 + $0x1] ss:$0 sm:$0xff] }
  0xce   :  { %2803 = vmatpush3.xpose.msk.msra.mxu1 %vm330_vm3, %v218_v22  ;;  %2815 = vmatpush3.xpose.msk.msra.mxu0 %vm330_vm3, %v233_v23  ;;  %v228_v27 = vadd.f32 %v2535_v15, %v227_v26 }
  0xcf   :  { %2816 = vmatprep.subr.mxu0 %v3066_v14  ;;  %2807 = vmatprep.subr.mxu1 %v3066_v14  ;;  %v2796_v30 = vpop.f32.mrf.mxu0 }
  0xd0   :  { %v317_v31 = vadd.f32 %v2796_v30, %v2540_v29 }
  0xd1   :  { %2805 = vmatmul.mubr.msk.f32.vlgmr.msra.gmra.mxu1 %vm330_vm3, %v121_v25  ;;  %v311_v32 = vpop.f32.mrf.mxu0 }
  0xd2   :  { %2817 = vmatpush3.xpose.msk.msra.mxu0 %vm330_vm3, %v228_v27  ;;  %2811 = vmatprep.mubr.msk.f32.mxu1 %vm3067_vm2, %v3066_v14  ;;  %v312_v33 = vadd.f32 %v2540_v29, %v311_v32 }
  0xd3   :  { %2808 = vmatpush3.msra.mxu1 %v317_v31  ;;  %v2799_v34 = vpop.f32.mrf.mxu0  ;;  %2828 = vmatprep.subr.mxu0 %v2556_v55  ;;  %v2572_v31 = vld [vmem:[%s3509_s7 + $0x1] ss:$0 sm:$0xff] }
  0xd4   :  { %2809 = vmatprep.subr.mxu1 %v3066_v14  ;;  %v327_v35 = vadd.f32 %v2799_v34, %v2540_v29 }
  0xd5   :  { %2819 = vmatmul.mubr.msk.f32.vlgmr.msra.gmra.mxu0 %vm330_vm3, %v126_v28  ;;  %2810 = vmatpush3.msra.mxu1 %v312_v33  ;;  %v321_v38 = vpop.f32.mrf.mxu0 }
  0xd6   :  { %2836 = vmatprep.mubr.msk.f32.mxu0 %vm47_vm1, %v3149_v8  ;;  %2821 = vmatprep.subr.mxu1 %v3066_v14  ;;  %v322_v0 = vadd.f32 %v2540_v29, %v321_v38 }
  0xd7   :  { %2829 = vmatpush3.msra.mxu0 %v2556_v55 }
  0xd8   :  { %2830 = vmatprep.subr.mxu0 %v2555_v56 }
  0xd9   :  { %2831 = vmatpush3.msra.mxu0 %v2555_v56 }
  0xda   :  { %2832 = vmatprep.subr.mxu0 %v2554_v57 }
  0xdb   :  { %2833 = vmatpush3.msra.mxu0 %v2554_v57  ;;  %v2588_v57 = vld [vmem:[%s3504_s2 + $0x58] sm:$0xff] }
  0xdc   :  { %2834 = vmatprep.subr.mxu0 %v2553_v58 }
  0xdd   :  { %2835 = vmatpush3.msra.mxu0 %v2553_v58  ;;  %v2587_v58 = vld [vmem:[%s3504_s2 + $0x50] sm:$0xff] }
  0xde   :  { %2837 = vmatmul.mubr.msk.f32.vlgmr.msra.gmra.mxu0 %vm47_vm1, %v3163_v10  ;;  %2849 = vmatprep.subr.mxu0 %v2570_v5 }
  0xdf   :  { %2853 = vmatprep.mubr.msk.f32.mxu0 %vm138_vm0, %v3133_v4  ;;  %2850 = vmatpush3.msra.mxu0 %v2570_v5 }
  0xe0   :  { %2851 = vmatprep.subr.mxu0 %v2569_v7 }
  0xe1   :  { %2852 = vmatpush3.msra.mxu0 %v2569_v7  ;;  %v2593_v7 = vld [vmem:[%s3506_s4 + $0x20] sm:$0xff] }
  0xe2   :  { %2854 = vmatmul.mubr.msk.f32.vlgmr.msra.gmra.mxu0 %vm138_vm0, %v3141_v6  ;;  %2873 = vmatprep.subr.mxu0 %v3066_v14 }
  0xe3   :  { %2856 = vmatprep.mubr.msk.f32.mxu0 %vm138_vm0, %v3156_v9 }
  0xe6   :  { %2857 = vmatmul.mubr.msk.f32.gmra.mxu0 %vm138_vm0, %v3170_v11 }
  0xe7   :  { %2877 = vmatprep.mubr.msk.f32.mxu0 %vm3067_vm2, %v3066_v14 }
 0x191   :  { %v406_v36 = vpop.f32.mrf.mxu1 }
 0x192   :  { %v410_v37 = vmul.f32 0.35355338, %v406_v36 }
 0x193   :  { %v2806_v39 = vpop.f32.mrf.mxu1 }
 0x194   :  { %v411_v40 = vsel %vm138_vm0, %v410_v37, -inf }
 0x195   :  { %v570_v41 = vpop.f32.mrf.mxu0  ;;  %412 = vmax.xlane.f32.xlu0 %v411_v40 }
 0x196   :  { %v574_v42 = vmul.f32 0.35355338, %v570_v41 }
 0x197   :  { %v2820_v43 = vpop.f32.mrf.mxu0 }
 0x198   :  { %v575_v44 = vsel %vm138_vm0, %v574_v42, -inf }
 0x199   :  { %576 = vmax.xlane.f32.xlu0 %v575_v44 }
 0x19e   :  { %v2838_v20 = vpop.f32.mrf.mxu0 }
 0x19f   :  { %v744_v30 = vadd.f32 %v2838_v20, %v2558_v24 }
 0x1a0   :  { %v738_v26 = vpop.f32.mrf.mxu0 }
 0x1a1   :  { %v739_v28 = vadd.f32 %v2558_v24, %v738_v26 }
 0x1a2   :  { %v2855_v32 = vpop.f32.mrf.mxu0 }
 0x1a3   :  { %v926_v33 = vadd.f32 %v2855_v32, %v2572_v31 }
 0x1a4   :  { %v920_v34 = vpop.f32.mrf.mxu0 }
 0x1a6   :  { %v2858_v36 = vpop.f32.mrf.mxu0 }
 0x1a8   :  { %v930_v40 = vpop.f32.mrf.mxu0 }
 0x21e   :  { %v413_v45 = vpop.xlane.xlu0 %412 }
 0x21f   :  { %v414_v46 = vsub.f32 %v410_v37, %v413_v45  ;;  %v936_v37 = vadd.f32 %v2858_v36, %v2572_v31 }
 0x221   :  { %v415_v47 = vmul.f32 1.442695, %v414_v46 }
 0x222   :  { %v577_v48 = vpop.xlane.xlu0 %576 }
 0x223   :  { %3012 = vpow2.f32 %v415_v47  ;;  %v578_v49 = vsub.f32 %v574_v42, %v577_v48 }
 0x225   :  { %v579_v50 = vmul.f32 1.442695, %v578_v49 }
 0x227   :  { %3014 = vpow2.f32 %v579_v50 }
 0x230   :  { %v3013_v51 = vpop.eup %3012 }
 0x231   :  { %v417_v52 = vsel %vm138_vm0, %v3013_v51, 0.0 }
 0x232   :  { %418 = vadd.xlane.f32.xlu1 %v417_v52 }
 0x234   :  { %v3015_v53 = vpop.eup %3014 }
 0x235   :  { %v581_v54 = vsel %vm138_vm0, %v3015_v53, 0.0 }
 0x236   :  { %582 = vadd.xlane.f32.xlu1 %v581_v54 }
 0x2bb   :  { %v419_v59 = vpop.xlane.xlu1 %418 }
 0x2bc   :  { %3016 = vrcp.f32 %v419_v59  ;;  %v2586_v59 = vld [vmem:[%s3504_s2 + $0x48] sm:$0xff] }
 0x2bf   :  { %v583_v60 = vpop.xlane.xlu1 %582 }
 0x2c0   :  { %3018 = vrcp.f32 %v583_v60  ;;  %v2585_v60 = vld [vmem:[%s3504_s2 + $0x40] sm:$0xff] }
 0x2c9   :  { %v3017_v61 = vpop.eup %3016 }
 0x2ca   :  { %v421_v62 = vmul.f32 %v3017_v61, %v3013_v51 }
 0x2cc   :  { %2812 = vmatmul.mubr.msk.f32.vlgmr.msra.gmra.mxu1 %vm138_vm0, %v421_v62 }
 0x2cd   :  { %v3019_v63 = vpop.eup %3018  ;;  %2822 = vmatpush3.msra.mxu1 %v327_v35  ;;  %2825 = vmatprep.mubr.msk.f32.mxu1 %vm3067_vm2, %v3066_v14  ;;  %v921_v35 = vadd.f32 %v2572_v31, %v920_v34 }
 0x2ce   :  { %2823 = vmatprep.subr.mxu1 %v3066_v14  ;;  %v585_v2 = vmul.f32 %v3019_v63, %v3015_v53 }
 0x2cf   :  { %2824 = vmatpush3.msra.mxu1 %v322_v0 }
 0x2d0   :  { %2826 = vmatmul.mubr.msk.f32.vlgmr.msra.gmra.mxu1 %vm138_vm0, %v585_v2  ;;  %2839 = vmatprep.subr.mxu1 %v2562_v1  ;;  %v931_v2 = vadd.f32 %v2572_v31, %v930_v40 }
 0x2d1   :  { %2840 = vmatpush3.msra.mxu1 %v2562_v1  ;;  %2843 = vmatprep.mubr.msk.f32.mxu1 %vm138_vm0, %v3133_v4 }
 0x2d2   :  { %2841 = vmatprep.subr.mxu1 %v2561_v3 }
 0x2d3   :  { %2842 = vmatpush3.msra.mxu1 %v2561_v3  ;;  %v2594_v3 = vld [vmem:[%s3506_s4 + $0x28] sm:$0xff] }
 0x2d4   :  { %2844 = vmatmul.mubr.msk.f32.vlgmr.msra.gmra.mxu1 %vm138_vm0, %v3141_v6  ;;  %2859 = vmatprep.subr.mxu1 %v3066_v14 }
 0x2d5   :  { %2846 = vmatprep.mubr.msk.f32.mxu1 %vm138_vm0, %v3156_v9 }
 0x2d8   :  { %2847 = vmatmul.mubr.msk.f32.gmra.mxu1 %vm138_vm0, %v3170_v11 }
 0x2d9   :  { %2863 = vmatprep.mubr.msk.f32.mxu1 %vm3067_vm2, %v3066_v14 }
 0x38c   :  { %v3279_v12 = vpop.f32.mrf.mxu1 }
 0x38e   :  { %v2813_v13 = vpop.f32.mrf.mxu1 }
 0x38f   :  { %v2602_v13 = vld [vmem:[%s3508_s6 + $0x28] sm:$0xff] }
 0x390   :  { %v3281_v15 = vpop.f32.mrf.mxu1 }
 0x392   :  { %v2827_v16 = vpop.f32.mrf.mxu1 }
 0x393   :  { %v2601_v16 = vld [vmem:[%s3508_s6 + $0x20] sm:$0xff] }
 0x394   :  { %v2845_v18 = vpop.f32.mrf.mxu1 }
 0x395   :  { %v830_v19 = vadd.f32 %v2845_v18, %v2564_v17 }
 0x396   :  { %v824_v21 = vpop.f32.mrf.mxu1 }
 0x397   :  { %2860 = vmatpush3.xpose.msk.msra.mxu1 %vm330_vm3, %v830_v19  ;;  %v825_v23 = vadd.f32 %v2564_v17, %v824_v21  ;;  %v2596_v21 = vld [vmem:[%s3507_s5 + $0x2] ss:$0 sm:$0xff] }
 0x398   :  { %v2848_v22 = vpop.f32.mrf.mxu1  ;;  %2861 = vmatprep.subr.mxu1 %v3066_v14 }
 0x399   :  { %v840_v25 = vadd.f32 %v2848_v22, %v2564_v17 }
 0x39a   :  { %v834_v27 = vpop.f32.mrf.mxu1 }
 0x39b   :  { %2862 = vmatpush3.xpose.msk.msra.mxu1 %vm330_vm3, %v825_v23  ;;  %2874 = vmatpush3.xpose.msk.msra.mxu0 %vm330_vm3, %v840_v25  ;;  %v835_v29 = vadd.f32 %v2564_v17, %v834_v27 }
 0x39c   :  { %2875 = vmatprep.subr.mxu0 %v3066_v14  ;;  %2866 = vmatprep.subr.mxu1 %v3066_v14 }
 0x39e   :  { %2864 = vmatmul.mubr.msk.f32.vlgmr.msra.gmra.mxu1 %vm330_vm3, %v739_v28  ;;  %v2590_v28 = vld [vmem:[%s3505_s3 + $0x2] ss:$0 sm:$0xff] }
 0x39f   :  { %2876 = vmatpush3.xpose.msk.msra.mxu0 %vm330_vm3, %v835_v29  ;;  %2870 = vmatprep.mubr.msk.f32.mxu1 %vm3067_vm2, %v3066_v14 }
 0x3a0   :  { %2867 = vmatpush3.msra.mxu1 %v926_v33  ;;  %2887 = vmatprep.subr.mxu0 %v2588_v57 }
 0x3a1   :  { %2868 = vmatprep.subr.mxu1 %v3066_v14 }
 0x3a2   :  { %2878 = vmatmul.mubr.msk.f32.vlgmr.msra.gmra.mxu0 %vm330_vm3, %v744_v30  ;;  %2869 = vmatpush3.msra.mxu1 %v921_v35  ;;  %v2604_v35 = vld [vmem:[%s3509_s7 + $0x2] ss:$0 sm:$0xff] }
 0x3a3   :  { %2895 = vmatprep.mubr.msk.f32.mxu0 %vm47_vm1, %v3149_v8  ;;  %2880 = vmatprep.subr.mxu1 %v3066_v14 }
 0x3a4   :  { %2888 = vmatpush3.msra.mxu0 %v2588_v57 }
 0x3a5   :  { %2889 = vmatprep.subr.mxu0 %v2587_v58 }
 0x3a6   :  { %2890 = vmatpush3.msra.mxu0 %v2587_v58 }
 0x3a7   :  { %2891 = vmatprep.subr.mxu0 %v2586_v59 }
 0x3a8   :  { %2892 = vmatpush3.msra.mxu0 %v2586_v59 }
 0x3a9   :  { %2893 = vmatprep.subr.mxu0 %v2585_v60 }
 0x3aa   :  { %2894 = vmatpush3.msra.mxu0 %v2585_v60  ;;  %v2620_v60 = vld [vmem:[%s3504_s2 + $0x78] sm:$0xff] }
 0x3ab   :  { %2896 = vmatmul.mubr.msk.f32.vlgmr.msra.gmra.mxu0 %vm47_vm1, %v3163_v10  ;;  %2908 = vmatprep.subr.mxu0 %v2602_v13 }
 0x3ac   :  { %2912 = vmatprep.mubr.msk.f32.mxu0 %vm138_vm0, %v3133_v4  ;;  %2909 = vmatpush3.msra.mxu0 %v2602_v13 }
 0x3ad   :  { %2910 = vmatprep.subr.mxu0 %v2601_v16 }
 0x3ae   :  { %2911 = vmatpush3.msra.mxu0 %v2601_v16  ;;  %v2625_v16 = vld [vmem:[%s3506_s4 + $0x30] sm:$0xff] }
 0x3af   :  { %2913 = vmatmul.mubr.msk.f32.vlgmr.msra.gmra.mxu0 %vm138_vm0, %v3141_v6  ;;  %2932 = vmatprep.subr.mxu0 %v3066_v14 }
 0x3b0   :  { %2915 = vmatprep.mubr.msk.f32.mxu0 %vm138_vm0, %v3156_v9 }
 0x3b3   :  { %2916 = vmatmul.mubr.msk.f32.gmra.mxu0 %vm138_vm0, %v3170_v11 }
 0x3b4   :  { %2936 = vmatprep.mubr.msk.f32.mxu0 %vm3067_vm2, %v3066_v14 }
 0x45e   :  { %v1014_v38 = vpop.f32.mrf.mxu1 }
 0x45f   :  { %v1018_v39 = vmul.f32 0.35355338, %v1014_v38 }
 0x460   :  { %v2865_v41 = vpop.f32.mrf.mxu1 }
 0x461   :  { %v1019_v42 = vsel %vm138_vm0, %v1018_v39, -inf }
 0x462   :  { %v1178_v43 = vpop.f32.mrf.mxu0  ;;  %1020 = vmax.xlane.f32.xlu0 %v1019_v42 }
 0x463   :  { %v1182_v44 = vmul.f32 0.35355338, %v1178_v43 }
 0x464   :  { %v2879_v45 = vpop.f32.mrf.mxu0 }
 0x465   :  { %v1183_v46 = vsel %vm138_vm0, %v1182_v44, -inf }
 0x466   :  { %1184 = vmax.xlane.f32.xlu1 %v1183_v46 }
 0x46b   :  { %v2897_v24 = vpop.f32.mrf.mxu0 }
 0x46c   :  { %v1352_v34 = vadd.f32 %v2897_v24, %v2590_v28 }
 0x46d   :  { %v1346_v30 = vpop.f32.mrf.mxu0 }
 0x46e   :  { %v1347_v32 = vadd.f32 %v2590_v28, %v1346_v30  ;;  %v2622_v28 = vld [vmem:[%s3505_s3 + $0x3] ss:$0 sm:$0xff] }
 0x46f   :  { %v2914_v36 = vpop.f32.mrf.mxu0 }
 0x471   :  { %v1528_v38 = vpop.f32.mrf.mxu0 }
 0x473   :  { %v2917_v40 = vpop.f32.mrf.mxu0 }
 0x474   :  { %v1544_v41 = vadd.f32 %v2917_v40, %v2604_v35 }
 0x4eb   :  { %v1021_v47 = vpop.xlane.xlu0 %1020 }
 0x4ec   :  { %v1022_v48 = vsub.f32 %v1018_v39, %v1021_v47  ;;  %v1529_v39 = vadd.f32 %v2604_v35, %v1528_v38 }
 0x4ee   :  { %v1023_v49 = vmul.f32 1.442695, %v1022_v48 }
 0x4ef   :  { %v1185_v50 = vpop.xlane.xlu1 %1184 }
 0x4f0   :  { %3020 = vpow2.f32 %v1023_v49  ;;  %v1186_v51 = vsub.f32 %v1182_v44, %v1185_v50  ;;  %v1538_v44 = vpop.f32.mrf.mxu0 }
 0x4f2   :  { %v1187_v52 = vmul.f32 1.442695, %v1186_v51 }
 0x4f4   :  { %3022 = vpow2.f32 %v1187_v52 }
 0x4fd   :  { %v3021_v53 = vpop.eup %3020 }
 0x4fe   :  { %v1025_v54 = vsel %vm138_vm0, %v3021_v53, 0.0 }
 0x4ff   :  { %1026 = vadd.xlane.f32.xlu0 %v1025_v54 }
 0x501   :  { %v3023_v55 = vpop.eup %3022 }
 0x502   :  { %v1189_v56 = vsel %vm138_vm0, %v3023_v55, 0.0 }
 0x503   :  { %1190 = vadd.xlane.f32.xlu1 %v1189_v56 }
 0x588   :  { %v1027_v61 = vpop.xlane.xlu0 %1026 }
 0x589   :  { %3024 = vrcp.f32 %v1027_v61  ;;  %v2619_v61 = vld [vmem:[%s3504_s2 + $0x70] sm:$0xff] }
 0x58c   :  { %v1191_v62 = vpop.xlane.xlu1 %1190 }
 0x58d   :  { %3026 = vrcp.f32 %v1191_v62  ;;  %v2618_v62 = vld [vmem:[%s3504_s2 + $0x68] sm:$0xff] }
 0x596   :  { %v3025_v63 = vpop.eup %3024 }
 0x597   :  { %v1029_v0 = vmul.f32 %v3025_v63, %v3021_v53  ;;  %v2617_v63 = vld [vmem:[%s3504_s2 + $0x60] sm:$0xff] }
 0x599   :  { %2871 = vmatmul.mubr.msk.f32.vlgmr.msra.gmra.mxu1 %vm138_vm0, %v1029_v0 }
 0x59a   :  { %v3027_v1 = vpop.eup %3026  ;;  %2881 = vmatpush3.msra.mxu1 %v936_v37  ;;  %2884 = vmatprep.mubr.msk.f32.mxu1 %vm3067_vm2, %v3066_v14  ;;  %v1534_v37 = vadd.f32 %v2914_v36, %v2604_v35 }
 0x59b   :  { %2882 = vmatprep.subr.mxu1 %v3066_v14  ;;  %v1193_v5 = vmul.f32 %v3027_v1, %v3023_v55 }
 0x59c   :  { %2883 = vmatpush3.msra.mxu1 %v931_v2 }
 0x59d   :  { %2885 = vmatmul.mubr.msk.f32.vlgmr.msra.gmra.mxu1 %vm138_vm0, %v1193_v5  ;;  %2898 = vmatprep.subr.mxu1 %v2594_v3 }
 0x59e   :  { %2899 = vmatpush3.msra.mxu1 %v2594_v3  ;;  %2902 = vmatprep.mubr.msk.f32.mxu1 %vm138_vm0, %v3133_v4 }
 0x59f   :  { %2900 = vmatprep.subr.mxu1 %v2593_v7 }
 0x5a0   :  { %2901 = vmatpush3.msra.mxu1 %v2593_v7  ;;  %v1539_v7 = vadd.f32 %v2604_v35, %v1538_v44  ;;  %v2636_v35 = vld [vmem:[%s3509_s7 + $0x3] ss:$0 sm:$0xff]  ;;  %s3068_s7 = smov 8  }
 0x5a1   :  { %2903 = vmatmul.mubr.msk.f32.vlgmr.msra.gmra.mxu1 %vm138_vm0, %v3141_v6  ;;  %2918 = vmatprep.subr.mxu1 %v3066_v14 }
 0x5a2   :  { %2905 = vmatprep.mubr.msk.f32.mxu1 %vm138_vm0, %v3156_v9 }
 0x5a5   :  { %2906 = vmatmul.mubr.msk.f32.gmra.mxu1 %vm138_vm0, %v3170_v11 }
 0x5a6   :  { %2922 = vmatprep.mubr.msk.f32.mxu1 %vm3067_vm2, %v3066_v14 }
 0x659   :  { %v3364_v17 = vpop.f32.mrf.mxu1 }
 0x65b   :  { %v2872_v18 = vpop.f32.mrf.mxu1 }
 0x65c   :  { %v2633_v18 = vld [vmem:[%s3508_s6 + $0x30] sm:$0xff] }
 0x65d   :  { %v3366_v19 = vpop.f32.mrf.mxu1 }
 0x65f   :  { %v2886_v20 = vpop.f32.mrf.mxu1 }
 0x661   :  { %v2904_v22 = vpop.f32.mrf.mxu1 }
 0x662   :  { %v1438_v23 = vadd.f32 %v2904_v22, %v2596_v21 }
 0x663   :  { %v1432_v25 = vpop.f32.mrf.mxu1 }
 0x664   :  { %2919 = vmatpush3.xpose.msk.msra.mxu1 %vm330_vm3, %v1438_v23  ;;  %v1433_v27 = vadd.f32 %v2596_v21, %v1432_v25 }
 0x665   :  { %v2907_v26 = vpop.f32.mrf.mxu1  ;;  %2920 = vmatprep.subr.mxu1 %v3066_v14 }
 0x666   :  { %v1448_v29 = vadd.f32 %v2907_v26, %v2596_v21 }
 0x667   :  { %v1442_v31 = vpop.f32.mrf.mxu1 }
 0x668   :  { %2921 = vmatpush3.xpose.msk.msra.mxu1 %vm330_vm3, %v1433_v27  ;;  %2933 = vmatpush3.xpose.msk.msra.mxu0 %vm330_vm3, %v1448_v29  ;;  %v1443_v33 = vadd.f32 %v2596_v21, %v1442_v31 }
 0x669   :  { %2934 = vmatprep.subr.mxu0 %v3066_v14  ;;  %2925 = vmatprep.subr.mxu1 %v3066_v14 }
 0x66b   :  { %2923 = vmatmul.mubr.msk.f32.vlgmr.msra.gmra.mxu1 %vm330_vm3, %v1347_v32 }
 0x66c   :  { %2935 = vmatpush3.xpose.msk.msra.mxu0 %vm330_vm3, %v1443_v33  ;;  %2929 = vmatprep.mubr.msk.f32.mxu1 %vm3067_vm2, %v3066_v14 }
 0x66d   :  { %2926 = vmatpush3.msra.mxu1 %v1534_v37  ;;  %2946 = vmatprep.subr.mxu0 %v2620_v60 }
 0x66e   :  { %2927 = vmatprep.subr.mxu1 %v3066_v14 }
 0x66f   :  { %2937 = vmatmul.mubr.msk.f32.vlgmr.msra.gmra.mxu0 %vm330_vm3, %v1352_v34  ;;  %2928 = vmatpush3.msra.mxu1 %v1529_v39 }
 0x670   :  { %2954 = vmatprep.mubr.msk.f32.mxu0 %vm47_vm1, %v3149_v8  ;;  %2939 = vmatprep.subr.mxu1 %v3066_v14 }
 0x671   :  { %2947 = vmatpush3.msra.mxu0 %v2620_v60 }
 0x672   :  { %2948 = vmatprep.subr.mxu0 %v2619_v61 }
 0x673   :  { %2949 = vmatpush3.msra.mxu0 %v2619_v61 }
 0x674   :  { %2950 = vmatprep.subr.mxu0 %v2618_v62 }
 0x675   :  { %2951 = vmatpush3.msra.mxu0 %v2618_v62 }
 0x676   :  { %2952 = vmatprep.subr.mxu0 %v2617_v63 }
 0x677   :  { %2953 = vmatpush3.msra.mxu0 %v2617_v63 }
 0x678   :  { %2955 = vmatmul.mubr.msk.f32.vlgmr.msra.gmra.mxu0 %vm47_vm1, %v3163_v10  ;;  %v2626_v10 = vld [vmem:[%s3506_s4 + $0x38] sm:$0xff] }
 0x679   :  { %2971 = vmatprep.mubr.msk.f32.mxu0 %vm138_vm0, %v3133_v4 }
 0x72b   :  { %v1622_v42 = vpop.f32.mrf.mxu1 }
 0x72c   :  { %v1626_v43 = vmul.f32 0.35355338, %v1622_v42 }
 0x72d   :  { %v2924_v8 = vpop.f32.mrf.mxu1 }
 0x72e   :  { %v1627_v45 = vsel %vm138_vm0, %v1626_v43, -inf }
 0x72f   :  { %v1786_v46 = vpop.f32.mrf.mxu0  ;;  %1628 = vmax.xlane.f32.xlu0 %v1627_v45 }
 0x730   :  { %v1790_v47 = vmul.f32 0.35355338, %v1786_v46 }
 0x731   :  { %v2938_v48 = vpop.f32.mrf.mxu0 }
 0x732   :  { %v1791_v49 = vsel %vm138_vm0, %v1790_v47, -inf }
 0x733   :  { %1792 = vmax.xlane.f32.xlu1 %v1791_v49 }
 0x738   :  { %v2956_v26 = vpop.f32.mrf.mxu0 }
 0x739   :  { %v1960_v34 = vadd.f32 %v2956_v26, %v2622_v28 }
 0x73a   :  { %v1954_v30 = vpop.f32.mrf.mxu0 }
 0x73b   :  { %v1955_v32 = vadd.f32 %v2622_v28, %v1954_v30 }
 0x7b8   :  { %v1629_v50 = vpop.xlane.xlu0 %1628 }
 0x7b9   :  { %v1630_v51 = vsub.f32 %v1626_v43, %v1629_v50 }
 0x7bb   :  { %v1631_v52 = vmul.f32 1.442695, %v1630_v51 }
 0x7bc   :  { %v1793_v53 = vpop.xlane.xlu1 %1792 }
 0x7bd   :  { %3028 = vpow2.f32 %v1631_v52  ;;  %v1794_v54 = vsub.f32 %v1790_v47, %v1793_v53 }
 0x7bf   :  { %v1795_v55 = vmul.f32 1.442695, %v1794_v54 }
 0x7c1   :  { %3030 = vpow2.f32 %v1795_v55 }
 0x7ca   :  { %v3029_v56 = vpop.eup %3028 }
 0x7cb   :  { %v1633_v57 = vsel %vm138_vm0, %v3029_v56, 0.0 }
 0x7cc   :  { %1634 = vadd.xlane.f32.xlu0 %v1633_v57 }
 0x7ce   :  { %v3031_v58 = vpop.eup %3030 }
 0x7cf   :  { %v1797_v59 = vsel %vm138_vm0, %v3031_v58, 0.0 }
 0x7d0   :  { %1798 = vadd.xlane.f32.xlu1 %v1797_v59 }
 0x855   :  { %v1635_v0 = vpop.xlane.xlu0 %1634 }
 0x856   :  { %3032 = vrcp.f32 %v1635_v0 }
 0x859   :  { %v1799_v1 = vpop.xlane.xlu1 %1798 }
 0x85a   :  { %3034 = vrcp.f32 %v1799_v1 }
 0x863   :  { %v3033_v2 = vpop.eup %3032 }
 0x864   :  { %v1637_v3 = vmul.f32 %v3033_v2, %v3029_v56 }
 0x866   :  { %2930 = vmatmul.mubr.msk.f32.vlgmr.msra.gmra.mxu1 %vm138_vm0, %v1637_v3 }
 0x867   :  { %v3035_v5 = vpop.eup %3034  ;;  %2940 = vmatpush3.msra.mxu1 %v1544_v41  ;;  %2943 = vmatprep.mubr.msk.f32.mxu1 %vm3067_vm2, %v3066_v14 }
 0x868   :  { %2941 = vmatprep.subr.mxu1 %v3066_v14  ;;  %v1801_v13 = vmul.f32 %v3035_v5, %v3031_v58 }
 0x869   :  { %2942 = vmatpush3.msra.mxu1 %v1539_v7 }
 0x86a   :  { %2944 = vmatmul.mubr.msk.f32.vlgmr.msra.gmra.mxu1 %vm138_vm0, %v1801_v13  ;;  %2957 = vmatprep.subr.mxu1 %v2626_v10 }
 0x86b   :  { %2958 = vmatpush3.msra.mxu1 %v2626_v10  ;;  %2961 = vmatprep.mubr.msk.f32.mxu1 %vm138_vm0, %v3133_v4  ;;  %v2634_v4 = vld [vmem:[%s3508_s6 + $0x38] sm:$0xff] }
 0x86c   :  { %2959 = vmatprep.subr.mxu1 %v2625_v16  ;;  %2967 = vmatprep.subr.mxu0 %v2634_v4 }
 0x86d   :  { %2960 = vmatpush3.msra.mxu1 %v2625_v16  ;;  %2968 = vmatpush3.msra.mxu0 %v2634_v4 }
 0x86e   :  { %2962 = vmatmul.mubr.msk.f32.vlgmr.msra.gmra.mxu1 %vm138_vm0, %v3141_v6  ;;  %2977 = vmatprep.subr.mxu1 %v3066_v14 }
 0x86f   :  { %2964 = vmatprep.mubr.msk.f32.mxu1 %vm138_vm0, %v3156_v9  ;;  %2969 = vmatprep.subr.mxu0 %v2633_v18 }
 0x870   :  { %2970 = vmatpush3.msra.mxu0 %v2633_v18 }
 0x871   :  { %2972 = vmatmul.mubr.msk.f32.vlgmr.msra.gmra.mxu0 %vm138_vm0, %v3141_v6  ;;  %2991 = vmatprep.subr.mxu0 %v3066_v14  ;;  %v2628_v6 = vld [vmem:[%s3507_s5 + $0x3] ss:$0 sm:$0xff] }
 0x872   :  { %2965 = vmatmul.mubr.msk.f32.gmra.mxu1 %vm138_vm0, %v3170_v11  ;;  %2974 = vmatprep.mubr.msk.f32.mxu0 %vm138_vm0, %v3156_v9 }
 0x873   :  { %2981 = vmatprep.mubr.msk.f32.mxu1 %vm3067_vm2, %v3066_v14 }
 0x875   :  { %2975 = vmatmul.mubr.msk.f32.gmra.mxu0 %vm138_vm0, %v3170_v11 }
 0x876   :  { %2995 = vmatprep.mubr.msk.f32.mxu0 %vm3067_vm2, %v3066_v14 }
 0x926   :  { %v3449_v20 = vpop.f32.mrf.mxu1 }
 0x928   :  { %v2931_v21 = vpop.f32.mrf.mxu1 }
 0x92a   :  { %v3451_v22 = vpop.f32.mrf.mxu1 }
 0x92c   :  { %v2945_v23 = vpop.f32.mrf.mxu1 }
 0x92e   :  { %v2963_v24 = vpop.f32.mrf.mxu1 }
 0x92f   :  { %v2046_v25 = vadd.f32 %v2963_v24, %v2628_v6 }
 0x930   :  { %v2040_v9 = vpop.f32.mrf.mxu1 }
 0x931   :  { %2978 = vmatpush3.xpose.msk.msra.mxu1 %vm330_vm3, %v2046_v25  ;;  %v2041_v27 = vadd.f32 %v2628_v6, %v2040_v9  ;;  %v2973_v36 = vpop.f32.mrf.mxu0 }
 0x932   :  { %v2966_v11 = vpop.f32.mrf.mxu1  ;;  %2979 = vmatprep.subr.mxu1 %v3066_v14  ;;  %v2142_v37 = vadd.f32 %v2973_v36, %v2636_v35 }
 0x933   :  { %v2056_v29 = vadd.f32 %v2966_v11, %v2628_v6  ;;  %v2136_v38 = vpop.f32.mrf.mxu0 }
 0x934   :  { %v2050_v31 = vpop.f32.mrf.mxu1  ;;  %v2137_v39 = vadd.f32 %v2636_v35, %v2136_v38 }
 0x935   :  { %2980 = vmatpush3.xpose.msk.msra.mxu1 %vm330_vm3, %v2041_v27  ;;  %2992 = vmatpush3.xpose.msk.msra.mxu0 %vm330_vm3, %v2056_v29  ;;  %v2051_v33 = vadd.f32 %v2628_v6, %v2050_v31  ;;  %v2976_v40 = vpop.f32.mrf.mxu0 }
 0x936   :  { %2993 = vmatprep.subr.mxu0 %v3066_v14  ;;  %2984 = vmatprep.subr.mxu1 %v3066_v14  ;;  %v2152_v41 = vadd.f32 %v2976_v40, %v2636_v35 }
 0x937   :  { %v2146_v44 = vpop.f32.mrf.mxu0 }
 0x938   :  { %2982 = vmatmul.mubr.msk.f32.vlgmr.msra.gmra.mxu1 %vm330_vm3, %v1955_v32  ;;  %v2147_v1 = vadd.f32 %v2636_v35, %v2146_v44 }
 0x939   :  { %2994 = vmatpush3.xpose.msk.msra.mxu0 %vm330_vm3, %v2051_v33  ;;  %2988 = vmatprep.mubr.msk.f32.mxu1 %vm3067_vm2, %v3066_v14 }
 0x93a   :  { %2985 = vmatpush3.msra.mxu1 %v2142_v37 }
 0x93b   :  { %2986 = vmatprep.subr.mxu1 %v3066_v14 }
 0x93c   :  { %2996 = vmatmul.mubr.msk.f32.vlgmr.msra.gmra.mxu0 %vm330_vm3, %v1960_v34  ;;  %2987 = vmatpush3.msra.mxu1 %v2137_v39 }
 0x93d   :  { %2998 = vmatprep.subr.mxu1 %v3066_v14 }
 0x9f8   :  { %v2230_v42 = vpop.f32.mrf.mxu1 }
 0x9f9   :  { %v2234_v43 = vmul.f32 0.35355338, %v2230_v42 }
 0x9fa   :  { %v2983_v8 = vpop.f32.mrf.mxu1 }
 0x9fb   :  { %v2235_v45 = vsel %vm138_vm0, %v2234_v43, -inf }
 0x9fc   :  { %v2394_v46 = vpop.f32.mrf.mxu0  ;;  %2236 = vmax.xlane.f32.xlu0 %v2235_v45 }
 0x9fd   :  { %v2398_v47 = vmul.f32 0.35355338, %v2394_v46 }
 0x9fe   :  { %v2997_v48 = vpop.f32.mrf.mxu0 }
 0x9ff   :  { %v2399_v49 = vsel %vm138_vm0, %v2398_v47, -inf }
 0xa00   :  { %2400 = vmax.xlane.f32.xlu1 %v2399_v49 }
 0xa85   :  { %v2237_v50 = vpop.xlane.xlu0 %2236 }
 0xa86   :  { %v2238_v51 = vsub.f32 %v2234_v43, %v2237_v50 }
 0xa88   :  { %v2239_v52 = vmul.f32 1.442695, %v2238_v51 }
 0xa89   :  { %v2401_v53 = vpop.xlane.xlu1 %2400 }
 0xa8a   :  { %3036 = vpow2.f32 %v2239_v52  ;;  %v2402_v54 = vsub.f32 %v2398_v47, %v2401_v53 }
 0xa8c   :  { %v2403_v55 = vmul.f32 1.442695, %v2402_v54 }
 0xa8e   :  { %3038 = vpow2.f32 %v2403_v55 }
 0xa97   :  { %v3037_v56 = vpop.eup %3036 }
 0xa98   :  { %v2241_v57 = vsel %vm138_vm0, %v3037_v56, 0.0 }
 0xa99   :  { %2242 = vadd.xlane.f32.xlu0 %v2241_v57 }
 0xa9b   :  { %v3039_v58 = vpop.eup %3038 }
 0xa9c   :  { %v2405_v59 = vsel %vm138_vm0, %v3039_v58, 0.0 }
 0xa9d   :  { %2406 = vadd.xlane.f32.xlu1 %v2405_v59 }
 0xaae   :  { %2487 = vrot.lane.b32.xlu1 %v3366_v19, %s3068_s7 }
 0xaaf   :  { %2485 = vrot.lane.b32.xlu0 %v3364_v17, %s3068_s7 }
 0xab2   :  { %2493 = vrot.lane.b32.xlu1 %v3449_v20, %s3069_s28 }
 0xab6   :  { %2495 = vrot.lane.b32.xlu1 %v3451_v22, %s3069_s28 }
 0xb22   :  { %v2243_v60 = vpop.xlane.xlu0 %2242 }
 0xb23   :  { %3040 = vrcp.f32 %v2243_v60 }
 0xb26   :  { %v2407_v61 = vpop.xlane.xlu1 %2406  ;;  %v2486_v13 = vpop.permute.xlu0 %2485 }
 0xb27   :  { %3042 = vrcp.f32 %v2407_v61  ;;  %v2507_v16 = vsel %vm330_vm3, %v3279_v12, %v2486_v13 }
 0xb2a   :  { %v2488_v7 = vpop.permute.xlu1 %2487 }
 0xb2b   :  { %v2508_v21 = vsel %vm330_vm3, %v3281_v15, %v2488_v7 }
 0xb2e   :  { %v2494_v10 = vpop.permute.xlu1 %2493 }
 0xb30   :  { %v3041_v62 = vpop.eup %3040 }
 0xb31   :  { %v2245_v63 = vmul.f32 %v3041_v62, %v3037_v56 }
 0xb32   :  { %v2496_v4 = vpop.permute.xlu1 %2495 }
 0xb33   :  { %2989 = vmatmul.mubr.msk.f32.vlgmr.msra.gmra.mxu1 %vm138_vm0, %v2245_v63  ;;  %v2510_v22 = vsel %vm138_vm0, %v2508_v21, %v2496_v4 }
 0xb34   :  { %v3043_v0 = vpop.eup %3042  ;;  %2999 = vmatpush3.msra.mxu1 %v2152_v41  ;;  %3002 = vmatprep.mubr.msk.f32.mxu1 %vm3067_vm2, %v3066_v14 }
 0xb35   :  { %3000 = vmatprep.subr.mxu1 %v3066_v14  ;;  %v2409_v17 = vmul.f32 %v3043_v0, %v3039_v58  ;;  %v2509_v14 = vsel %vm138_vm0, %v2507_v16, %v2494_v10 }
 0xb36   :  { %3001 = vmatpush3.msra.mxu1 %v2147_v1 }
 0xb37   :  { %3003 = vmatmul.mubr.msk.f32.vlgmr.msra.gmra.mxu1 %vm138_vm0, %v2409_v17 }
 0xbf3   :  { %v2315_v19 = vpop.f32.mrf.mxu1 }
 0xbf4   :  { %2501 = vrot.lane.b32.xlu0 %v2315_v19, %s3070_s0 }
 0xbf5   :  { %v2990_v2 = vpop.f32.mrf.mxu1 }
 0xbf7   :  { %v2479_v3 = vpop.f32.mrf.mxu1 }
 0xbf8   :  { %2503 = vrot.lane.b32.xlu1 %v2479_v3, %s3070_s0 }
 0xbf9   :  { %v3004_v5 = vpop.f32.mrf.mxu1 }
 0xc66   :  { %v2502_v18 = vpop.permute.xlu0 %2501 }
 0xc67   :  { %v2512_v20 = vsel %vm2511_vm4, %v2509_v14, %v2502_v18 }
 0xc68   :  { %2514 = vst.msk [vmem:[#allocation2] sm:$0xff] %vm47_vm1, %v2512_v20 }
 0xc6a   :  { %v2504_v23 = vpop.permute.xlu1 %2503 }
 0xc6b   :  { %v2513_v6 = vsel %vm2511_vm4, %v2510_v22, %v2504_v23 }
 0xc6c   :  { %2515 = vst.msk [vmem:[#allocation2 + $0x8] sm:$0xff] %vm47_vm1, %v2513_v6 }
 0xc6d   :  { %3055 = shalt.err (!%p3052_p4)
}
 0xc6e   :  { %s3072_s9 = smov 128  }
 0xc6f   :  { %2527 = dma.vmem_to_hbm [thread:$0]  %s2522_s1, 256, %s3510_s8, [#allocation3], %s3072_s9, %s3072_s9, %s3068_s7  }
 0xc70   :  { %3064 = dma.done.wait [#allocation3], 256  }
 0xc71   :  { %3065 = vsyncadd [#allocation3], 4294967040 }
 0xc72   :  { %2531 = vsyncpa [#allocation3], 1 }

</bundles_post_ra>
